<compile_context>
chip_gen: v6e
topology: v6e:2x2x1
jax: 0.10.0
libtpu: 0.0.40
codegen_flags: <defaults>
</compile_context>

<pallas_src>
import functools

import jax
import jax.numpy as jnp
from jax.experimental import pallas as pl
from jax.experimental.pallas import tpu as pltpu

LAYER_DIMS = [108, 752, 576, 256, 192, 96, 3]  # 6 Linear layers


def _round_up(n, m):
    return ((n + m - 1) // m) * m


# Lane-dense (multiple-of-128) padded layer widths.
PADDED_DIMS = [_round_up(d, 128) for d in LAYER_DIMS]

# Generation-dependent choices (resolved once at import; backend is TPU).
_DEVICE_KIND = jax.devices()[0].device_kind.lower()
# bf16 VALU exists on v6e / v7x -> do the ReLU6 clamp in bf16 there.
_BF16_EPILOGUE = ("v6" in _DEVICE_KIND) or ("v7" in _DEVICE_KIND)
# v7x has 2 TensorCores per chip -> make sure the grid has >= 2 steps.
_MULTI_TC = "v7" in _DEVICE_KIND


def long_dense_kernel(x_ref, *refs, bf16_epilogue):
    # refs = (w1, b1, w2, b2, ..., w6, b6, out_ref)
    out_ref = refs[-1]
    param_refs = refs[:-1]
    n_layers = len(param_refs) // 2

    h = x_ref[...]                                   # (tile, 128) bf16
    for li in range(n_layers):
        w = param_refs[2 * li][...]                  # (in_pad, out_pad) bf16
        b = param_refs[2 * li + 1][...]              # (1, out_pad) f32
        lhs = h if h.dtype == jnp.bfloat16 else h.astype(jnp.bfloat16)
        z = jnp.dot(lhs, w, preferred_element_type=jnp.float32) + b  # f32
        if li < n_layers - 1:
            if bf16_epilogue:
                # f32 bias add above; clamp in bf16 (halves VALU vreg traffic,
                # feeds the next MXU dot directly).
                h = jnp.clip(z.astype(jnp.bfloat16), 0.0, 6.0)
            else:
                h = jnp.clip(z, 0.0, 6.0)            # f32 ReLU6 (v5e path)
        else:
            h = jax.nn.sigmoid(z)                    # exp on EUP, f32 result
    out_ref[...] = h.astype(out_ref.dtype)


@functools.partial(jax.jit, static_argnames=("batch_tile",))
def long_dense_forward(x, params, batch_tile=512):
    """x: (B, 108) float32.  params: padded flat list [w1, b1, ..., w6, b6]
    produced by prepare_params (weights bf16, biases f32)."""
    assert batch_tile % 128 == 0, "batch_tile must be a multiple of 128"
    B, F = x.shape
    assert F == LAYER_DIMS[0]
    F_pad = PADDED_DIMS[0]
    out_pad = PADDED_DIMS[-1]

    # Tile: multiple of 128, no larger than needed; on 2-TC chips split the
    # batch into >= 2 tiles (down to 128 rows) so both cores get work.
    tile = min(batch_tile, _round_up(B, 128))
    if _MULTI_TC and B > 128:
        while tile > 128 and pl.cdiv(B, tile) < 2:
            tile = _round_up(tile // 2, 128)
    B_pad = _round_up(B, tile)
    n_tiles = B_pad // tile

    # Pad batch + feature dims and cast to bf16 (single fused XLA op):
    # halves input HBM traffic and the x double-buffer VMEM.
    x_p = jnp.pad(x, ((0, B_pad - B), (0, F_pad - F))).astype(jnp.bfloat16)

    x_spec = pl.BlockSpec((tile, F_pad), lambda i: (i, 0))
    param_specs = []
    for w, b in zip(params[0::2], params[1::2]):
        # Constant block index -> Pallas keeps the weights resident in VMEM
        # (no per-step re-DMA).
        param_specs.append(pl.BlockSpec(w.shape, lambda i: (0, 0)))
        param_specs.append(pl.BlockSpec(b.shape, lambda i: (0, 0)))
    out_spec = pl.BlockSpec((tile, out_pad), lambda i: (i, 0))

    # Rough cost estimate for the XLA scheduler.
    flops = 2 * B_pad * sum(pi * po for pi, po in
                            zip(PADDED_DIMS[:-1], PADDED_DIMS[1:]))
    param_bytes = sum(int(p.size) * p.dtype.itemsize for p in params)
    bytes_accessed = (
        x_p.size * x_p.dtype.itemsize
        + param_bytes
        + B_pad * out_pad * 4
    )
    transcendentals = B_pad * out_pad  # final-layer exp

    # VMEM budget sized from the actual footprint (weights double-buffered,
    # a few live f32 activation slabs, double-buffered x/out tiles) + slack.
    act_bytes = tile * max(PADDED_DIMS) * 4 * 4
    io_bytes = 2 * tile * (F_pad * 2 + out_pad * 4)
    vmem_limit = int(min(96 * 2**20,
                         max(16 * 2**20,
                             2 * param_bytes + act_bytes + io_bytes + 4 * 2**20)))

    kernel = functools.partial(long_dense_kernel, bf16_epilogue=_BF16_EPILOGUE)

    out_p = pl.pallas_call(
        kernel,
        out_shape=jax.ShapeDtypeStruct((B_pad, out_pad), jnp.float32),
        grid_spec=pltpu.PrefetchScalarGridSpec(
            num_scalar_prefetch=0,
            grid=(n_tiles,),
            in_specs=[x_spec] + param_specs,
            out_specs=out_spec,
        ),
        compiler_params=pltpu.CompilerParams(
            dimension_semantics=("parallel",),
            vmem_limit_bytes=vmem_limit,
        ),
        cost_estimate=pl.CostEstimate(
            flops=flops,
            transcendentals=transcendentals,
            bytes_accessed=bytes_accessed,
        ),
    )(x_p, *params)

    return out_p[:B, :LAYER_DIMS[-1]]


def init_params(key):
    """Deterministic init matching nn.Linear default: U(-1/sqrt(in), 1/sqrt(in)),
    at the ORIGINAL (unpadded) layer sizes."""
    params = []
    for in_f, out_f in zip(LAYER_DIMS[:-1], LAYER_DIMS[1:]):
        key, kw, kb = jax.random.split(key, 3)
        bound = 1.0 / (in_f ** 0.5)
        w = jax.random.uniform(kw, (in_f, out_f), jnp.float32, -bound, bound)
        b = jax.random.uniform(kb, (1, out_f), jnp.float32, -bound, bound)
        params += [w, b]
    return params


def prepare_params(params_f32):
    """Zero-pad every layer to multiple-of-128 widths; weights -> bf16
    (MXU-native, half the VMEM), biases stay f32 (added after f32 accumulation)."""
    padded = []
    for li, (w, b) in enumerate(zip(params_f32[0::2], params_f32[1::2])):
        in_p, out_p = PADDED_DIMS[li], PADDED_DIMS[li + 1]
        w_p = jnp.zeros((in_p, out_p), jnp.float32)
        w_p = w_p.at[: w.shape[0], : w.shape[1]].set(w)
        b_p = jnp.zeros((1, out_p), jnp.float32)
        b_p = b_p.at[:, : b.shape[1]].set(b)
        padded += [w_p.astype(jnp.bfloat16), b_p]
    return padded


def reference_forward(x, padded_params, bf16_epilogue=_BF16_EPILOGUE):
    """Pure-JAX reference mirroring the kernel's numerics (bf16 weights/input,
    f32 accumulation, generation-matched epilogue dtype)."""
    B, F = x.shape
    h = jnp.pad(x, ((0, 0), (0, PADDED_DIMS[0] - F))).astype(jnp.bfloat16)
    n_layers = len(padded_params) // 2
    for li in range(n_layers):
        w = padded_params[2 * li]
        b = padded_params[2 * li + 1]
        lhs = h if h.dtype == jnp.bfloat16 else h.astype(jnp.bfloat16)
        z = jnp.dot(lhs, w, preferred_element_type=jnp.float32) + b
        if li < n_layers - 1:
            if bf16_epilogue:
                h = jnp.clip(z.astype(jnp.bfloat16), 0.0, 6.0)
            else:
                h = jnp.clip(z, 0.0, 6.0)
        else:
            h = jax.nn.sigmoid(z)
    return h[:, :LAYER_DIMS[-1]]


if __name__ == "__main__":
    key = jax.random.PRNGKey(0)
    key, kx1, kx2 = jax.random.split(key, 3)

    params_f32 = init_params(key)
    params = prepare_params(params_f32)

    # Test 1: single (or two, on v7x) tile(s).
    B1 = 16
    x1 = jax.random.normal(kx1, (B1, LAYER_DIMS[0]), jnp.float32)
    out1 = jax.block_until_ready(long_dense_forward(x1, params))
    ref1 = reference_forward(x1, params)
    assert out1.shape == (B1, LAYER_DIMS[-1])
    assert jnp.allclose(out1, ref1, atol=2e-3, rtol=0), "mismatch vs reference (B=16)"

    # Test 2: multiple grid tiles (exercises batch tiling / padding path).
    B2 = 300
    x2 = jax.random.normal(kx2, (B2, LAYER_DIMS[0]), jnp.float32)
    out2 = jax.block_until_ready(long_dense_forward(x2, params, batch_tile=128))
    ref2 = reference_forward(x2, params)
    assert out2.shape == (B2, LAYER_DIMS[-1])
    assert jnp.allclose(out2, ref2, atol=2e-3, rtol=0), "mismatch vs reference (B=300)"

    print("KERNEL_OK")
</pallas_src>

<mosaic_0001>
module attributes {stable_mosaic.version = 11 : i64} {
  func.func @long_dense_kernel(%arg0: i32, %arg1: memref<128x128xbf16, #tpu.memory_space<vmem>>, %arg2: memref<128x768xbf16, #tpu.memory_space<vmem>>, %arg3: memref<1x768xf32, #tpu.memory_space<vmem>>, %arg4: memref<768x640xbf16, #tpu.memory_space<vmem>>, %arg5: memref<1x640xf32, #tpu.memory_space<vmem>>, %arg6: memref<640x256xbf16, #tpu.memory_space<vmem>>, %arg7: memref<1x256xf32, #tpu.memory_space<vmem>>, %arg8: memref<256x256xbf16, #tpu.memory_space<vmem>>, %arg9: memref<1x256xf32, #tpu.memory_space<vmem>>, %arg10: memref<256x128xbf16, #tpu.memory_space<vmem>>, %arg11: memref<1x128xf32, #tpu.memory_space<vmem>>, %arg12: memref<128x128xbf16, #tpu.memory_space<vmem>>, %arg13: memref<1x128xf32, #tpu.memory_space<vmem>>, %arg14: memref<128x128xf32, #tpu.memory_space<vmem>>) attributes {dimension_semantics = [#tpu.dimension_semantics<parallel>], iteration_bounds = array<i64: 1>, scalar_prefetch = 0 : i64, scratch_operands = 0 : i64, tpu.core_type = #tpu.core_type<tc>, window_params = [{transform_indices = @transform_0, window_bounds = array<i64: 128, 128>}, {pipeline_mode = #tpu.pipeline_mode<synchronous>, transform_indices = @transform_1, window_bounds = array<i64: 128, 768>}, {pipeline_mode = #tpu.pipeline_mode<synchronous>, transform_indices = @transform_2, window_bounds = array<i64: 1, 768>}, {pipeline_mode = #tpu.pipeline_mode<synchronous>, transform_indices = @transform_3, window_bounds = array<i64: 768, 640>}, {pipeline_mode = #tpu.pipeline_mode<synchronous>, transform_indices = @transform_4, window_bounds = array<i64: 1, 640>}, {pipeline_mode = #tpu.pipeline_mode<synchronous>, transform_indices = @transform_5, window_bounds = array<i64: 640, 256>}, {pipeline_mode = #tpu.pipeline_mode<synchronous>, transform_indices = @transform_6, window_bounds = array<i64: 1, 256>}, {pipeline_mode = #tpu.pipeline_mode<synchronous>, transform_indices = @transform_7, window_bounds = array<i64: 256, 256>}, {pipeline_mode = #tpu.pipeline_mode<synchronous>, transform_indices = @transform_8, window_bounds = array<i64: 1, 256>}, {pipeline_mode = #tpu.pipeline_mode<synchronous>, transform_indices = @transform_9, window_bounds = array<i64: 256, 128>}, {pipeline_mode = #tpu.pipeline_mode<synchronous>, transform_indices = @transform_10, window_bounds = array<i64: 1, 128>}, {pipeline_mode = #tpu.pipeline_mode<synchronous>, transform_indices = @transform_11, window_bounds = array<i64: 128, 128>}, {pipeline_mode = #tpu.pipeline_mode<synchronous>, transform_indices = @transform_12, window_bounds = array<i64: 1, 128>}, {transform_indices = @transform_13, window_bounds = array<i64: 128, 128>}]} {
    %c0 = arith.constant 0 : index
    %c0_0 = arith.constant 0 : index
    %0 = vector.load %arg1[%c0, %c0_0] : memref<128x128xbf16, #tpu.memory_space<vmem>>, vector<128x128xbf16>
    %c0_1 = arith.constant 0 : index
    %c0_2 = arith.constant 0 : index
    %1 = vector.load %arg2[%c0_1, %c0_2] : memref<128x768xbf16, #tpu.memory_space<vmem>>, vector<128x768xbf16>
    %c0_3 = arith.constant 0 : index
    %c0_4 = arith.constant 0 : index
    %2 = vector.load %arg3[%c0_3, %c0_4] : memref<1x768xf32, #tpu.memory_space<vmem>>, vector<1x768xf32>
    %cst = arith.constant dense<0.000000e+00> : vector<128x768xf32>
    %3 = tpu.matmul %0, %1, %cst {dimension_numbers = #tpu.dot_dimension_numbers<[1], [0], [0], [1], [0, 0, 1, 1], [], []>} : vector<128x128xbf16>, vector<128x768xbf16>, vector<128x768xf32> -> vector<128x768xf32>
    %4 = vector.broadcast %2 : vector<1x768xf32> to vector<128x768xf32>
    %5 = arith.addf %3, %4 : vector<128x768xf32>
    %cst_5 = arith.constant 0.000000e+00 : f32
    %cst_6 = arith.constant 6.000000e+00 : f32
    %6 = vector.broadcast %cst_5 : f32 to vector<128x768xf32>
    %7 = arith.maximumf %6, %5 : vector<128x768xf32>
    %8 = vector.broadcast %cst_6 : f32 to vector<128x768xf32>
    %9 = arith.minimumf %8, %7 : vector<128x768xf32>
    %c0_7 = arith.constant 0 : index
    %c0_8 = arith.constant 0 : index
    %10 = vector.load %arg4[%c0_7, %c0_8] : memref<768x640xbf16, #tpu.memory_space<vmem>>, vector<768x640xbf16>
    %c0_9 = arith.constant 0 : index
    %c0_10 = arith.constant 0 : index
    %11 = vector.load %arg5[%c0_9, %c0_10] : memref<1x640xf32, #tpu.memory_space<vmem>>, vector<1x640xf32>
    %12 = arith.truncf %9 : vector<128x768xf32> to vector<128x768xbf16>
    %cst_11 = arith.constant dense<0.000000e+00> : vector<128x640xf32>
    %13 = tpu.matmul %12, %10, %cst_11 {dimension_numbers = #tpu.dot_dimension_numbers<[1], [0], [0], [1], [0, 0, 1, 1], [], []>} : vector<128x768xbf16>, vector<768x640xbf16>, vector<128x640xf32> -> vector<128x640xf32>
    %14 = vector.broadcast %11 : vector<1x640xf32> to vector<128x640xf32>
    %15 = arith.addf %13, %14 : vector<128x640xf32>
    %cst_12 = arith.constant 0.000000e+00 : f32
    %cst_13 = arith.constant 6.000000e+00 : f32
    %16 = vector.broadcast %cst_12 : f32 to vector<128x640xf32>
    %17 = arith.maximumf %16, %15 : vector<128x640xf32>
    %18 = vector.broadcast %cst_13 : f32 to vector<128x640xf32>
    %19 = arith.minimumf %18, %17 : vector<128x640xf32>
    %c0_14 = arith.constant 0 : index
    %c0_15 = arith.constant 0 : index
    %20 = vector.load %arg6[%c0_14, %c0_15] : memref<640x256xbf16, #tpu.memory_space<vmem>>, vector<640x256xbf16>
    %c0_16 = arith.constant 0 : index
    %c0_17 = arith.constant 0 : index
    %21 = vector.load %arg7[%c0_16, %c0_17] : memref<1x256xf32, #tpu.memory_space<vmem>>, vector<1x256xf32>
    %22 = arith.truncf %19 : vector<128x640xf32> to vector<128x640xbf16>
    %cst_18 = arith.constant dense<0.000000e+00> : vector<128x256xf32>
    %23 = tpu.matmul %22, %20, %cst_18 {dimension_numbers = #tpu.dot_dimension_numbers<[1], [0], [0], [1], [0, 0, 1, 1], [], []>} : vector<128x640xbf16>, vector<640x256xbf16>, vector<128x256xf32> -> vector<128x256xf32>
    %24 = vector.broadcast %21 : vector<1x256xf32> to vector<128x256xf32>
    %25 = arith.addf %23, %24 : vector<128x256xf32>
    %cst_19 = arith.constant 0.000000e+00 : f32
    %cst_20 = arith.constant 6.000000e+00 : f32
    %26 = vector.broadcast %cst_19 : f32 to vector<128x256xf32>
    %27 = arith.maximumf %26, %25 : vector<128x256xf32>
    %28 = vector.broadcast %cst_20 : f32 to vector<128x256xf32>
    %29 = arith.minimumf %28, %27 : vector<128x256xf32>
    %c0_21 = arith.constant 0 : index
    %c0_22 = arith.constant 0 : index
    %30 = vector.load %arg8[%c0_21, %c0_22] : memref<256x256xbf16, #tpu.memory_space<vmem>>, vector<256x256xbf16>
    %c0_23 = arith.constant 0 : index
    %c0_24 = arith.constant 0 : index
    %31 = vector.load %arg9[%c0_23, %c0_24] : memref<1x256xf32, #tpu.memory_space<vmem>>, vector<1x256xf32>
    %32 = arith.truncf %29 : vector<128x256xf32> to vector<128x256xbf16>
    %cst_25 = arith.constant dense<0.000000e+00> : vector<128x256xf32>
    %33 = tpu.matmul %32, %30, %cst_25 {dimension_numbers = #tpu.dot_dimension_numbers<[1], [0], [0], [1], [0, 0, 1, 1], [], []>} : vector<128x256xbf16>, vector<256x256xbf16>, vector<128x256xf32> -> vector<128x256xf32>
    %34 = vector.broadcast %31 : vector<1x256xf32> to vector<128x256xf32>
    %35 = arith.addf %33, %34 : vector<128x256xf32>
    %cst_26 = arith.constant 0.000000e+00 : f32
    %cst_27 = arith.constant 6.000000e+00 : f32
    %36 = vector.broadcast %cst_26 : f32 to vector<128x256xf32>
    %37 = arith.maximumf %36, %35 : vector<128x256xf32>
    %38 = vector.broadcast %cst_27 : f32 to vector<128x256xf32>
    %39 = arith.minimumf %38, %37 : vector<128x256xf32>
    %c0_28 = arith.constant 0 : index
    %c0_29 = arith.constant 0 : index
    %40 = vector.load %arg10[%c0_28, %c0_29] : memref<256x128xbf16, #tpu.memory_space<vmem>>, vector<256x128xbf16>
    %c0_30 = arith.constant 0 : index
    %c0_31 = arith.constant 0 : index
    %41 = vector.load %arg11[%c0_30, %c0_31] : memref<1x128xf32, #tpu.memory_space<vmem>>, vector<1x128xf32>
    %42 = arith.truncf %39 : vector<128x256xf32> to vector<128x256xbf16>
    %cst_32 = arith.constant dense<0.000000e+00> : vector<128x128xf32>
    %43 = tpu.matmul %42, %40, %cst_32 {dimension_numbers = #tpu.dot_dimension_numbers<[1], [0], [0], [1], [0, 0, 1, 1], [], []>} : vector<128x256xbf16>, vector<256x128xbf16>, vector<128x128xf32> -> vector<128x128xf32>
    %44 = vector.broadcast %41 : vector<1x128xf32> to vector<128x128xf32>
    %45 = arith.addf %43, %44 : vector<128x128xf32>
    %cst_33 = arith.constant 0.000000e+00 : f32
    %cst_34 = arith.constant 6.000000e+00 : f32
    %46 = vector.broadcast %cst_33 : f32 to vector<128x128xf32>
    %47 = arith.maximumf %46, %45 : vector<128x128xf32>
    %48 = vector.broadcast %cst_34 : f32 to vector<128x128xf32>
    %49 = arith.minimumf %48, %47 : vector<128x128xf32>
    %c0_35 = arith.constant 0 : index
    %c0_36 = arith.constant 0 : index
    %50 = vector.load %arg12[%c0_35, %c0_36] : memref<128x128xbf16, #tpu.memory_space<vmem>>, vector<128x128xbf16>
    %c0_37 = arith.constant 0 : index
    %c0_38 = arith.constant 0 : index
    %51 = vector.load %arg13[%c0_37, %c0_38] : memref<1x128xf32, #tpu.memory_space<vmem>>, vector<1x128xf32>
    %52 = arith.truncf %49 : vector<128x128xf32> to vector<128x128xbf16>
    %cst_39 = arith.constant dense<0.000000e+00> : vector<128x128xf32>
    %53 = tpu.matmul %52, %50, %cst_39 {dimension_numbers = #tpu.dot_dimension_numbers<[1], [0], [0], [1], [0, 0, 1, 1], [], []>} : vector<128x128xbf16>, vector<128x128xbf16>, vector<128x128xf32> -> vector<128x128xf32>
    %54 = vector.broadcast %51 : vector<1x128xf32> to vector<128x128xf32>
    %55 = arith.addf %53, %54 : vector<128x128xf32>
    %56 = arith.negf %55 : vector<128x128xf32>
    %57 = math.exp %56 : vector<128x128xf32>
    %cst_40 = arith.constant 1.000000e+00 : f32
    %58 = vector.broadcast %cst_40 : f32 to vector<128x128xf32>
    %59 = arith.addf %58, %57 : vector<128x128xf32>
    %60 = arith.divf %58, %59 : vector<128x128xf32>
    %c0_41 = arith.constant 0 : index
    %c0_42 = arith.constant 0 : index
    %61 = vector.load %arg14[%c0_41, %c0_42] : memref<128x128xf32, #tpu.memory_space<vmem>>, vector<128x128xf32>
    tpu.vector_store %arg14[%c0_41, %c0_42], %60 {strides = array<i32>} : memref<128x128xf32, #tpu.memory_space<vmem>>, vector<128x128xf32>,
    return
  }
  func.func @transform_0(%arg0: i32) -> (i32, i32) {
    %c0_i32 = arith.constant 0 : i32
    %c0_i32_0 = arith.constant 0 : i32
    return %arg0, %c0_i32 : i32, i32
  }
  func.func @transform_1(%arg0: i32) -> (i32, i32) {
    %c0_i32 = arith.constant 0 : i32
    %c0_i32_0 = arith.constant 0 : i32
    %c0_i32_1 = arith.constant 0 : i32
    return %c0_i32, %c0_i32_0 : i32, i32
  }
  func.func @transform_2(%arg0: i32) -> (i32, i32) {
    %c0_i32 = arith.constant 0 : i32
    %c0_i32_0 = arith.constant 0 : i32
    %c0_i32_1 = arith.constant 0 : i32
    return %c0_i32, %c0_i32_0 : i32, i32
  }
  func.func @transform_3(%arg0: i32) -> (i32, i32) {
    %c0_i32 = arith.constant 0 : i32
    %c0_i32_0 = arith.constant 0 : i32
    %c0_i32_1 = arith.constant 0 : i32
    return %c0_i32, %c0_i32_0 : i32, i32
  }
  func.func @transform_4(%arg0: i32) -> (i32, i32) {
    %c0_i32 = arith.constant 0 : i32
    %c0_i32_0 = arith.constant 0 : i32
    %c0_i32_1 = arith.constant 0 : i32
    return %c0_i32, %c0_i32_0 : i32, i32
  }
  func.func @transform_5(%arg0: i32) -> (i32, i32) {
    %c0_i32 = arith.constant 0 : i32
    %c0_i32_0 = arith.constant 0 : i32
    %c0_i32_1 = arith.constant 0 : i32
    return %c0_i32, %c0_i32_0 : i32, i32
  }
  func.func @transform_6(%arg0: i32) -> (i32, i32) {
    %c0_i32 = arith.constant 0 : i32
    %c0_i32_0 = arith.constant 0 : i32
    %c0_i32_1 = arith.constant 0 : i32
    return %c0_i32, %c0_i32_0 : i32, i32
  }
  func.func @transform_7(%arg0: i32) -> (i32, i32) {
    %c0_i32 = arith.constant 0 : i32
    %c0_i32_0 = arith.constant 0 : i32
    %c0_i32_1 = arith.constant 0 : i32
    return %c0_i32, %c0_i32_0 : i32, i32
  }
  func.func @transform_8(%arg0: i32) -> (i32, i32) {
    %c0_i32 = arith.constant 0 : i32
    %c0_i32_0 = arith.constant 0 : i32
    %c0_i32_1 = arith.constant 0 : i32
    return %c0_i32, %c0_i32_0 : i32, i32
  }
  func.func @transform_9(%arg0: i32) -> (i32, i32) {
    %c0_i32 = arith.constant 0 : i32
    %c0_i32_0 = arith.constant 0 : i32
    %c0_i32_1 = arith.constant 0 : i32
    return %c0_i32, %c0_i32_0 : i32, i32
  }
  func.func @transform_10(%arg0: i32) -> (i32, i32) {
    %c0_i32 = arith.constant 0 : i32
    %c0_i32_0 = arith.constant 0 : i32
    %c0_i32_1 = arith.constant 0 : i32
    return %c0_i32, %c0_i32_0 : i32, i32
  }
  func.func @transform_11(%arg0: i32) -> (i32, i32) {
    %c0_i32 = arith.constant 0 : i32
    %c0_i32_0 = arith.constant 0 : i32
    %c0_i32_1 = arith.constant 0 : i32
    return %c0_i32, %c0_i32_0 : i32, i32
  }
  func.func @transform_12(%arg0: i32) -> (i32, i32) {
    %c0_i32 = arith.constant 0 : i32
    %c0_i32_0 = arith.constant 0 : i32
    %c0_i32_1 = arith.constant 0 : i32
    return %c0_i32, %c0_i32_0 : i32, i32
  }
  func.func @transform_13(%arg0: i32) -> (i32, i32) {
    %c0_i32 = arith.constant 0 : i32
    %c0_i32_0 = arith.constant 0 : i32
    return %arg0, %c0_i32 : i32, i32
  }
}

</mosaic_0001>

<bundles_post_ra>
// kernel: long_dense_forward.1
= control target key start
LH: loop header
LB: loop body
LE: loop exit
PB: predicated region body
PF: predicated region fallthrough
CT: control target
= control target key end

     0   :  { %18 = vsyncpa [#allocation3], 0  ;;  %s8623_s0 = inlined_call_operand.vmem [shape: bf16[128,128], index: 0, kind: input, shape index: {}]   ;;  %s8624_s1 = inlined_call_operand.hbm [shape: bf16[128,768], index: 1, kind: input, shape index: {}]   ;;  %s8625_s2 = inlined_call_operand.vmem [shape: f32[1,768], index: 2, kind: input, shape index: {}]   ;;  %s8626_s3 = inlined_call_operand.hbm [shape: bf16[768,640], index: 3, kind: input, shape index: {}]   ;;  %s8627_s4 = inlined_call_operand.vmem [shape: f32[1,640], index: 4, kind: input, shape index: {}]   ;;  %s8628_s5 = inlined_call_operand.hbm [shape: bf16[640,256], index: 5, kind: input, shape index: {}]   ;;  %s8629_s6 = inlined_call_operand.vmem [shape: f32[1,256], index: 6, kind: input, shape index: {}]   ;;  %s8630_s7 = inlined_call_operand.hbm [shape: bf16[256,256], index: 7, kind: input, shape index: {}]   ;;  %s8631_s8 = inlined_call_operand.vmem [shape: f32[1,256], index: 8, kind: input, shape index: {}]   ;;  %s8632_s9 = inlined_call_operand.hbm [shape: bf16[256,128], index: 9, kind: input, shape index: {}]   ;;  %s8633_s10 = inlined_call_operand.vmem [shape: f32[1,128], index: 10, kind: input, shape index: {}]   ;;  %s8634_s11 = inlined_call_operand.vmem [shape: bf16[128,128], index: 11, kind: input, shape index: {}]   ;;  %s8635_s12 = inlined_call_operand.vmem [shape: f32[1,128], index: 12, kind: input, shape index: {}]   ;;  %s8636_s13 = inlined_call_operand.vmem [shape: f32[128,128], index: 13, kind: output, shape index: {}]  }
   0x1   :  { %19 = vsyncpa [#allocation5], 0 }
   0x2   :  { %20 = vsyncpa [#allocation8], 0  ;;  %s7222_s25 = smov [#allocation4]  }
   0x3   :  { %s42_s26 = sshll.u32 %s7222_s25, 4  ;;  %s43_s26 = int_to_ptr.vmem [resolvable:$true] %s42_s26 }
   0x4   :  { %s7124_s27 = scalar_lea.vmem %s43_s26, 30720  ;;  %p7129_p1 = scmp.lt.s32.totalorder %s43_s26, %s43_s26 }
   0x5   :  { %p7125_p0 = scmp.ne.s32.totalorder %s43_s26, %s7124_s27  ;;  %p7130_p2 = scmp.lt.s32.totalorder %s7124_s27, %s7124_s27 }
   0x7   :  { %p7131_p3 = por %p7130_p2, %p7129_p1 }
   0x9   :  { %p7132_p4 = pnand %p7131_p3, %p7125_p0 }
   0xb   :  { %7135 = shalt.err (!%p7132_p4)
}
   0xc   :  { %s7223_s28 = smov 320   ;;  %s7224_s29 = smov 20  }
   0xd   :  { %48 = dma.hbm_to_vmem [thread:$0]  %s8626_s3, 30720, %s43_s26, [#allocation5], %s7223_s28, %s7223_s28, %s7224_s29  }
   0xe   :  { %s7225_s15 = smov [#allocation7]   ;;  %s7226_s17 = smov [#allocation2]  }
   0xf   :  { %s70_s16 = sshll.u32 %s7225_s15, 4  ;;  %s28_s18 = sshll.u32 %s7226_s17, 4  ;;  %s71_s16 = int_to_ptr.vmem [resolvable:$true] %s70_s16  ;;  %s29_s18 = int_to_ptr.vmem [resolvable:$true] %s28_s18 }
  0x10   :  { %s7144_s19 = scalar_lea.vmem %s71_s16, 4096  ;;  %p7149_p6 = scmp.lt.s32.totalorder %s71_s16, %s71_s16 }
  0x11   :  { %p7145_p5 = scmp.ne.s32.totalorder %s71_s16, %s7144_s19  ;;  %p7150_p7 = scmp.lt.s32.totalorder %s7144_s19, %s7144_s19 }
  0x13   :  { %p7151_p8 = por %p7150_p7, %p7149_p6 }
  0x15   :  { %p7152_p9 = pnand %p7151_p8, %p7145_p5 }
  0x17   :  { %7155 = shalt.err (!%p7152_p9)
}
  0x18   :  { %s7227_s20 = smov 128   ;;  %s7228_s21 = smov 8  }
  0x19   :  { %76 = dma.hbm_to_vmem [thread:$0]  %s8630_s7, 4096, %s71_s16, [#allocation8], %s7227_s20, %s7227_s20, %s7228_s21  }
  0x1a   :  { %s7164_s3 = scalar_lea.vmem %s29_s18, 6144  ;;  %p7169_p11 = scmp.lt.s32.totalorder %s29_s18, %s29_s18 }
  0x1b   :  { %p7165_p10 = scmp.ne.s32.totalorder %s29_s18, %s7164_s3  ;;  %p7170_p12 = scmp.lt.s32.totalorder %s7164_s3, %s7164_s3 }
  0x1d   :  { %p7171_p13 = por %p7170_p12, %p7169_p11 }
  0x1f   :  { %p7172_p0 = pnand %p7171_p13, %p7165_p10 }
  0x21   :  { %7175 = shalt.err (!%p7172_p0)
}
  0x22   :  { %s7229_s24 = smov 384   ;;  %s7230_s25 = smov 24  }
  0x23   :  { %34 = dma.hbm_to_vmem [thread:$0]  %s8624_s1, 6144, %s29_s18, [#allocation3], %s7229_s24, %s7229_s24, %s7230_s25  }
  0x24   :  { %s7231_s28 = smov [#allocation6]   ;;  %s7232_s30 = smov [#allocation9]  }
  0x25   :  { %s56_s29 = sshll.u32 %s7231_s28, 4  ;;  %s84_s14 = sshll.u32 %s7232_s30, 4  ;;  %s57_s29 = int_to_ptr.vmem [resolvable:$true] %s56_s29  ;;  %s85_s14 = int_to_ptr.vmem [resolvable:$true] %s84_s14 }
  0x26   :  { %s7184_s7 = scalar_lea.vmem %s57_s29, 10240  ;;  %p7189_p2 = scmp.lt.s32.totalorder %s57_s29, %s57_s29 }
  0x27   :  { %p7185_p1 = scmp.ne.s32.totalorder %s57_s29, %s7184_s7  ;;  %p7190_p3 = scmp.lt.s32.totalorder %s7184_s7, %s7184_s7 }
  0x29   :  { %p7191_p4 = por %p7190_p3, %p7189_p2 }
  0x2b   :  { %p7192_p5 = pnand %p7191_p4, %p7185_p1 }
  0x2d   :  { %7195 = shalt.err (!%p7192_p5)
}
  0x2e   :  { %62 = dma.hbm_to_vmem [thread:$0]  %s8628_s5, 10240, %s57_s29, [#allocation5], %s7227_s20, %s7227_s20, %s7228_s21  }
  0x2f   :  { %s7204_s17 = scalar_lea.vmem %s85_s14, 2048  ;;  %p7209_p7 = scmp.lt.s32.totalorder %s85_s14, %s85_s14 }
  0x30   :  { %p7205_p6 = scmp.ne.s32.totalorder %s85_s14, %s7204_s17  ;;  %p7210_p8 = scmp.lt.s32.totalorder %s7204_s17, %s7204_s17 }
  0x32   :  { %p7211_p9 = por %p7210_p8, %p7209_p7 }
  0x34   :  { %p7212_p10 = pnand %p7211_p9, %p7205_p6 }
  0x36   :  { %7215 = shalt.err (!%p7212_p10)
}
  0x37   :  { %s7233_s1 = smov 64   ;;  %s7234_s18 = smov 4  }
  0x38   :  { %90 = dma.hbm_to_vmem [thread:$0]  %s8632_s9, 2048, %s85_s14, [#allocation8], %s7233_s1, %s7233_s1, %s7234_s18  }
  0x39   :  { %7216 = dma.done.wait [#allocation3], 6144  }
  0x3a   :  { %7217 = vsyncadd [#allocation3], 4294961152 }
  0x3b   :  { %7218 = dma.done.wait [#allocation5], 40960  }
  0x3c   :  { %7219 = vsyncadd [#allocation5], 4294926336 }
  0x3d   :  { %7220 = dma.done.wait [#allocation8], 6144  }
  0x3e   :  { %7221 = vsyncadd [#allocation8], 4294961152  ;;  %v8637_v0 = vmov 0   ;;  %v6443_v1 = vld [vmem:[#allocation2 + $0x154] ss:$24 sps:$4 sm:$0xff]   ;;  %v7326_v34 = vld [vmem:[%s8623_s0] sm:$0xff]  }
  0x3f   :  { %529 = vmatprep.mubr.bf16.mxu0 %v8637_v0  ;;  %642 = vmatprep.mubr.bf16.mxu1 %v8637_v0  ;;  %v6445_v2 = vld [vmem:[#allocation2 + $0x15c] ss:$24 sps:$4 sm:$0xff]   ;;  %v6447_v3 = vld [vmem:[#allocation2 + $0x150] ss:$24 sps:$4 sm:$0xff]   ;;  %v6451_v6 = vld [vmem:[#allocation2 + $0x12c] ss:$24 sps:$4 sm:$0xff]  }
  0x40   :  { %497 = vmatprep.subr.bf16.mxu0 %v6443_v1  ;;  %v6448_v4 = vld [vmem:[#allocation2 + $0x158] ss:$24 sps:$4 sm:$0xff]   ;;  %610 = vmatprep.subr.bf16.mxu1 %v6445_v2  ;;  %v6449_v5 = vld [vmem:[#allocation2 + $0x124] ss:$24 sps:$4 sm:$0xff]   ;;  %v6454_v8 = vld [vmem:[#allocation2 + $0x128] ss:$24 sps:$4 sm:$0xff]  }
  0x41   :  { %498 = vmatpush1.bf16.msra.mxu0 %v6447_v3  ;;  %611 = vmatpush1.bf16.msra.mxu1 %v6448_v4  ;;  %v6453_v7 = vld [vmem:[#allocation2 + $0x120] ss:$24 sps:$4 sm:$0xff]   ;;  %v6455_v9 = vld [vmem:[#allocation2 + $0xf4] ss:$24 sps:$4 sm:$0xff]   ;;  %v6459_v11 = vld [vmem:[#allocation2 + $0xf0] ss:$24 sps:$4 sm:$0xff]  }
  0x42   :  { %499 = vmatprep.subr.bf16.mxu0 %v6449_v5  ;;  %612 = vmatprep.subr.bf16.mxu1 %v6451_v6  ;;  %v6457_v10 = vld [vmem:[#allocation2 + $0xfc] ss:$24 sps:$4 sm:$0xff]   ;;  %v6460_v12 = vld [vmem:[#allocation2 + $0xf8] ss:$24 sps:$4 sm:$0xff]   ;;  %v6463_v14 = vld [vmem:[#allocation2 + $0xcc] ss:$24 sps:$4 sm:$0xff]  }
  0x43   :  { %v6461_v13 = vld [vmem:[#allocation2 + $0xc4] ss:$24 sps:$4 sm:$0xff]   ;;  %v6465_v15 = vld [vmem:[#allocation2 + $0xc0] ss:$24 sps:$4 sm:$0xff]   ;;  %v6467_v17 = vld [vmem:[#allocation2 + $0x94] ss:$24 sps:$4 sm:$0xff]  }
  0x44   :  { %v6466_v16 = vld [vmem:[#allocation2 + $0xc8] ss:$24 sps:$4 sm:$0xff]   ;;  %v6469_v18 = vld [vmem:[#allocation2 + $0x9c] ss:$24 sps:$4 sm:$0xff]   ;;  %v6472_v20 = vld [vmem:[#allocation2 + $0x98] ss:$24 sps:$4 sm:$0xff]  }
  0x45   :  { %500 = vmatpush1.bf16.msra.mxu0 %v6453_v7  ;;  %613 = vmatpush1.bf16.msra.mxu1 %v6454_v8  ;;  %v6471_v19 = vld [vmem:[#allocation2 + $0x90] ss:$24 sps:$4 sm:$0xff]   ;;  %v6473_v21 = vld [vmem:[#allocation2 + $0x64] ss:$24 sps:$4 sm:$0xff]   ;;  %v6477_v23 = vld [vmem:[#allocation2 + $0x60] ss:$24 sps:$4 sm:$0xff]  }
  0x46   :  { %501 = vmatprep.subr.bf16.mxu0 %v6455_v9  ;;  %614 = vmatprep.subr.bf16.mxu1 %v6457_v10  ;;  %v6475_v22 = vld [vmem:[#allocation2 + $0x6c] ss:$24 sps:$4 sm:$0xff]   ;;  %v6478_v24 = vld [vmem:[#allocation2 + $0x68] ss:$24 sps:$4 sm:$0xff]   ;;  %v6481_v26 = vld [vmem:[#allocation2 + $0x3c] ss:$24 sps:$4 sm:$0xff]  }
  0x47   :  { %v6479_v25 = vld [vmem:[#allocation2 + $0x34] ss:$24 sps:$4 sm:$0xff]   ;;  %v6483_v27 = vld [vmem:[#allocation2 + $0x30] ss:$24 sps:$4 sm:$0xff]   ;;  %v6485_v29 = vld [vmem:[#allocation2 + $0x4] ss:$24 sps:$4 sm:$0xff]  }
  0x48   :  { %v6484_v28 = vld [vmem:[#allocation2 + $0x38] ss:$24 sps:$4 sm:$0xff]   ;;  %v6487_v30 = vld [vmem:[#allocation2 + $0xc] ss:$24 sps:$4 sm:$0xff]   ;;  %v6490_v32 = vld [vmem:[#allocation2 + $0x8] ss:$24 sps:$4 sm:$0xff]  }
  0x49   :  { %502 = vmatpush1.bf16.msra.mxu0 %v6459_v11  ;;  %615 = vmatpush1.bf16.msra.mxu1 %v6460_v12  ;;  %v6489_v31 = vld [vmem:[#allocation2] ss:$24 sps:$4 sm:$0xff]   ;;  %v6494_v33 = vld [vmem:[#allocation2 + $0x164] ss:$24 sps:$4 sm:$0xff]   ;;  %v6498_v36 = vld [vmem:[#allocation2 + $0x134] ss:$24 sps:$4 sm:$0xff]  }
  0x4a   :  { %503 = vmatprep.subr.bf16.mxu0 %v6461_v13  ;;  %616 = vmatprep.subr.bf16.mxu1 %v6463_v14  ;;  %v6492_v35 = vld [vmem:[#allocation2 + $0x160] ss:$24 sps:$4 sm:$0xff]   ;;  %v6496_v37 = vld [vmem:[#allocation2 + $0x130] ss:$24 sps:$4 sm:$0xff]   ;;  %v6502_v38 = vld [vmem:[#allocation2 + $0x104] ss:$24 sps:$4 sm:$0xff]  }
  0x4b   :  { %v7335_v39 = vld [vmem:[%s8623_s0 + $0x8] sm:$0xff]   ;;  %v6500_v40 = vld [vmem:[#allocation2 + $0x100] ss:$24 sps:$4 sm:$0xff]   ;;  %v6525_v41 = vld [vmem:[#allocation4 + $0x11c] ss:$20 sps:$4 sm:$0xff]  }
  0x4c   :  { %v6506_v42 = vld [vmem:[#allocation2 + $0xd4] ss:$24 sps:$4 sm:$0xff]   ;;  %v6504_v45 = vld [vmem:[#allocation2 + $0xd0] ss:$24 sps:$4 sm:$0xff]   ;;  %v6510_v46 = vld [vmem:[#allocation2 + $0xa4] ss:$24 sps:$4 sm:$0xff]  }
  0x4d   :  { %504 = vmatpush1.bf16.msra.mxu0 %v6465_v15  ;;  %617 = vmatpush1.bf16.msra.mxu1 %v6466_v16  ;;  %v6523_v43 = vld [vmem:[#allocation4 + $0x118] ss:$20 sps:$4 sm:$0xff]   ;;  %v6531_v44 = vld [vmem:[#allocation4 + $0xf4] ss:$20 sps:$4 sm:$0xff]   ;;  %v6529_v47 = vld [vmem:[#allocation4 + $0xf0] ss:$20 sps:$4 sm:$0xff]  }
  0x4e   :  { %505 = vmatprep.subr.bf16.mxu0 %v6467_v17  ;;  %618 = vmatprep.subr.bf16.mxu1 %v6469_v18  ;;  %v7344_v48 = vld [vmem:[%s8623_s0 + $0x10] sm:$0xff]   ;;  %v6508_v49 = vld [vmem:[#allocation2 + $0xa0] ss:$24 sps:$4 sm:$0xff]   ;;  %v6535_v52 = vld [vmem:[#allocation4 + $0xc8] ss:$20 sps:$4 sm:$0xff]  }
  0x4f   :  { %v6537_v50 = vld [vmem:[#allocation4 + $0xcc] ss:$20 sps:$4 sm:$0xff]   ;;  %v6543_v53 = vld [vmem:[#allocation4 + $0xa4] ss:$20 sps:$4 sm:$0xff]   ;;  %v6512_v54 = vld [vmem:[#allocation2 + $0x70] ss:$24 sps:$4 sm:$0xff]  }
  0x50   :  { %v6514_v51 = vld [vmem:[#allocation2 + $0x74] ss:$24 sps:$4 sm:$0xff]   ;;  %v6518_v55 = vld [vmem:[#allocation2 + $0x44] ss:$24 sps:$4 sm:$0xff]   ;;  %v6516_v58 = vld [vmem:[#allocation2 + $0x40] ss:$24 sps:$4 sm:$0xff]  }
  0x51   :  { %506 = vmatpush1.bf16.msra.mxu0 %v6471_v19  ;;  %619 = vmatpush1.bf16.msra.mxu1 %v6472_v20  ;;  %v6541_v56 = vld [vmem:[#allocation4 + $0xa0] ss:$20 sps:$4 sm:$0xff]   ;;  %v7353_v57 = vld [vmem:[%s8623_s0 + $0x18] sm:$0xff]   ;;  %v6520_v63 = vld [vmem:[#allocation2 + $0x10] ss:$24 sps:$4 sm:$0xff]  }
  0x52   :  { %507 = vmatprep.subr.bf16.mxu0 %v6473_v21  ;;  %620 = vmatprep.subr.bf16.mxu1 %v6475_v22  ;;  %v6549_v59 = vld [vmem:[#allocation4 + $0x7c] ss:$20 sps:$4 sm:$0xff]   ;;  %v6522_v60 = vld [vmem:[#allocation2 + $0x14] ss:$24 sps:$4 sm:$0xff]   ;;  %v7362_v3 = vld [vmem:[%s8623_s0 + $0x20] sm:$0xff]  }
  0x53   :  { %v6547_v61 = vld [vmem:[#allocation4 + $0x78] ss:$20 sps:$4 sm:$0xff]   ;;  %v6555_v62 = vld [vmem:[#allocation4 + $0x54] ss:$20 sps:$4 sm:$0xff]   ;;  %v6528_v1 = vld [vmem:[#allocation4 + $0x39c] ss:$20 sps:$4 sm:$0xff]  }
  0x54   :  { %v6553_v2 = vld [vmem:[#allocation4 + $0x50] ss:$20 sps:$4 sm:$0xff]   ;;  %v6561_v4 = vld [vmem:[#allocation4 + $0x2c] ss:$20 sps:$4 sm:$0xff]   ;;  %v6559_v5 = vld [vmem:[#allocation4 + $0x28] ss:$20 sps:$4 sm:$0xff]  }
  0x55   :  { %508 = vmatpush1.bf16.msra.mxu0 %v6477_v23  ;;  %621 = vmatpush1.bf16.msra.mxu1 %v6478_v24  ;;  %v6567_v6 = vld [vmem:[#allocation4 + $0x4] ss:$20 sps:$4 sm:$0xff]   ;;  %v6565_v7 = vld [vmem:[#allocation4] ss:$20 sps:$4 sm:$0xff]   ;;  %v7371_v8 = vld [vmem:[%s8623_s0 + $0x28] sm:$0xff]  }
  0x56   :  { %509 = vmatprep.subr.bf16.mxu0 %v6479_v25  ;;  %622 = vmatprep.subr.bf16.mxu1 %v6481_v26  ;;  %v6571_v9 = vld [vmem:[#allocation4 + $0x258] ss:$20 sps:$4 sm:$0xff]   ;;  %v6573_v10 = vld [vmem:[#allocation4 + $0x25c] ss:$20 sps:$4 sm:$0xff]   ;;  %v6579_v11 = vld [vmem:[#allocation4 + $0x234] ss:$20 sps:$4 sm:$0xff]  }
  0x57   :  { %v6577_v12 = vld [vmem:[#allocation4 + $0x230] ss:$20 sps:$4 sm:$0xff]   ;;  %v6585_v14 = vld [vmem:[#allocation4 + $0x20c] ss:$20 sps:$4 sm:$0xff]   ;;  %v6583_v15 = vld [vmem:[#allocation4 + $0x208] ss:$20 sps:$4 sm:$0xff]  }
  0x58   :  { %v7380_v13 = vld [vmem:[%s8623_s0 + $0x30] sm:$0xff]   ;;  %v6591_v16 = vld [vmem:[#allocation4 + $0x1e4] ss:$20 sps:$4 sm:$0xff]   ;;  %v6540_v24 = vld [vmem:[#allocation4 + $0x34c] ss:$20 sps:$4 sm:$0xff]  }
  0x59   :  { %510 = vmatpush1.bf16.msra.mxu0 %v6483_v27  ;;  %623 = vmatpush1.bf16.msra.mxu1 %v6484_v28  ;;  %v6589_v17 = vld [vmem:[#allocation4 + $0x1e0] ss:$20 sps:$4 sm:$0xff]   ;;  %v7389_v18 = vld [vmem:[%s8623_s0 + $0x38] sm:$0xff]   ;;  %v6532_v22 = vld [vmem:[#allocation4 + $0x370] ss:$20 sps:$4 sm:$0xff]  }
  0x5a   :  { %511 = vmatprep.subr.bf16.mxu0 %v6485_v29  ;;  %624 = vmatprep.subr.bf16.mxu1 %v6487_v30  ;;  %v6526_v19 = vld [vmem:[#allocation4 + $0x398] ss:$20 sps:$4 sm:$0xff]   ;;  %v6534_v20 = vld [vmem:[#allocation4 + $0x374] ss:$20 sps:$4 sm:$0xff]   ;;  %v6597_v21 = vld [vmem:[#allocation4 + $0x1bc] ss:$20 sps:$4 sm:$0xff]  }
  0x5b   :  { %v6595_v23 = vld [vmem:[#allocation4 + $0x1b8] ss:$20 sps:$4 sm:$0xff]   ;;  %v6538_v25 = vld [vmem:[#allocation4 + $0x348] ss:$20 sps:$4 sm:$0xff]   ;;  %v6601_v28 = vld [vmem:[#allocation4 + $0x190] ss:$20 sps:$4 sm:$0xff]  }
  0x5c   :  { %v6603_v26 = vld [vmem:[#allocation4 + $0x194] ss:$20 sps:$4 sm:$0xff]   ;;  %v6546_v27 = vld [vmem:[#allocation4 + $0x324] ss:$20 sps:$4 sm:$0xff]   ;;  %v6609_v30 = vld [vmem:[#allocation4 + $0x16c] ss:$20 sps:$4 sm:$0xff]  }
  0x5d   :  { %512 = vmatpush1.bf16.msra.mxu0 %v6489_v31  ;;  %625 = vmatpush1.bf16.msra.mxu1 %v6490_v32  ;;  %v6544_v29 = vld [vmem:[#allocation4 + $0x320] ss:$20 sps:$4 sm:$0xff]   ;;  %v6552_v31 = vld [vmem:[#allocation4 + $0x2fc] ss:$20 sps:$4 sm:$0xff]  }
  0x5e   :  { %723 = vmatprep.subr.bf16.mxu0 %v6494_v33  ;;  %2639 = vmatprep.subr.bf16.mxu1 %v6525_v41  ;;  %v6607_v32 = vld [vmem:[#allocation4 + $0x168] ss:$20 sps:$4 sm:$0xff]   ;;  %v6550_v33 = vld [vmem:[#allocation4 + $0x2f8] ss:$20 sps:$4 sm:$0xff]  }
  0x5f   :  { %v6570_v41 = vld [vmem:[#allocation4 + $0x284] ss:$20 sps:$4 sm:$0xff]  }
  0x60   :  { %530 = vmatmul.mubr.bf16.vlgmr.msra.gmra.mxu0 %v7326_v34  ;;  %643 = vmatmul.mubr.bf16.vlgmr.msra.gmra.mxu1 %v7326_v34 }
  0x61   :  { %724 = vmatpush1.bf16.msra.mxu0 %v6492_v35  ;;  %539 = vmatprep.mubr.bf16.mxu0 %v8637_v0  ;;  %v6558_v35 = vld [vmem:[#allocation4 + $0x2d4] ss:$20 sps:$4 sm:$0xff]  }
  0x62   :  { %652 = vmatprep.mubr.bf16.mxu1 %v8637_v0  ;;  %725 = vmatprep.subr.bf16.mxu0 %v6498_v36  ;;  %v6613_v36 = vld [vmem:[#allocation4 + $0x140] ss:$20 sps:$4 sm:$0xff]  }
  0x63   :  { %2640 = vmatpush1.bf16.msra.mxu1 %v6523_v43  ;;  %v6576_v43 = vld [vmem:[#allocation4 + $0x4dc] ss:$20 sps:$4 sm:$0xff]  }
  0x64   :  { %2641 = vmatprep.subr.bf16.mxu1 %v6531_v44  ;;  %v6574_v44 = vld [vmem:[#allocation4 + $0x4d8] ss:$20 sps:$4 sm:$0xff]  }
  0x65   :  { %726 = vmatpush1.bf16.msra.mxu0 %v6496_v37  ;;  %v6621_v37 = vld [vmem:[#allocation4 + $0x61c] ss:$20 sps:$4 sm:$0xff]  }
  0x66   :  { %727 = vmatprep.subr.bf16.mxu0 %v6502_v38  ;;  %v6556_v38 = vld [vmem:[#allocation4 + $0x2d0] ss:$20 sps:$4 sm:$0xff]  }
  0x67   :  { %2642 = vmatpush1.bf16.msra.mxu1 %v6529_v47  ;;  %v6588_v47 = vld [vmem:[#allocation4 + $0x48c] ss:$20 sps:$4 sm:$0xff]  }
  0x68   :  { %540 = vmatmul.mubr.bf16.gmra.mxu0 %v7335_v39  ;;  %653 = vmatmul.mubr.bf16.gmra.mxu1 %v7335_v39 }
  0x69   :  { %549 = vmatprep.mubr.bf16.mxu0 %v8637_v0  ;;  %662 = vmatprep.mubr.bf16.mxu1 %v8637_v0 }
  0x6a   :  { %728 = vmatpush1.bf16.msra.mxu0 %v6500_v40  ;;  %2643 = vmatprep.subr.bf16.mxu1 %v6537_v50  ;;  %v6562_v40 = vld [vmem:[#allocation4 + $0x2a8] ss:$20 sps:$4 sm:$0xff]   ;;  %v6592_v50 = vld [vmem:[#allocation4 + $0x460] ss:$20 sps:$4 sm:$0xff]  }
  0x6b   :  { %729 = vmatprep.subr.bf16.mxu0 %v6506_v42  ;;  %2644 = vmatpush1.bf16.msra.mxu1 %v6535_v52  ;;  %v6568_v42 = vld [vmem:[#allocation4 + $0x280] ss:$20 sps:$4 sm:$0xff]   ;;  %v6598_v52 = vld [vmem:[#allocation4 + $0x438] ss:$20 sps:$4 sm:$0xff]  }
  0x6c   :  { %2645 = vmatprep.subr.bf16.mxu1 %v6543_v53  ;;  %v6606_v53 = vld [vmem:[#allocation4 + $0x414] ss:$20 sps:$4 sm:$0xff]  }
  0x6e   :  { %730 = vmatpush1.bf16.msra.mxu0 %v6504_v45  ;;  %v6582_v45 = vld [vmem:[#allocation4 + $0x4b4] ss:$20 sps:$4 sm:$0xff]  }
  0x6f   :  { %731 = vmatprep.subr.bf16.mxu0 %v6510_v46  ;;  %2646 = vmatpush1.bf16.msra.mxu1 %v6541_v56  ;;  %v6580_v46 = vld [vmem:[#allocation4 + $0x4b0] ss:$20 sps:$4 sm:$0xff]   ;;  %v6610_v56 = vld [vmem:[#allocation4 + $0x3e8] ss:$20 sps:$4 sm:$0xff]  }
  0x70   :  { %550 = vmatmul.mubr.bf16.gmra.mxu0 %v7344_v48  ;;  %663 = vmatmul.mubr.bf16.gmra.mxu1 %v7344_v48 }
  0x71   :  { %559 = vmatprep.mubr.bf16.mxu0 %v8637_v0  ;;  %672 = vmatprep.mubr.bf16.mxu1 %v8637_v0 }
  0x72   :  { %732 = vmatpush1.bf16.msra.mxu0 %v6508_v49  ;;  %2647 = vmatprep.subr.bf16.mxu1 %v6549_v59  ;;  %v6594_v49 = vld [vmem:[#allocation4 + $0x464] ss:$20 sps:$4 sm:$0xff]  }
  0x73   :  { %733 = vmatprep.subr.bf16.mxu0 %v6514_v51  ;;  %2648 = vmatpush1.bf16.msra.mxu1 %v6547_v61  ;;  %v6600_v51 = vld [vmem:[#allocation4 + $0x43c] ss:$20 sps:$4 sm:$0xff]   ;;  %v6624_v59 = vld [vmem:[#allocation4 + $0x124] ss:$20 sps:$4 sm:$0xff]  }
  0x74   :  { %2649 = vmatprep.subr.bf16.mxu1 %v6555_v62 }
  0x76   :  { %734 = vmatpush1.bf16.msra.mxu0 %v6512_v54  ;;  %v6604_v54 = vld [vmem:[#allocation4 + $0x410] ss:$20 sps:$4 sm:$0xff]  }
  0x77   :  { %735 = vmatprep.subr.bf16.mxu0 %v6518_v55  ;;  %2650 = vmatpush1.bf16.msra.mxu1 %v6553_v2  ;;  %v6612_v55 = vld [vmem:[#allocation4 + $0x3ec] ss:$20 sps:$4 sm:$0xff]  }
  0x78   :  { %560 = vmatmul.mubr.bf16.gmra.mxu0 %v7353_v57  ;;  %673 = vmatmul.mubr.bf16.gmra.mxu1 %v7353_v57 }
  0x79   :  { %569 = vmatprep.mubr.bf16.mxu0 %v8637_v0  ;;  %682 = vmatprep.mubr.bf16.mxu1 %v8637_v0 }
  0x7a   :  { %736 = vmatpush1.bf16.msra.mxu0 %v6516_v58  ;;  %2651 = vmatprep.subr.bf16.mxu1 %v6561_v4  ;;  %v6616_v58 = vld [vmem:[#allocation4 + $0x3c0] ss:$20 sps:$4 sm:$0xff]  }
  0x7b   :  { %737 = vmatprep.subr.bf16.mxu0 %v6522_v60  ;;  %2652 = vmatpush1.bf16.msra.mxu1 %v6559_v5  ;;  %v179_v60 = vlaneseq }
  0x7c   :  { %2653 = vmatprep.subr.bf16.mxu1 %v6567_v6 }
  0x7d   :  { %v7409_v61 = vshrl.u32 %v179_v60, 7 }
  0x7e   :  { %738 = vmatpush1.bf16.msra.mxu0 %v6520_v63 }
  0x7f   :  { %2752 = vmatprep.subr.bf16.mxu0 %v6528_v1  ;;  %2654 = vmatpush1.bf16.msra.mxu1 %v6565_v7  ;;  %8657 = vst [vmem:[#allocation13_spill] sm:$0xff] %v7409_v61  ;;  %v8640_v62 = vsub.s32 2, %v7409_v61  ;;  %v7413_v63 = vsub.s32 0, %v7409_v61  ;;  %v7416_v1 = vsub.s32 1, %v7409_v61  ;;  %v8639_v2 = vsub.s32 3, %v7409_v61 }
  0x80   :  { %570 = vmatmul.mubr.bf16.gmra.mxu0 %v7362_v3  ;;  %683 = vmatmul.mubr.bf16.gmra.mxu1 %v7362_v3 }
  0x81   :  { %579 = vmatprep.mubr.bf16.mxu0 %v8637_v0  ;;  %692 = vmatprep.mubr.bf16.mxu1 %v8637_v0  ;;  %8658 = vst [vmem:[#allocation14_spill] sm:$0xff] %v7413_v63  ;;  %8659 = vst [vmem:[#allocation15_spill] sm:$0xff] %v7416_v1 }
  0x82   :  { %2655 = vmatprep.subr.bf16.mxu1 %v6573_v10 }
  0x83   :  { %2656 = vmatpush2.bf16.msra.mxu1 %v6571_v9 }
  0x84   :  { %2657 = vmatprep.subr.bf16.mxu1 %v6579_v11 }
  0x87   :  { %2658 = vmatpush2.bf16.msra.mxu1 %v6577_v12 }
  0x88   :  { %580 = vmatmul.mubr.bf16.gmra.mxu0 %v7371_v8  ;;  %693 = vmatmul.mubr.bf16.gmra.mxu1 %v7371_v8 }
  0x89   :  { %589 = vmatprep.mubr.bf16.mxu0 %v8637_v0  ;;  %702 = vmatprep.mubr.bf16.mxu1 %v8637_v0 }
  0x8a   :  { %2659 = vmatprep.subr.bf16.mxu1 %v6585_v14 }
  0x8b   :  { %2660 = vmatpush2.bf16.msra.mxu1 %v6583_v15 }
  0x8c   :  { %2661 = vmatprep.subr.bf16.mxu1 %v6591_v16 }
  0x8f   :  { %2662 = vmatpush2.bf16.msra.mxu1 %v6589_v17 }
  0x90   :  { %590 = vmatmul.mubr.bf16.gmra.mxu0 %v7380_v13  ;;  %703 = vmatmul.mubr.bf16.gmra.mxu1 %v7380_v13 }
  0x91   :  { %599 = vmatprep.mubr.bf16.mxu0 %v8637_v0  ;;  %712 = vmatprep.mubr.bf16.mxu1 %v8637_v0 }
  0x92   :  { %2663 = vmatprep.subr.bf16.mxu1 %v6597_v21 }
  0x93   :  { %2664 = vmatpush2.bf16.msra.mxu1 %v6595_v23 }
  0x94   :  { %2665 = vmatprep.subr.bf16.mxu1 %v6603_v26 }
  0x97   :  { %2666 = vmatpush2.bf16.msra.mxu1 %v6601_v28 }
  0x98   :  { %600 = vmatmul.mubr.bf16.gmra.mxu0 %v7389_v18  ;;  %713 = vmatmul.mubr.bf16.gmra.mxu1 %v7389_v18 }
  0x99   :  { %755 = vmatprep.mubr.bf16.mxu0 %v8637_v0  ;;  %2667 = vmatprep.subr.bf16.mxu1 %v6609_v30 }
  0x9b   :  { %2668 = vmatpush2.bf16.msra.mxu1 %v6607_v32 }
  0xa0   :  { %756 = vmatmul.mubr.bf16.vlgmr.msra.gmra.mxu0 %v7326_v34  ;;  %v6615_v34 = vld [vmem:[#allocation4 + $0x144] ss:$20 sps:$4 sm:$0xff]  }
  0xa1   :  { %765 = vmatprep.mubr.bf16.mxu0 %v8637_v0  ;;  %2753 = vmatpush1.bf16.msra.mxu0 %v6526_v19 }
  0xa2   :  { %2754 = vmatprep.subr.bf16.mxu0 %v6534_v20  ;;  %2669 = vmatprep.subr.bf16.mxu1 %v6615_v34 }
  0xa3   :  { %2670 = vmatpush2.bf16.msra.mxu1 %v6613_v36 }
  0xa4   :  { %2865 = vmatprep.subr.bf16.mxu1 %v6621_v37 }
  0xa5   :  { %2755 = vmatpush1.bf16.msra.mxu0 %v6532_v22 }
  0xa6   :  { %2756 = vmatprep.subr.bf16.mxu0 %v6540_v24 }
  0xa8   :  { %766 = vmatmul.mubr.bf16.gmra.mxu0 %v7335_v39  ;;  %v6564_v39 = vld [vmem:[#allocation4 + $0x2ac] ss:$20 sps:$4 sm:$0xff]  }
  0xa9   :  { %775 = vmatprep.mubr.bf16.mxu0 %v8637_v0  ;;  %2757 = vmatpush1.bf16.msra.mxu0 %v6538_v25 }
  0xaa   :  { %2758 = vmatprep.subr.bf16.mxu0 %v6546_v27 }
  0xad   :  { %2759 = vmatpush1.bf16.msra.mxu0 %v6544_v29 }
  0xae   :  { %2760 = vmatprep.subr.bf16.mxu0 %v6552_v31 }
  0xb0   :  { %776 = vmatmul.mubr.bf16.gmra.mxu0 %v7344_v48  ;;  %v6586_v48 = vld [vmem:[#allocation4 + $0x488] ss:$20 sps:$4 sm:$0xff]  }
  0xb1   :  { %785 = vmatprep.mubr.bf16.mxu0 %v8637_v0  ;;  %2761 = vmatpush1.bf16.msra.mxu0 %v6550_v33 }
  0xb2   :  { %2762 = vmatprep.subr.bf16.mxu0 %v6558_v35 }
  0xb5   :  { %2763 = vmatpush1.bf16.msra.mxu0 %v6556_v38 }
  0xb6   :  { %2764 = vmatprep.subr.bf16.mxu0 %v6564_v39 }
  0xb8   :  { %786 = vmatmul.mubr.bf16.gmra.mxu0 %v7353_v57  ;;  %v6618_v57 = vld [vmem:[#allocation4 + $0x3c4] ss:$20 sps:$4 sm:$0xff]  }
  0xb9   :  { %795 = vmatprep.mubr.bf16.mxu0 %v8637_v0  ;;  %2765 = vmatpush1.bf16.msra.mxu0 %v6562_v40 }
  0xba   :  { %2766 = vmatprep.subr.bf16.mxu0 %v6570_v41 }
  0xbd   :  { %2767 = vmatpush1.bf16.msra.mxu0 %v6568_v42 }
  0xbe   :  { %2768 = vmatprep.subr.bf16.mxu0 %v6576_v43 }
  0xc0   :  { %796 = vmatmul.mubr.bf16.gmra.mxu0 %v7362_v3  ;;  %v7422_v3 = vld [vmem:[%s8625_s2] sm:$0x3f] }
  0xc1   :  { %805 = vmatprep.mubr.bf16.mxu0 %v8637_v0  ;;  %2769 = vmatpush2.bf16.msra.mxu0 %v6574_v44  ;;  %v7427_v4 = vrot.slane %v7422_v3, %v8640_v62  ;;  %v7431_v5 = vrot.slane %v7422_v3, %v7413_v63  ;;  %v7435_v6 = vrot.slane %v7422_v3, %v7416_v1 }
  0xc2   :  { %2770 = vmatprep.subr.bf16.mxu0 %v6582_v45  ;;  %v7440_v7 = vrot.slane %v7422_v3, %v8639_v2 }
  0xc5   :  { %2771 = vmatpush2.bf16.msra.mxu0 %v6580_v46 }
  0xc6   :  { %2772 = vmatprep.subr.bf16.mxu0 %v6588_v47 }
  0xc8   :  { %806 = vmatmul.mubr.bf16.gmra.mxu0 %v7371_v8 }
  0xc9   :  { %815 = vmatprep.mubr.bf16.mxu0 %v8637_v0  ;;  %2773 = vmatpush2.bf16.msra.mxu0 %v6586_v48 }
  0xca   :  { %2774 = vmatprep.subr.bf16.mxu0 %v6594_v49 }
  0xcd   :  { %2775 = vmatpush2.bf16.msra.mxu0 %v6592_v50 }
  0xce   :  { %2776 = vmatprep.subr.bf16.mxu0 %v6600_v51 }
  0xd0   :  { %816 = vmatmul.mubr.bf16.gmra.mxu0 %v7380_v13 }
  0xd1   :  { %825 = vmatprep.mubr.bf16.mxu0 %v8637_v0  ;;  %2777 = vmatpush2.bf16.msra.mxu0 %v6598_v52  ;;  %v6619_v52 = vld [vmem:[#allocation4 + $0x618] ss:$20 sps:$4 sm:$0xff]  }
  0xd2   :  { %2778 = vmatprep.subr.bf16.mxu0 %v6606_v53  ;;  %v6622_v53 = vld [vmem:[#allocation4 + $0x120] ss:$20 sps:$4 sm:$0xff]   ;;  %v6696_v0 = vld [vmem:[#allocation4 + $0x1c4] ss:$20 sps:$4 sm:$0xff]  }
  0xd5   :  { %2779 = vmatpush2.bf16.msra.mxu0 %v6604_v54 }
  0xd6   :  { %2780 = vmatprep.subr.bf16.mxu0 %v6612_v55 }
  0xd8   :  { %826 = vmatmul.mubr.bf16.gmra.mxu0 %v7389_v18 }
  0xd9   :  { %2781 = vmatpush2.bf16.msra.mxu0 %v6610_v56 }
  0xda   :  { %2782 = vmatprep.subr.bf16.mxu0 %v6618_v57 }
  0xdd   :  { %2783 = vmatpush2.bf16.msra.mxu0 %v6616_v58  ;;  %v6627_v58 = vld [vmem:[#allocation4 + $0x5f4] ss:$20 sps:$4 sm:$0xff]  }
  0xde   :  { %2978 = vmatprep.subr.bf16.mxu0 %v6624_v59  ;;  %v6630_v59 = vld [vmem:[#allocation4 + $0xfc] ss:$20 sps:$4 sm:$0xff]  }
 0x120   :  { %v531_v8 = vpop.f32.mrf.mxu0  ;;  %v644_v9 = vpop.f32.mrf.mxu1 }
 0x121   :  { %v645_v10 = vadd.f32 %v644_v9, %v7427_v4  ;;  %v532_v13 = vadd.f32 %v531_v8, %v7431_v5 }
 0x122   :  { %v533_v11 = vpop.f32.mrf.mxu0  ;;  %v646_v12 = vpop.f32.mrf.mxu1 }
 0x123   :  { %v534_v14 = vadd.f32 %v533_v11, %v7435_v6  ;;  %v647_v15 = vadd.f32 %v646_v12, %v7440_v7  ;;  %v838_v16 = vmax.f32 %v645_v10, 0.0  ;;  %v836_v24 = vmax.f32 %v532_v13, 0.0 }
 0x124   :  { %v535_v17 = vpop.f32.mrf.mxu0  ;;  %v648_v18 = vpop.f32.mrf.mxu1 }
 0x125   :  { %v839_v19 = vmax.f32 %v647_v15, 0.0  ;;  %v536_v20 = vadd.f32 %v535_v17, %v7431_v5  ;;  %v649_v21 = vadd.f32 %v648_v18, %v7427_v4  ;;  %v837_v25 = vmax.f32 %v534_v14, 0.0 }
 0x126   :  { %v537_v22 = vpop.f32.mrf.mxu0  ;;  %v650_v23 = vpop.f32.mrf.mxu1  ;;  %v934_v28 = vmin.f32 %v838_v16, 6.0  ;;  %v932_v42 = vmin.f32 %v836_v24, 6.0 }
 0x127   :  { %v538_v26 = vadd.f32 %v537_v22, %v7435_v6  ;;  %v651_v27 = vadd.f32 %v650_v23, %v7440_v7  ;;  %v935_v29 = vmin.f32 %v839_v19, 6.0  ;;  %v842_v30 = vmax.f32 %v536_v20, 0.0  ;;  %v6625_v20 = vld [vmem:[#allocation4 + $0x5f0] ss:$20 sps:$4 sm:$0xff]  }
 0x128   :  { %v844_v31 = vmax.f32 %v649_v21, 0.0  ;;  %v541_v32 = vpop.f32.mrf.mxu0  ;;  %v654_v33 = vpop.f32.mrf.mxu1  ;;  %v933_v43 = vmin.f32 %v837_v25, 6.0  ;;  %v6628_v21 = vld [vmem:[#allocation4 + $0xf8] ss:$20 sps:$4 sm:$0xff]  }
 0x129   :  { %v843_v34 = vmax.f32 %v538_v26, 0.0  ;;  %v845_v35 = vmax.f32 %v651_v27, 0.0  ;;  %v542_v36 = vadd.f32 %v541_v32, %v7431_v5  ;;  %v655_v37 = vadd.f32 %v654_v33, %v7427_v4  ;;  %v6636_v32 = vld [vmem:[#allocation4 + $0xd4] ss:$20 sps:$4 sm:$0xff]  }
 0x12a   :  { %v938_v38 = vmin.f32 %v842_v30, 6.0  ;;  %v940_v39 = vmin.f32 %v844_v31, 6.0  ;;  %v543_v40 = vpop.f32.mrf.mxu0  ;;  %v656_v41 = vpop.f32.mrf.mxu1  ;;  %v6633_v31 = vld [vmem:[#allocation4 + $0x5cc] ss:$20 sps:$4 sm:$0xff]  }
 0x12b   :  { %v939_v44 = vmin.f32 %v843_v34, 6.0  ;;  %v941_v45 = vmin.f32 %v845_v35, 6.0  ;;  %v848_v46 = vmax.f32 %v542_v36, 0.0  ;;  %v850_v47 = vmax.f32 %v655_v37, 0.0 }
 0x12c   :  { %v544_v48 = vadd.f32 %v543_v40, %v7435_v6  ;;  %v657_v49 = vadd.f32 %v656_v41, %v7440_v7  ;;  %v545_v50 = vpop.f32.mrf.mxu0  ;;  %v658_v51 = vpop.f32.mrf.mxu1  ;;  %v7454_v54 = vpack.c.bf16 %v938_v38, %v932_v42  ;;  %v7456_v55 = vpack.c.bf16 %v940_v39, %v934_v28 }
 0x12d   :  { %v546_v56 = vadd.f32 %v545_v50, %v7431_v5  ;;  %v659_v57 = vadd.f32 %v658_v51, %v7427_v4  ;;  %v7460_v11 = vpack.c.bf16 %v939_v44, %v933_v43  ;;  %v7462_v12 = vpack.c.bf16 %v941_v45, %v935_v29  ;;  %v6631_v43 = vld [vmem:[#allocation4 + $0x5c8] ss:$20 sps:$4 sm:$0xff]   ;;  %v6634_v44 = vld [vmem:[#allocation4 + $0xd0] ss:$20 sps:$4 sm:$0xff]   ;;  %v6642_v50 = vld [vmem:[#allocation4 + $0xac] ss:$20 sps:$4 sm:$0xff]  }
 0x12e   :  { %v849_v60 = vmax.f32 %v544_v48, 0.0  ;;  %v851_v8 = vmax.f32 %v657_v49, 0.0  ;;  %v547_v9 = vpop.f32.mrf.mxu0  ;;  %v660_v10 = vpop.f32.mrf.mxu1  ;;  %v946_v17 = vmin.f32 %v850_v47, 6.0  ;;  %v944_v33 = vmin.f32 %v848_v46, 6.0  ;;  %v6639_v49 = vld [vmem:[#allocation4 + $0x5a4] ss:$20 sps:$4 sm:$0xff]  }
 0x12f   :  { %v854_v13 = vmax.f32 %v546_v56, 0.0  ;;  %v856_v14 = vmax.f32 %v659_v57, 0.0  ;;  %v548_v15 = vadd.f32 %v547_v9, %v7435_v6  ;;  %v661_v16 = vadd.f32 %v660_v10, %v7440_v7  ;;  %2671 = vmatprep.mubr.bf16.mxu1 %v7460_v11  ;;  %2784 = vmatprep.mubr.bf16.mxu0 %v7462_v12 }
 0x130   :  { %v551_v18 = vpop.f32.mrf.mxu0  ;;  %v664_v19 = vpop.f32.mrf.mxu1  ;;  %v947_v22 = vmin.f32 %v851_v8, 6.0  ;;  %2672 = vmatmul.mubr.bf16.vlgmr.msra.gmra.mxu1 %v7454_v54  ;;  %2785 = vmatmul.mubr.bf16.vlgmr.msra.gmra.mxu0 %v7456_v55  ;;  %v945_v34 = vmin.f32 %v849_v60, 6.0 }
 0x131   :  { %v952_v23 = vmin.f32 %v856_v14, 6.0  ;;  %v855_v24 = vmax.f32 %v548_v15, 0.0  ;;  %v857_v25 = vmax.f32 %v661_v16, 0.0  ;;  %v950_v26 = vmin.f32 %v854_v13, 6.0  ;;  %2866 = vmatpush1.bf16.msra.mxu1 %v6619_v52  ;;  %2979 = vmatpush1.bf16.msra.mxu0 %v6622_v53  ;;  %v6637_v15 = vld [vmem:[#allocation4 + $0x5a0] ss:$20 sps:$4 sm:$0xff]  }
 0x132   :  { %v7471_v27 = vadd.f32 %v551_v18, %v7431_v5  ;;  %v665_v28 = vadd.f32 %v664_v19, %v7427_v4  ;;  %v553_v29 = vpop.f32.mrf.mxu0  ;;  %v666_v30 = vpop.f32.mrf.mxu1  ;;  %2867 = vmatprep.subr.bf16.mxu1 %v6627_v58  ;;  %2980 = vmatprep.subr.bf16.mxu0 %v6630_v59  ;;  %v6640_v16 = vld [vmem:[#allocation4 + $0xa8] ss:$20 sps:$4 sm:$0xff]  }
 0x133   :  { %v951_v35 = vmin.f32 %v855_v24, 6.0  ;;  %v953_v36 = vmin.f32 %v857_v25, 6.0  ;;  %v7474_v37 = vpack.c.bf16 %v952_v23, %v946_v17  ;;  %v554_v39 = vadd.f32 %v553_v29, %v7435_v6 }
 0x134   :  { %v862_v38 = vmax.f32 %v665_v28, 0.0  ;;  %v667_v40 = vadd.f32 %v666_v30, %v7440_v7  ;;  %v555_v41 = vpop.f32.mrf.mxu0  ;;  %v668_v42 = vpop.f32.mrf.mxu1  ;;  %v7484_v51 = vpack.c.bf16 %v950_v26, %v944_v33  ;;  %v860_v52 = vmax.f32 %v7471_v27, 0.0  ;;  %v6645_v26 = vld [vmem:[#allocation4 + $0x57c] ss:$20 sps:$4 sm:$0xff]   ;;  %v6648_v27 = vld [vmem:[#allocation4 + $0x84] ss:$20 sps:$4 sm:$0xff]  }
 0x135   :  { %v556_v45 = vadd.f32 %v555_v41, %v7431_v5  ;;  %v669_v46 = vadd.f32 %v668_v42, %v7427_v4  ;;  %v7480_v47 = vpack.c.bf16 %v951_v35, %v945_v34  ;;  %v7482_v48 = vpack.c.bf16 %v953_v36, %v947_v22  ;;  %2868 = vmatpush1.bf16.msra.mxu1 %v6625_v20 }
 0x136   :  { %v861_v53 = vmax.f32 %v554_v39, 0.0  ;;  %v863_v56 = vmax.f32 %v667_v40, 0.0  ;;  %2981 = vmatpush1.bf16.msra.mxu0 %v6628_v21  ;;  %v557_v57 = vpop.f32.mrf.mxu0  ;;  %v670_v58 = vpop.f32.mrf.mxu1  ;;  %v958_v10 = vmin.f32 %v862_v38, 6.0  ;;  %2869 = vmatprep.subr.bf16.mxu1 %v6633_v31  ;;  %v956_v28 = vmin.f32 %v860_v52, 6.0  ;;  %v6643_v39 = vld [vmem:[#allocation4 + $0x578] ss:$20 sps:$4 sm:$0xff]  }
 0x137   :  { %v866_v59 = vmax.f32 %v556_v45, 0.0  ;;  %v868_v60 = vmax.f32 %v669_v46, 0.0  ;;  %v558_v8 = vadd.f32 %v557_v57, %v7435_v6  ;;  %v671_v9 = vadd.f32 %v670_v58, %v7440_v7  ;;  %2681 = vmatprep.mubr.bf16.mxu1 %v7480_v47  ;;  %2794 = vmatprep.mubr.bf16.mxu0 %v7482_v48  ;;  %v6646_v40 = vld [vmem:[#allocation4 + $0x80] ss:$20 sps:$4 sm:$0xff]   ;;  %v6654_v46 = vld [vmem:[#allocation4 + $0x5c] ss:$20 sps:$4 sm:$0xff]  }
 0x138   :  { %v561_v13 = vpop.f32.mrf.mxu0  ;;  %v674_v14 = vpop.f32.mrf.mxu1  ;;  %2982 = vmatprep.subr.bf16.mxu0 %v6636_v32  ;;  %v959_v17 = vmin.f32 %v863_v56, 6.0  ;;  %2682 = vmatmul.mubr.bf16.gmra.mxu1 %v7484_v51  ;;  %v957_v29 = vmin.f32 %v861_v53, 6.0  ;;  %v6651_v45 = vld [vmem:[#allocation4 + $0x554] ss:$20 sps:$4 sm:$0xff]  }
 0x139   :  { %v964_v18 = vmin.f32 %v868_v60, 6.0  ;;  %v867_v19 = vmax.f32 %v558_v8, 0.0  ;;  %v869_v20 = vmax.f32 %v671_v9, 0.0  ;;  %2795 = vmatmul.mubr.bf16.gmra.mxu0 %v7474_v37  ;;  %v962_v21 = vmin.f32 %v866_v59, 6.0  ;;  %2870 = vmatpush1.bf16.msra.mxu1 %v6631_v43 }
 0x13a   :  { %v7494_v22 = vadd.f32 %v561_v13, %v7431_v5  ;;  %v675_v23 = vadd.f32 %v674_v14, %v7427_v4  ;;  %2983 = vmatpush1.bf16.msra.mxu0 %v6634_v44  ;;  %v563_v24 = vpop.f32.mrf.mxu0  ;;  %v676_v25 = vpop.f32.mrf.mxu1  ;;  %2871 = vmatprep.subr.bf16.mxu1 %v6639_v49  ;;  %v6649_v14 = vld [vmem:[#allocation4 + $0x550] ss:$20 sps:$4 sm:$0xff]  }
 0x13b   :  { %v963_v30 = vmin.f32 %v867_v19, 6.0  ;;  %v965_v31 = vmin.f32 %v869_v20, 6.0  ;;  %2984 = vmatprep.subr.bf16.mxu0 %v6642_v50  ;;  %v7497_v32 = vpack.c.bf16 %v964_v18, %v958_v10  ;;  %v564_v34 = vadd.f32 %v563_v24, %v7435_v6 }
 0x13c   :  { %v874_v33 = vmax.f32 %v675_v23, 0.0  ;;  %v677_v35 = vadd.f32 %v676_v25, %v7440_v7  ;;  %v565_v36 = vpop.f32.mrf.mxu0  ;;  %v678_v38 = vpop.f32.mrf.mxu1  ;;  %v7507_v49 = vpack.c.bf16 %v962_v21, %v956_v28  ;;  %v872_v50 = vmax.f32 %v7494_v22, 0.0  ;;  %v6657_v25 = vld [vmem:[#allocation4 + $0x52c] ss:$20 sps:$4 sm:$0xff]  }
 0x13d   :  { %v566_v41 = vadd.f32 %v565_v36, %v7431_v5  ;;  %v679_v42 = vadd.f32 %v678_v38, %v7427_v4  ;;  %v7503_v43 = vpack.c.bf16 %v963_v30, %v957_v29  ;;  %v7505_v44 = vpack.c.bf16 %v965_v31, %v959_v17  ;;  %2872 = vmatpush1.bf16.msra.mxu1 %v6637_v15  ;;  %v6652_v15 = vld [vmem:[#allocation4 + $0x58] ss:$20 sps:$4 sm:$0xff]  }
 0x13e   :  { %v873_v52 = vmax.f32 %v564_v34, 0.0  ;;  %v875_v53 = vmax.f32 %v677_v35, 0.0  ;;  %2985 = vmatpush1.bf16.msra.mxu0 %v6640_v16  ;;  %v567_v56 = vpop.f32.mrf.mxu0  ;;  %v680_v57 = vpop.f32.mrf.mxu1  ;;  %v970_v9 = vmin.f32 %v874_v33, 6.0  ;;  %2873 = vmatprep.subr.bf16.mxu1 %v6645_v26  ;;  %v6660_v26 = vld [vmem:[#allocation4 + $0x34] ss:$20 sps:$4 sm:$0xff]  }
 0x13f   :  { %v878_v58 = vmax.f32 %v566_v41, 0.0  ;;  %v880_v59 = vmax.f32 %v679_v42, 0.0  ;;  %v568_v60 = vadd.f32 %v567_v56, %v7435_v6  ;;  %v681_v8 = vadd.f32 %v680_v57, %v7440_v7  ;;  %2691 = vmatprep.mubr.bf16.mxu1 %v7503_v43  ;;  %2804 = vmatprep.mubr.bf16.mxu0 %v7505_v44 }
 0x140   :  { %v571_v10 = vpop.f32.mrf.mxu0  ;;  %v684_v13 = vpop.f32.mrf.mxu1  ;;  %2986 = vmatprep.subr.bf16.mxu0 %v6648_v27  ;;  %v971_v16 = vmin.f32 %v875_v53, 6.0  ;;  %2692 = vmatmul.mubr.bf16.gmra.mxu1 %v7507_v49  ;;  %v968_v27 = vmin.f32 %v872_v50, 6.0  ;;  %v969_v28 = vmin.f32 %v873_v52, 6.0 }
 0x141   :  { %v976_v17 = vmin.f32 %v880_v59, 6.0  ;;  %v879_v18 = vmax.f32 %v568_v60, 0.0  ;;  %v881_v19 = vmax.f32 %v681_v8, 0.0  ;;  %2805 = vmatmul.mubr.bf16.gmra.mxu0 %v7497_v32  ;;  %v974_v20 = vmin.f32 %v878_v58, 6.0  ;;  %2874 = vmatpush1.bf16.msra.mxu1 %v6643_v39  ;;  %v6655_v39 = vld [vmem:[#allocation4 + $0x528] ss:$20 sps:$4 sm:$0xff]  }
 0x142   :  { %v572_v21 = vadd.f32 %v571_v10, %v7431_v5  ;;  %v685_v22 = vadd.f32 %v684_v13, %v7427_v4  ;;  %2987 = vmatpush1.bf16.msra.mxu0 %v6646_v40  ;;  %v573_v23 = vpop.f32.mrf.mxu0  ;;  %v686_v24 = vpop.f32.mrf.mxu1  ;;  %2875 = vmatprep.subr.bf16.mxu1 %v6651_v45  ;;  %v6658_v40 = vld [vmem:[#allocation4 + $0x30] ss:$20 sps:$4 sm:$0xff]   ;;  %v6666_v13 = vld [vmem:[#allocation4 + $0xc] ss:$20 sps:$4 sm:$0xff]  }
 0x143   :  { %v975_v29 = vmin.f32 %v879_v18, 6.0  ;;  %v977_v30 = vmin.f32 %v881_v19, 6.0  ;;  %2988 = vmatprep.subr.bf16.mxu0 %v6654_v46  ;;  %v7518_v31 = vpack.c.bf16 %v976_v17, %v970_v9  ;;  %v574_v34 = vadd.f32 %v573_v23, %v7435_v6  ;;  %v6663_v45 = vld [vmem:[#allocation4 + $0x504] ss:$20 sps:$4 sm:$0xff]  }
 0x144   :  { %v886_v33 = vmax.f32 %v685_v22, 0.0  ;;  %v687_v35 = vadd.f32 %v686_v24, %v7440_v7  ;;  %v575_v36 = vpop.f32.mrf.mxu0  ;;  %v688_v38 = vpop.f32.mrf.mxu1  ;;  %v7528_v46 = vpack.c.bf16 %v974_v20, %v968_v27  ;;  %v884_v53 = vmax.f32 %v572_v21, 0.0 }
 0x145   :  { %v576_v41 = vadd.f32 %v575_v36, %v7431_v5  ;;  %v689_v42 = vadd.f32 %v688_v38, %v7427_v4  ;;  %v7524_v50 = vpack.c.bf16 %v975_v29, %v969_v28  ;;  %v7526_v52 = vpack.c.bf16 %v977_v30, %v971_v16  ;;  %2876 = vmatpush1.bf16.msra.mxu1 %v6649_v14 }
 0x146   :  { %8661 = vst [vmem:[#allocation17_spill] sm:$0xff] %v7528_v46  ;;  %v885_v56 = vmax.f32 %v574_v34, 0.0  ;;  %v887_v57 = vmax.f32 %v687_v35, 0.0  ;;  %2989 = vmatpush1.bf16.msra.mxu0 %v6652_v15  ;;  %v577_v58 = vpop.f32.mrf.mxu0  ;;  %v690_v59 = vpop.f32.mrf.mxu1  ;;  %v982_v16 = vmin.f32 %v886_v33, 6.0  ;;  %2877 = vmatprep.subr.bf16.mxu1 %v6657_v25  ;;  %v6661_v25 = vld [vmem:[#allocation4 + $0x500] ss:$20 sps:$4 sm:$0xff]  }
 0x147   :  { %8660 = vst [vmem:[#allocation16_spill] sm:$0xff] %v7524_v50  ;;  %v890_v60 = vmax.f32 %v576_v41, 0.0  ;;  %v892_v8 = vmax.f32 %v689_v42, 0.0  ;;  %v578_v9 = vadd.f32 %v577_v58, %v7435_v6  ;;  %v691_v10 = vadd.f32 %v690_v59, %v7440_v7  ;;  %2701 = vmatprep.mubr.bf16.mxu1 %v7524_v50  ;;  %2814 = vmatprep.mubr.bf16.mxu0 %v7526_v52  ;;  %v6672_v42 = vld [vmem:[#allocation4 + $0x264] ss:$20 sps:$4 sm:$0xff]  }
 0x148   :  { %v581_v17 = vpop.f32.mrf.mxu0  ;;  %v694_v18 = vpop.f32.mrf.mxu1  ;;  %2990 = vmatprep.subr.bf16.mxu0 %v6660_v26  ;;  %v983_v14 = vmin.f32 %v887_v57, 6.0  ;;  %2702 = vmatmul.mubr.bf16.gmra.mxu1 %v7528_v46  ;;  %v6664_v26 = vld [vmem:[#allocation4 + $0x8] ss:$20 sps:$4 sm:$0xff]   ;;  %v980_v28 = vmin.f32 %v884_v53, 6.0  ;;  %v981_v29 = vmin.f32 %v885_v56, 6.0 }
 0x149   :  { %v988_v15 = vmin.f32 %v892_v8, 6.0  ;;  %v891_v19 = vmax.f32 %v578_v9, 0.0  ;;  %v893_v20 = vmax.f32 %v691_v10, 0.0  ;;  %2815 = vmatmul.mubr.bf16.gmra.mxu0 %v7518_v31  ;;  %v986_v21 = vmin.f32 %v890_v60, 6.0  ;;  %2878 = vmatpush1.bf16.msra.mxu1 %v6655_v39 }
 0x14a   :  { %v7537_v22 = vadd.f32 %v581_v17, %v7431_v5  ;;  %v695_v23 = vadd.f32 %v694_v18, %v7427_v4  ;;  %2991 = vmatpush1.bf16.msra.mxu0 %v6658_v40  ;;  %v583_v24 = vpop.f32.mrf.mxu0  ;;  %v696_v27 = vpop.f32.mrf.mxu1  ;;  %2879 = vmatprep.subr.bf16.mxu1 %v6663_v45  ;;  %v6669_v40 = vld [vmem:[#allocation4 + $0x75c] ss:$20 sps:$4 sm:$0xff]   ;;  %v6667_v45 = vld [vmem:[#allocation4 + $0x758] ss:$20 sps:$4 sm:$0xff]  }
 0x14b   :  { %v987_v30 = vmin.f32 %v891_v19, 6.0  ;;  %v989_v33 = vmin.f32 %v893_v20, 6.0  ;;  %2992 = vmatprep.subr.bf16.mxu0 %v6666_v13  ;;  %v7540_v34 = vpack.c.bf16 %v988_v15, %v982_v16  ;;  %v584_v36 = vadd.f32 %v583_v24, %v7435_v6  ;;  %v6670_v16 = vld [vmem:[#allocation4 + $0x260] ss:$20 sps:$4 sm:$0xff]   ;;  %v6678_v20 = vld [vmem:[#allocation4 + $0x23c] ss:$20 sps:$4 sm:$0xff]  }
 0x14c   :  { %v898_v35 = vmax.f32 %v695_v23, 0.0  ;;  %v697_v38 = vadd.f32 %v696_v27, %v7440_v7  ;;  %v585_v41 = vpop.f32.mrf.mxu0  ;;  %v698_v39 = vpop.f32.mrf.mxu1  ;;  %v7550_v59 = vpack.c.bf16 %v986_v21, %v980_v28  ;;  %v896_v60 = vmax.f32 %v7537_v22, 0.0 }
 0x14d   :  { %v586_v57 = vadd.f32 %v585_v41, %v7431_v5  ;;  %v699_v53 = vadd.f32 %v698_v39, %v7427_v4  ;;  %v7546_v56 = vpack.c.bf16 %v987_v30, %v981_v29  ;;  %v7548_v58 = vpack.c.bf16 %v989_v33, %v983_v14  ;;  %2880 = vmatpush1.bf16.msra.mxu1 %v6661_v25  ;;  %v6675_v14 = vld [vmem:[#allocation4 + $0x734] ss:$20 sps:$4 sm:$0xff]  }
 0x14e   :  { %8663 = vst [vmem:[#allocation19_spill] sm:$0xff] %v7550_v59  ;;  %v897_v8 = vmax.f32 %v584_v36, 0.0  ;;  %v899_v9 = vmax.f32 %v697_v38, 0.0  ;;  %2993 = vmatpush1.bf16.msra.mxu0 %v6664_v26  ;;  %v587_v10 = vpop.f32.mrf.mxu0  ;;  %v700_v13 = vpop.f32.mrf.mxu1  ;;  %v994_v21 = vmin.f32 %v898_v35, 6.0  ;;  %2881 = vmatprep.subr.bf16.mxu1 %v6669_v40  ;;  %v6673_v36 = vld [vmem:[#allocation4 + $0x730] ss:$20 sps:$4 sm:$0xff]  }
 0x14f   :  { %8662 = vst [vmem:[#allocation18_spill] sm:$0xff] %v7546_v56  ;;  %v902_v17 = vmax.f32 %v586_v57, 0.0  ;;  %v904_v18 = vmax.f32 %v699_v53, 0.0  ;;  %v588_v15 = vadd.f32 %v587_v10, %v7435_v6  ;;  %v701_v19 = vadd.f32 %v700_v13, %v7440_v7  ;;  %2711 = vmatprep.mubr.bf16.mxu1 %v7546_v56  ;;  %2824 = vmatprep.mubr.bf16.mxu0 %v7548_v58  ;;  %v6676_v38 = vld [vmem:[#allocation4 + $0x238] ss:$20 sps:$4 sm:$0xff]  }
 0x150   :  { %v591_v22 = vpop.f32.mrf.mxu0  ;;  %v704_v23 = vpop.f32.mrf.mxu1  ;;  %2994 = vmatprep.subr.bf16.mxu0 %v6672_v42  ;;  %v995_v24 = vmin.f32 %v899_v9, 6.0  ;;  %2712 = vmatmul.mubr.bf16.gmra.mxu1 %v7550_v59  ;;  %v992_v41 = vmin.f32 %v896_v60, 6.0  ;;  %v993_v39 = vmin.f32 %v897_v8, 6.0 }
 0x151   :  { %v1000_v27 = vmin.f32 %v904_v18, 6.0  ;;  %v903_v25 = vmax.f32 %v588_v15, 0.0  ;;  %v905_v26 = vmax.f32 %v701_v19, 0.0  ;;  %2825 = vmatmul.mubr.bf16.gmra.mxu0 %v7540_v34  ;;  %v998_v28 = vmin.f32 %v902_v17, 6.0  ;;  %2882 = vmatpush2.bf16.msra.mxu1 %v6667_v45  ;;  %v6684_v17 = vld [vmem:[#allocation4 + $0x214] ss:$20 sps:$4 sm:$0xff]  }
 0x152   :  { %v592_v29 = vadd.f32 %v591_v22, %v7431_v5  ;;  %v705_v30 = vadd.f32 %v704_v23, %v7427_v4  ;;  %2995 = vmatpush2.bf16.msra.mxu0 %v6670_v16  ;;  %v593_v33 = vpop.f32.mrf.mxu0  ;;  %v706_v35 = vpop.f32.mrf.mxu1  ;;  %2883 = vmatprep.subr.bf16.mxu1 %v6675_v14  ;;  %v6681_v16 = vld [vmem:[#allocation4 + $0x70c] ss:$20 sps:$4 sm:$0xff]   ;;  %v6679_v19 = vld [vmem:[#allocation4 + $0x708] ss:$20 sps:$4 sm:$0xff]  }
 0x153   :  { %v999_v40 = vmin.f32 %v903_v25, 6.0  ;;  %v1001_v42 = vmin.f32 %v905_v26, 6.0  ;;  %2996 = vmatprep.subr.bf16.mxu0 %v6678_v20  ;;  %v7561_v57 = vpack.c.bf16 %v1000_v27, %v994_v21  ;;  %v594_v9 = vadd.f32 %v593_v33, %v7435_v6  ;;  %v6682_v25 = vld [vmem:[#allocation4 + $0x210] ss:$20 sps:$4 sm:$0xff]  }
 0x154   :  { %v910_v53 = vmax.f32 %v705_v30, 0.0  ;;  %v707_v10 = vadd.f32 %v706_v35, %v7440_v7  ;;  %v595_v13 = vpop.f32.mrf.mxu0  ;;  %v708_v45 = vpop.f32.mrf.mxu1  ;;  %v7571_v14 = vpack.c.bf16 %v998_v28, %v992_v41  ;;  %v908_v20 = vmax.f32 %v592_v29, 0.0  ;;  %v6690_v28 = vld [vmem:[#allocation4 + $0x1ec] ss:$20 sps:$4 sm:$0xff]  }
 0x155   :  { %v596_v18 = vadd.f32 %v595_v13, %v7431_v5  ;;  %v709_v60 = vadd.f32 %v708_v45, %v7427_v4  ;;  %v7567_v8 = vpack.c.bf16 %v999_v40, %v993_v39  ;;  %v7569_v15 = vpack.c.bf16 %v1001_v42, %v995_v24  ;;  %2884 = vmatpush2.bf16.msra.mxu1 %v6673_v36  ;;  %v6687_v24 = vld [vmem:[#allocation4 + $0x6e4] ss:$20 sps:$4 sm:$0xff]  }
 0x156   :  { %v909_v21 = vmax.f32 %v594_v9, 0.0  ;;  %v911_v22 = vmax.f32 %v707_v10, 0.0  ;;  %2997 = vmatpush2.bf16.msra.mxu0 %v6676_v38  ;;  %v597_v23 = vpop.f32.mrf.mxu0  ;;  %v710_v27 = vpop.f32.mrf.mxu1  ;;  %v1006_v29 = vmin.f32 %v910_v53, 6.0  ;;  %2885 = vmatprep.subr.bf16.mxu1 %v6681_v16  ;;  %v8641_v36 = vsub.s32 4, %v7409_v61  ;;  %v6685_v10 = vld [vmem:[#allocation4 + $0x6e0] ss:$20 sps:$4 sm:$0xff]  }
 0x157   :  { %8664 = vst [vmem:[#allocation20_spill] sm:$0xff] %v7567_v8  ;;  %v914_v26 = vmax.f32 %v596_v18, 0.0  ;;  %v916_v30 = vmax.f32 %v709_v60, 0.0  ;;  %v598_v33 = vadd.f32 %v597_v23, %v7435_v6  ;;  %v711_v35 = vadd.f32 %v710_v27, %v7440_v7  ;;  %2721 = vmatprep.mubr.bf16.mxu1 %v7567_v8  ;;  %2834 = vmatprep.mubr.bf16.mxu0 %v7569_v15 }
 0x158   :  { %v601_v41 = vpop.f32.mrf.mxu0  ;;  %v714_v39 = vpop.f32.mrf.mxu1  ;;  %2998 = vmatprep.subr.bf16.mxu0 %v6684_v17  ;;  %v1007_v38 = vmin.f32 %v911_v22, 6.0  ;;  %2722 = vmatmul.mubr.bf16.gmra.mxu1 %v7571_v14  ;;  %v1004_v13 = vmin.f32 %v908_v20, 6.0  ;;  %v6688_v17 = vld [vmem:[#allocation4 + $0x1e8] ss:$20 sps:$4 sm:$0xff]   ;;  %v201_v60 = vsub.s32 5, %v7409_v61  ;;  %v1005_v22 = vmin.f32 %v909_v21, 6.0 }
 0x159   :  { %v1012_v40 = vmin.f32 %v916_v30, 6.0  ;;  %v915_v42 = vmax.f32 %v598_v33, 0.0  ;;  %v917_v9 = vmax.f32 %v711_v35, 0.0  ;;  %2835 = vmatmul.mubr.bf16.gmra.mxu0 %v7561_v57  ;;  %v1010_v45 = vmin.f32 %v914_v26, 6.0  ;;  %2886 = vmatpush2.bf16.msra.mxu1 %v6679_v19 }
 0x15a   :  { %v715_v18 = vadd.f32 %v714_v39, %v7427_v4  ;;  %2999 = vmatpush2.bf16.msra.mxu0 %v6682_v25  ;;  %v603_v53 = vpop.f32.mrf.mxu0  ;;  %v716_v16 = vpop.f32.mrf.mxu1  ;;  %v602_v30 = vadd.f32 %v601_v41, %v7431_v5  ;;  %2887 = vmatprep.subr.bf16.mxu1 %v6687_v24  ;;  %v6693_v39 = vld [vmem:[#allocation4 + $0x6bc] ss:$20 sps:$4 sm:$0xff]  }
 0x15b   :  { %v1011_v23 = vmin.f32 %v915_v42, 6.0  ;;  %v1013_v27 = vmin.f32 %v917_v9, 6.0  ;;  %3000 = vmatprep.subr.bf16.mxu0 %v6690_v28  ;;  %v7583_v33 = vpack.c.bf16 %v1012_v40, %v1006_v29  ;;  %v604_v26 = vadd.f32 %v603_v53, %v7435_v6  ;;  %v6694_v53 = vld [vmem:[#allocation4 + $0x1c0] ss:$20 sps:$4 sm:$0xff]  }
 0x15c   :  { %v922_v20 = vmax.f32 %v715_v18, 0.0  ;;  %v717_v19 = vadd.f32 %v716_v16, %v7440_v7  ;;  %v605_v25 = vpop.f32.mrf.mxu0  ;;  %v718_v35 = vpop.f32.mrf.mxu1  ;;  %v7593_v24 = vpack.c.bf16 %v1010_v45, %v1004_v13  ;;  %v6691_v18 = vld [vmem:[#allocation4 + $0x6b8] ss:$20 sps:$4 sm:$0xff]   ;;  %v6702_v13 = vld [vmem:[#allocation4 + $0x19c] ss:$20 sps:$4 sm:$0xff]   ;;  %v920_v45 = vmax.f32 %v602_v30, 0.0 }
 0x15d   :  { %v606_v2 = vadd.f32 %v605_v25, %v7431_v5  ;;  %v719_v21 = vadd.f32 %v718_v35, %v7427_v4  ;;  %v7589_v42 = vpack.c.bf16 %v1011_v23, %v1005_v22  ;;  %v7591_v41 = vpack.c.bf16 %v1013_v27, %v1007_v38  ;;  %2888 = vmatpush2.bf16.msra.mxu1 %v6685_v10  ;;  %v6699_v38 = vld [vmem:[#allocation4 + $0x694] ss:$20 sps:$4 sm:$0xff]  }
 0x15e   :  { %v921_v28 = vmax.f32 %v604_v26, 0.0  ;;  %v923_v29 = vmax.f32 %v717_v19, 0.0  ;;  %3001 = vmatpush2.bf16.msra.mxu0 %v6688_v17  ;;  %v607_v40 = vpop.f32.mrf.mxu0  ;;  %v720_v9 = vpop.f32.mrf.mxu1  ;;  %v1018_v22 = vmin.f32 %v922_v20, 6.0  ;;  %v7602_v10 = vrot.slane %v7422_v3, %v8641_v36  ;;  %2889 = vmatprep.subr.bf16.mxu1 %v6693_v39  ;;  %v6697_v20 = vld [vmem:[#allocation4 + $0x690] ss:$20 sps:$4 sm:$0xff]  }
 0x15f   :  { %8665 = vst [vmem:[#allocation21_spill] sm:$0xff] %v7589_v42  ;;  %v926_v16 = vmax.f32 %v606_v2, 0.0  ;;  %v928_v62 = vmax.f32 %v719_v21, 0.0  ;;  %v608_v5 = vadd.f32 %v607_v40, %v7435_v6  ;;  %v721_v4 = vadd.f32 %v720_v9, %v7440_v7  ;;  %2731 = vmatprep.mubr.bf16.mxu1 %v7589_v42  ;;  %2844 = vmatprep.mubr.bf16.mxu0 %v7591_v41  ;;  %v6700_v26 = vld [vmem:[#allocation4 + $0x198] ss:$20 sps:$4 sm:$0xff]  }
 0x160   :  { %v757_v17 = vpop.f32.mrf.mxu0  ;;  %3002 = vmatprep.subr.bf16.mxu0 %v6696_v0  ;;  %v7605_v2 = vrot.slane %v7422_v3, %v201_v60  ;;  %v1019_v6 = vmin.f32 %v923_v29, 6.0  ;;  %2732 = vmatmul.mubr.bf16.gmra.mxu1 %v7593_v24  ;;  %v1017_v19 = vmin.f32 %v921_v28, 6.0  ;;  %v1016_v3 = vmin.f32 %v920_v45, 6.0  ;;  %v6705_v21 = vld [vmem:[#allocation4 + $0x66c] ss:$20 sps:$4 sm:$0xff]  }
 0x161   :  { %v1024_v7 = vmin.f32 %v928_v62, 6.0  ;;  %v927_v23 = vmax.f32 %v608_v5, 0.0  ;;  %v929_v27 = vmax.f32 %v721_v4, 0.0  ;;  %2845 = vmatmul.mubr.bf16.gmra.mxu0 %v7583_v33  ;;  %2890 = vmatpush2.bf16.msra.mxu1 %v6691_v18  ;;  %v1022_v25 = vmin.f32 %v926_v16, 6.0  ;;  %v6708_v29 = vld [vmem:[#allocation4 + $0x174] ss:$20 sps:$4 sm:$0xff]  }
 0x162   :  { %3003 = vmatpush2.bf16.msra.mxu0 %v6694_v53  ;;  %v759_v30 = vpop.f32.mrf.mxu0  ;;  %2891 = vmatprep.subr.bf16.mxu1 %v6699_v38  ;;  %v758_v62 = vadd.f32 %v757_v17, %v7602_v10  ;;  %v6703_v16 = vld [vmem:[#allocation4 + $0x668] ss:$20 sps:$4 sm:$0xff]   ;;  %v6706_v5 = vld [vmem:[#allocation4 + $0x170] ss:$20 sps:$4 sm:$0xff]  }
 0x163   :  { %v1023_v35 = vmin.f32 %v927_v23, 6.0  ;;  %v1025_v0 = vmin.f32 %v929_v27, 6.0  ;;  %3004 = vmatprep.subr.bf16.mxu0 %v6702_v13  ;;  %v760_v60 = vadd.f32 %v759_v30, %v7605_v2  ;;  %v7611_v40 = vpack.c.bf16 %v1024_v7, %v1018_v22  ;;  %v6711_v22 = vld [vmem:[#allocation4 + $0x644] ss:$20 sps:$4 sm:$0xff]   ;;  %v6709_v30 = vld [vmem:[#allocation4 + $0x640] ss:$20 sps:$4 sm:$0xff]  }
 0x164   :  { %v761_v39 = vpop.f32.mrf.mxu0  ;;  %v7618_v4 = vpack.c.bf16 %v1022_v25, %v1016_v3  ;;  %v840_v7 = vmax.f32 %v758_v62, 0.0  ;;  %v6720_v62 = vld [vmem:[#allocation4 + $0x624] ss:$20 sps:$4 sm:$0xff]  }
 0x165   :  { %v762_v9 = vadd.f32 %v761_v39, %v7602_v10  ;;  %v7614_v18 = vpack.c.bf16 %v1023_v35, %v1017_v19  ;;  %v7616_v28 = vpack.c.bf16 %v1025_v0, %v1019_v6  ;;  %2892 = vmatpush2.bf16.msra.mxu1 %v6697_v20  ;;  %v841_v38 = vmax.f32 %v760_v60, 0.0  ;;  %v6714_v6 = vld [vmem:[#allocation4 + $0x14c] ss:$20 sps:$4 sm:$0xff]   ;;  %v6712_v20 = vld [vmem:[#allocation4 + $0x148] ss:$20 sps:$4 sm:$0xff]  }
 0x166   :  { %3005 = vmatpush2.bf16.msra.mxu0 %v6700_v26  ;;  %v763_v53 = vpop.f32.mrf.mxu0  ;;  %2893 = vmatprep.subr.bf16.mxu1 %v6705_v21  ;;  %v6717_v0 = vld [vmem:[#allocation4 + $0x3a4] ss:$20 sps:$4 sm:$0xff]   ;;  %v936_v60 = vmin.f32 %v840_v7, 6.0 }
 0x167   :  { %v846_v13 = vmax.f32 %v762_v9, 0.0  ;;  %v764_v45 = vadd.f32 %v763_v53, %v7605_v2  ;;  %2741 = vmatprep.mubr.bf16.mxu1 %v7614_v18  ;;  %2854 = vmatprep.mubr.bf16.mxu0 %v7616_v28  ;;  %v937_v26 = vmin.f32 %v841_v38, 6.0  ;;  %v6715_v53 = vld [vmem:[#allocation4 + $0x3a0] ss:$20 sps:$4 sm:$0xff]  }
 0x168   :  { %v767_v17 = vpop.f32.mrf.mxu0  ;;  %3006 = vmatprep.subr.bf16.mxu0 %v6708_v29  ;;  %2742 = vmatmul.mubr.bf16.gmra.mxu1 %v7618_v4 }
 0x169   :  { %v847_v23 = vmax.f32 %v764_v45, 0.0  ;;  %2855 = vmatmul.mubr.bf16.gmra.mxu0 %v7611_v40  ;;  %2894 = vmatpush2.bf16.msra.mxu1 %v6703_v16  ;;  %v942_v19 = vmin.f32 %v846_v13, 6.0  ;;  %v768_v39 = vadd.f32 %v767_v17, %v7602_v10  ;;  %v6718_v45 = vld [vmem:[#allocation4 + $0x620] ss:$20 sps:$4 sm:$0xff]  }
 0x16a   :  { %3007 = vmatpush2.bf16.msra.mxu0 %v6706_v5  ;;  %v769_v27 = vpop.f32.mrf.mxu0  ;;  %3010 = vmatprep.mubr.bf16.mxu0 %v7460_v11 }
 0x16b   :  { %v943_v25 = vmin.f32 %v847_v23, 6.0  ;;  %v770_v35 = vadd.f32 %v769_v27, %v7605_v2  ;;  %2895 = vmatprep.subr.bf16.mxu1 %v6711_v22  ;;  %3008 = vmatprep.subr.bf16.mxu0 %v6714_v6  ;;  %v7631_v16 = vpack.c.bf16 %v942_v19, %v936_v60  ;;  %v6723_v22 = vld [vmem:[#allocation4 + $0x37c] ss:$20 sps:$4 sm:$0xff]   ;;  %v852_v7 = vmax.f32 %v768_v39, 0.0 }
 0x16c   :  { %v771_v3 = vpop.f32.mrf.mxu0  ;;  %v6726_v6 = vld [vmem:[#allocation4 + $0x5fc] ss:$20 sps:$4 sm:$0xff]  }
 0x16d   :  { %v772_v21 = vadd.f32 %v771_v3, %v7602_v10  ;;  %v7629_v29 = vpack.c.bf16 %v943_v25, %v937_v26  ;;  %2896 = vmatpush2.bf16.msra.mxu1 %v6709_v30  ;;  %v853_v5 = vmax.f32 %v770_v35, 0.0  ;;  %v6721_v30 = vld [vmem:[#allocation4 + $0x378] ss:$20 sps:$4 sm:$0xff]   ;;  %v6729_v3 = vld [vmem:[#allocation4 + $0x354] ss:$20 sps:$4 sm:$0xff]   ;;  %v948_v60 = vmin.f32 %v852_v7, 6.0 }
 0x16e   :  { %3009 = vmatpush2.bf16.msra.mxu0 %v6712_v20  ;;  %v773_v9 = vpop.f32.mrf.mxu0  ;;  %3091 = vmatprep.subr.bf16.mxu1 %v6717_v0  ;;  %v6724_v35 = vld [vmem:[#allocation4 + $0x5f8] ss:$20 sps:$4 sm:$0xff]  }
 0x16f   :  { %v858_v38 = vmax.f32 %v772_v21, 0.0  ;;  %v774_v13 = vadd.f32 %v773_v9, %v7605_v2  ;;  %2897 = vmatprep.mubr.bf16.mxu1 %v7629_v29  ;;  %3204 = vmatprep.subr.bf16.mxu0 %v6720_v62  ;;  %v949_v20 = vmin.f32 %v853_v5, 6.0  ;;  %v6732_v62 = vld [vmem:[#allocation4 + $0x5d4] ss:$20 sps:$4 sm:$0xff]   ;;  %v6727_v5 = vld [vmem:[#allocation4 + $0x350] ss:$20 sps:$4 sm:$0xff]  }
 0x170   :  { %v777_v17 = vpop.f32.mrf.mxu0  ;;  %2898 = vmatmul.mubr.bf16.vlgmr.msra.gmra.mxu1 %v7631_v16  ;;  %v6735_v7 = vld [vmem:[#allocation4 + $0x32c] ss:$20 sps:$4 sm:$0xff]  }
 0x171   :  { %v859_v23 = vmax.f32 %v774_v13, 0.0  ;;  %3011 = vmatmul.mubr.bf16.vlgmr.msra.gmra.mxu0 %v7454_v54  ;;  %3092 = vmatpush1.bf16.msra.mxu1 %v6715_v53  ;;  %v954_v26 = vmin.f32 %v858_v38, 6.0  ;;  %v778_v39 = vadd.f32 %v777_v17, %v7602_v10  ;;  %v6738_v17 = vld [vmem:[#allocation4 + $0x5ac] ss:$20 sps:$4 sm:$0xff]  }
 0x172   :  { %3020 = vmatprep.mubr.bf16.mxu0 %v7480_v47  ;;  %v779_v27 = vpop.f32.mrf.mxu0  ;;  %3205 = vmatpush1.bf16.msra.mxu0 %v6718_v45 }
 0x173   :  { %v955_v19 = vmin.f32 %v859_v23, 6.0  ;;  %v780_v25 = vadd.f32 %v779_v27, %v7605_v2  ;;  %3093 = vmatprep.subr.bf16.mxu1 %v6723_v22  ;;  %3206 = vmatprep.subr.bf16.mxu0 %v6726_v6  ;;  %v7643_v38 = vpack.c.bf16 %v954_v26, %v948_v60  ;;  %v6730_v6 = vld [vmem:[#allocation4 + $0x5d0] ss:$20 sps:$4 sm:$0xff]   ;;  %v864_v27 = vmax.f32 %v778_v39, 0.0  ;;  %v6733_v26 = vld [vmem:[#allocation4 + $0x328] ss:$20 sps:$4 sm:$0xff]  }
 0x174   :  { %v781_v0 = vpop.f32.mrf.mxu0  ;;  %v6741_v60 = vld [vmem:[#allocation4 + $0x304] ss:$20 sps:$4 sm:$0xff]  }
 0x175   :  { %v782_v21 = vadd.f32 %v781_v0, %v7602_v10  ;;  %v7641_v9 = vpack.c.bf16 %v955_v19, %v949_v20  ;;  %3094 = vmatpush1.bf16.msra.mxu1 %v6721_v30  ;;  %v865_v13 = vmax.f32 %v780_v25, 0.0  ;;  %v6744_v39 = vld [vmem:[#allocation4 + $0x584] ss:$20 sps:$4 sm:$0xff]  }
 0x176   :  { %v783_v53 = vpop.f32.mrf.mxu0  ;;  %3207 = vmatpush1.bf16.msra.mxu0 %v6724_v35  ;;  %3095 = vmatprep.subr.bf16.mxu1 %v6729_v3  ;;  %v6736_v3 = vld [vmem:[#allocation4 + $0x5a8] ss:$20 sps:$4 sm:$0xff]  }
 0x177   :  { %v870_v45 = vmax.f32 %v782_v21, 0.0  ;;  %v784_v22 = vadd.f32 %v783_v53, %v7605_v2  ;;  %2907 = vmatprep.mubr.bf16.mxu1 %v7641_v9  ;;  %3208 = vmatprep.subr.bf16.mxu0 %v6732_v62  ;;  %v961_v19 = vmin.f32 %v865_v13, 6.0  ;;  %v960_v21 = vmin.f32 %v864_v27, 6.0  ;;  %v6747_v27 = vld [vmem:[#allocation4 + $0x2dc] ss:$20 sps:$4 sm:$0xff]  }
 0x178   :  { %v787_v23 = vpop.f32.mrf.mxu0  ;;  %2908 = vmatmul.mubr.bf16.gmra.mxu1 %v7643_v38 }
 0x179   :  { %v871_v20 = vmax.f32 %v784_v22, 0.0  ;;  %3021 = vmatmul.mubr.bf16.gmra.mxu0 %v7484_v51  ;;  %3096 = vmatpush1.bf16.msra.mxu1 %v6727_v5  ;;  %v966_v25 = vmin.f32 %v870_v45, 6.0  ;;  %v788_v53 = vadd.f32 %v787_v23, %v7602_v10  ;;  %v6739_v45 = vld [vmem:[#allocation4 + $0x300] ss:$20 sps:$4 sm:$0xff]   ;;  %v6750_v23 = vld [vmem:[#allocation4 + $0x55c] ss:$20 sps:$4 sm:$0xff]  }
 0x17a   :  { %3030 = vmatprep.mubr.bf16.mxu0 %v7503_v43  ;;  %v789_v30 = vpop.f32.mrf.mxu0  ;;  %3209 = vmatpush1.bf16.msra.mxu0 %v6730_v6 }
 0x17b   :  { %v967_v35 = vmin.f32 %v871_v20, 6.0  ;;  %v790_v0 = vadd.f32 %v789_v30, %v7605_v2  ;;  %3097 = vmatprep.subr.bf16.mxu1 %v6735_v7  ;;  %3210 = vmatprep.subr.bf16.mxu0 %v6738_v17  ;;  %v7655_v20 = vpack.c.bf16 %v966_v25, %v960_v21  ;;  %v6742_v17 = vld [vmem:[#allocation4 + $0x580] ss:$20 sps:$4 sm:$0xff]   ;;  %v6745_v25 = vld [vmem:[#allocation4 + $0x2d8] ss:$20 sps:$4 sm:$0xff]  }
 0x17c   :  { %v791_v62 = vpop.f32.mrf.mxu0 }
 0x17d   :  { %v792_v22 = vadd.f32 %v791_v62, %v7602_v10  ;;  %v7653_v5 = vpack.c.bf16 %v967_v35, %v961_v19  ;;  %3098 = vmatpush1.bf16.msra.mxu1 %v6733_v26  ;;  %v877_v6 = vmax.f32 %v790_v0, 0.0  ;;  %v876_v19 = vmax.f32 %v788_v53, 0.0  ;;  %v6753_v53 = vld [vmem:[#allocation4 + $0x2b4] ss:$20 sps:$4 sm:$0xff]  }
 0x17e   :  { %v793_v13 = vpop.f32.mrf.mxu0  ;;  %3211 = vmatpush1.bf16.msra.mxu0 %v6736_v3  ;;  %3099 = vmatprep.subr.bf16.mxu1 %v6741_v60  ;;  %v6748_v60 = vld [vmem:[#allocation4 + $0x558] ss:$20 sps:$4 sm:$0xff]  }
 0x17f   :  { %v882_v30 = vmax.f32 %v792_v22, 0.0  ;;  %v794_v7 = vadd.f32 %v793_v13, %v7605_v2  ;;  %2917 = vmatprep.mubr.bf16.mxu1 %v7653_v5  ;;  %3212 = vmatprep.subr.bf16.mxu0 %v6744_v39  ;;  %v973_v0 = vmin.f32 %v877_v6, 6.0  ;;  %v6756_v22 = vld [vmem:[#allocation4 + $0x534] ss:$20 sps:$4 sm:$0xff]   ;;  %v972_v13 = vmin.f32 %v876_v19, 6.0 }
 0x180   :  { %v797_v36 = vpop.f32.mrf.mxu0  ;;  %2918 = vmatmul.mubr.bf16.gmra.mxu1 %v7655_v20  ;;  %v6759_v19 = vld [vmem:[#allocation4 + $0x28c] ss:$20 sps:$4 sm:$0xff]  }
 0x181   :  { %v883_v35 = vmax.f32 %v794_v7, 0.0  ;;  %3031 = vmatmul.mubr.bf16.gmra.mxu0 %v7507_v49  ;;  %3100 = vmatpush1.bf16.msra.mxu1 %v6739_v45  ;;  %v978_v3 = vmin.f32 %v882_v30, 6.0  ;;  %v798_v7 = vadd.f32 %v797_v36, %v7602_v10  ;;  %v6751_v30 = vld [vmem:[#allocation4 + $0x2b0] ss:$20 sps:$4 sm:$0xff]   ;;  %v6762_v36 = vld [vmem:[#allocation4 + $0x50c] ss:$20 sps:$4 sm:$0xff]  }
 0x182   :  { %3040 = vmatprep.mubr.bf16.mxu0 %v7524_v50  ;;  %v799_v26 = vpop.f32.mrf.mxu0  ;;  %3213 = vmatpush1.bf16.msra.mxu0 %v6742_v17 }
 0x183   :  { %v979_v62 = vmin.f32 %v883_v35, 6.0  ;;  %v800_v21 = vadd.f32 %v799_v26, %v7605_v2  ;;  %3101 = vmatprep.subr.bf16.mxu1 %v6747_v27  ;;  %3214 = vmatprep.subr.bf16.mxu0 %v6750_v23  ;;  %v7667_v35 = vpack.c.bf16 %v978_v3, %v972_v13  ;;  %v6754_v23 = vld [vmem:[#allocation4 + $0x530] ss:$20 sps:$4 sm:$0xff]  }
 0x184   :  { %v801_v39 = vpop.f32.mrf.mxu0  ;;  %v6765_v13 = vld [vmem:[#allocation4 + $0x4e4] ss:$20 sps:$4 sm:$0xff]  }
 0x185   :  { %v802_v61 = vadd.f32 %v801_v39, %v7602_v10  ;;  %v7665_v45 = vpack.c.bf16 %v979_v62, %v973_v0  ;;  %3102 = vmatpush1.bf16.msra.mxu1 %v6745_v25  ;;  %v889_v17 = vmax.f32 %v800_v21, 0.0  ;;  %v888_v0 = vmax.f32 %v798_v7, 0.0  ;;  %v6757_v25 = vld [vmem:[#allocation4 + $0x288] ss:$20 sps:$4 sm:$0xff]   ;;  %v6768_v7 = vld [vmem:[#allocation4 + $0x764] ss:$20 sps:$4 sm:$0xff]  }
 0x186   :  { %v803_v6 = vpop.f32.mrf.mxu0  ;;  %3215 = vmatpush1.bf16.msra.mxu0 %v6748_v60  ;;  %3103 = vmatprep.subr.bf16.mxu1 %v6753_v53  ;;  %v6760_v53 = vld [vmem:[#allocation4 + $0x508] ss:$20 sps:$4 sm:$0xff]  }
 0x187   :  { %v894_v26 = vmax.f32 %v802_v61, 0.0  ;;  %v804_v27 = vadd.f32 %v803_v6, %v7605_v2  ;;  %2927 = vmatprep.mubr.bf16.mxu1 %v7665_v45  ;;  %3216 = vmatprep.subr.bf16.mxu0 %v6756_v22  ;;  %v985_v3 = vmin.f32 %v889_v17, 6.0  ;;  %v984_v6 = vmin.f32 %v888_v0, 6.0  ;;  %v6771_v0 = vld [vmem:[#allocation4 + $0x4bc] ss:$20 sps:$4 sm:$0xff]  }
 0x188   :  { %v807_v50 = vpop.f32.mrf.mxu0  ;;  %2928 = vmatmul.mubr.bf16.gmra.mxu1 %v7667_v35 }
 0x189   :  { %v895_v62 = vmax.f32 %v804_v27, 0.0  ;;  %3041 = vmatmul.mubr.bf16.gmra.mxu0 %v7528_v46  ;;  %3104 = vmatpush1.bf16.msra.mxu1 %v6751_v30  ;;  %v990_v21 = vmin.f32 %v894_v26, 6.0  ;;  %v808_v27 = vadd.f32 %v807_v50, %v7602_v10  ;;  %v6763_v26 = vld [vmem:[#allocation4 + $0x4e0] ss:$20 sps:$4 sm:$0xff]   ;;  %v6774_v50 = vld [vmem:[#allocation4 + $0x73c] ss:$20 sps:$4 sm:$0xff]  }
 0x18a   :  { %3050 = vmatprep.mubr.bf16.mxu0 %v7546_v56  ;;  %v809_v61 = vpop.f32.mrf.mxu0  ;;  %3217 = vmatpush1.bf16.msra.mxu0 %v6754_v23 }
 0x18b   :  { %v991_v60 = vmin.f32 %v895_v62, 6.0  ;;  %v810_v39 = vadd.f32 %v809_v61, %v7605_v2  ;;  %3105 = vmatprep.subr.bf16.mxu1 %v6759_v19  ;;  %3218 = vmatprep.subr.bf16.mxu0 %v6762_v36  ;;  %v7679_v62 = vpack.c.bf16 %v990_v21, %v984_v6  ;;  %v6766_v36 = vld [vmem:[#allocation4 + $0x760] ss:$20 sps:$4 sm:$0xff]  }
 0x18c   :  { %v811_v22 = vpop.f32.mrf.mxu0  ;;  %v6777_v6 = vld [vmem:[#allocation4 + $0x494] ss:$20 sps:$4 sm:$0xff]  }
 0x18d   :  { %v812_v56 = vadd.f32 %v811_v22, %v7602_v10  ;;  %v7677_v30 = vpack.c.bf16 %v991_v60, %v985_v3  ;;  %3106 = vmatpush1.bf16.msra.mxu1 %v6757_v25  ;;  %v901_v23 = vmax.f32 %v810_v39, 0.0  ;;  %v900_v3 = vmax.f32 %v808_v27, 0.0  ;;  %v6769_v25 = vld [vmem:[#allocation4 + $0x4b8] ss:$20 sps:$4 sm:$0xff]   ;;  %v6780_v27 = vld [vmem:[#allocation4 + $0x714] ss:$20 sps:$4 sm:$0xff]  }
 0x18e   :  { %v813_v17 = vpop.f32.mrf.mxu0  ;;  %3219 = vmatpush1.bf16.msra.mxu0 %v6760_v53  ;;  %3107 = vmatprep.subr.bf16.mxu1 %v6765_v13  ;;  %v6772_v13 = vld [vmem:[#allocation4 + $0x738] ss:$20 sps:$4 sm:$0xff]  }
 0x18f   :  { %v906_v61 = vmax.f32 %v812_v56, 0.0  ;;  %v814_v19 = vadd.f32 %v813_v17, %v7605_v2  ;;  %2937 = vmatprep.mubr.bf16.mxu1 %v7677_v30  ;;  %3220 = vmatprep.subr.bf16.mxu0 %v6768_v7  ;;  %v997_v21 = vmin.f32 %v901_v23, 6.0  ;;  %v996_v17 = vmin.f32 %v900_v3, 6.0  ;;  %v6783_v3 = vld [vmem:[#allocation4 + $0x46c] ss:$20 sps:$4 sm:$0xff]  }
 0x190   :  { %v817_v46 = vpop.f32.mrf.mxu0  ;;  %2938 = vmatmul.mubr.bf16.gmra.mxu1 %v7679_v62 }
 0x191   :  { %v907_v60 = vmax.f32 %v814_v19, 0.0  ;;  %3051 = vmatmul.mubr.bf16.gmra.mxu0 %v7550_v59  ;;  %3108 = vmatpush2.bf16.msra.mxu1 %v6763_v26  ;;  %v1002_v39 = vmin.f32 %v906_v61, 6.0  ;;  %v818_v19 = vadd.f32 %v817_v46, %v7602_v10  ;;  %v6775_v61 = vld [vmem:[#allocation4 + $0x490] ss:$20 sps:$4 sm:$0xff]   ;;  %v6786_v46 = vld [vmem:[#allocation4 + $0x6ec] ss:$20 sps:$4 sm:$0xff]  }
 0x192   :  { %3060 = vmatprep.mubr.bf16.mxu0 %v7567_v8  ;;  %v819_v56 = vpop.f32.mrf.mxu0  ;;  %3221 = vmatpush2.bf16.msra.mxu0 %v6766_v36 }
 0x193   :  { %v1003_v53 = vmin.f32 %v907_v60, 6.0  ;;  %v820_v22 = vadd.f32 %v819_v56, %v7605_v2  ;;  %3109 = vmatprep.subr.bf16.mxu1 %v6771_v0  ;;  %3222 = vmatprep.subr.bf16.mxu0 %v6774_v50  ;;  %v7691_v60 = vpack.c.bf16 %v1002_v39, %v996_v17  ;;  %v6778_v50 = vld [vmem:[#allocation4 + $0x710] ss:$20 sps:$4 sm:$0xff]  }
 0x194   :  { %v821_v7 = vpop.f32.mrf.mxu0  ;;  %v6789_v17 = vld [vmem:[#allocation4 + $0x444] ss:$20 sps:$4 sm:$0xff]  }
 0x195   :  { %v822_v8 = vadd.f32 %v821_v7, %v7602_v10  ;;  %v7689_v26 = vpack.c.bf16 %v1003_v53, %v997_v21  ;;  %3110 = vmatpush2.bf16.msra.mxu1 %v6769_v25  ;;  %v913_v36 = vmax.f32 %v820_v22, 0.0  ;;  %v912_v21 = vmax.f32 %v818_v19, 0.0  ;;  %v6781_v25 = vld [vmem:[#allocation4 + $0x468] ss:$20 sps:$4 sm:$0xff]   ;;  %v6792_v19 = vld [vmem:[#allocation4 + $0x6c4] ss:$20 sps:$4 sm:$0xff]  }
 0x196   :  { %v823_v23 = vpop.f32.mrf.mxu0  ;;  %3223 = vmatpush2.bf16.msra.mxu0 %v6772_v13  ;;  %3111 = vmatprep.subr.bf16.mxu1 %v6777_v6  ;;  %v6784_v6 = vld [vmem:[#allocation4 + $0x6e8] ss:$20 sps:$4 sm:$0xff]  }
 0x197   :  { %v918_v56 = vmax.f32 %v822_v8, 0.0  ;;  %v824_v0 = vadd.f32 %v823_v23, %v7605_v2  ;;  %2947 = vmatprep.mubr.bf16.mxu1 %v7689_v26  ;;  %3224 = vmatprep.subr.bf16.mxu0 %v6780_v27  ;;  %v1009_v39 = vmin.f32 %v913_v36, 6.0  ;;  %v1008_v23 = vmin.f32 %v912_v21, 6.0  ;;  %v6795_v21 = vld [vmem:[#allocation4 + $0x41c] ss:$20 sps:$4 sm:$0xff]  }
 0x198   :  { %v827_v59 = vpop.f32.mrf.mxu0  ;;  %2948 = vmatmul.mubr.bf16.gmra.mxu1 %v7691_v60 }
 0x199   :  { %v919_v53 = vmax.f32 %v824_v0, 0.0  ;;  %3061 = vmatmul.mubr.bf16.gmra.mxu0 %v7571_v14  ;;  %3112 = vmatpush2.bf16.msra.mxu1 %v6775_v61  ;;  %v1014_v22 = vmin.f32 %v918_v56, 6.0  ;;  %v828_v0 = vadd.f32 %v827_v59, %v7602_v10  ;;  %v6787_v56 = vld [vmem:[#allocation4 + $0x440] ss:$20 sps:$4 sm:$0xff]   ;;  %v6798_v59 = vld [vmem:[#allocation4 + $0x69c] ss:$20 sps:$4 sm:$0xff]  }
 0x19a   :  { %3070 = vmatprep.mubr.bf16.mxu0 %v7589_v42  ;;  %v829_v8 = vpop.f32.mrf.mxu0  ;;  %3225 = vmatpush2.bf16.msra.mxu0 %v6778_v50 }
 0x19b   :  { %v1015_v13 = vmin.f32 %v919_v53, 6.0  ;;  %v830_v7 = vadd.f32 %v829_v8, %v7605_v2  ;;  %3113 = vmatprep.subr.bf16.mxu1 %v6783_v3  ;;  %3226 = vmatprep.subr.bf16.mxu0 %v6786_v46  ;;  %v7703_v53 = vpack.c.bf16 %v1014_v22, %v1008_v23  ;;  %v6790_v46 = vld [vmem:[#allocation4 + $0x6c0] ss:$20 sps:$4 sm:$0xff]  }
 0x19c   :  { %v831_v27 = vpop.f32.mrf.mxu0 }
 0x19d   :  { %v832_v42 = vadd.f32 %v831_v27, %v7602_v10  ;;  %v7701_v61 = vpack.c.bf16 %v1015_v13, %v1009_v39  ;;  %3114 = vmatpush2.bf16.msra.mxu1 %v6781_v25  ;;  %8666 = vst [vmem:[#allocation22_spill] sm:$0xff] %v7703_v53  ;;  %v925_v50 = vmax.f32 %v830_v7, 0.0  ;;  %v924_v10 = vmax.f32 %v828_v0, 0.0  ;;  %v6796_v13 = vld [vmem:[#allocation4 + $0x698] ss:$20 sps:$4 sm:$0xff]  }
 0x19e   :  { %v833_v36 = vpop.f32.mrf.mxu0  ;;  %3227 = vmatpush2.bf16.msra.mxu0 %v6784_v6  ;;  %3115 = vmatprep.subr.bf16.mxu1 %v6789_v17  ;;  %v6801_v7 = vld [vmem:[#allocation4 + $0x3f4] ss:$20 sps:$4 sm:$0xff]   ;;  %v6802_v0 = vld [vmem:[#allocation4 + $0x670] ss:$20 sps:$4 sm:$0xff]  }
 0x19f   :  { %v930_v8 = vmax.f32 %v832_v42, 0.0  ;;  %v834_v3 = vadd.f32 %v833_v36, %v7605_v2  ;;  %2957 = vmatprep.mubr.bf16.mxu1 %v7701_v61  ;;  %3228 = vmatprep.subr.bf16.mxu0 %v6792_v19  ;;  %v6793_v42 = vld [vmem:[#allocation4 + $0x418] ss:$20 sps:$4 sm:$0xff]   ;;  %v1021_v25 = vmin.f32 %v925_v50, 6.0  ;;  %v6804_v6 = vld [vmem:[#allocation4 + $0x674] ss:$20 sps:$4 sm:$0xff]  }
 0x1a0   :  { %2958 = vmatmul.mubr.bf16.gmra.mxu1 %v7703_v53  ;;  %v1020_v27 = vmin.f32 %v924_v10, 6.0  ;;  %v6799_v19 = vld [vmem:[#allocation4 + $0x3f0] ss:$20 sps:$4 sm:$0xff]   ;;  %v6807_v36 = vld [vmem:[#allocation4 + $0x3cc] ss:$20 sps:$4 sm:$0xff]  }
 0x1a1   :  { %v931_v39 = vmax.f32 %v834_v3, 0.0  ;;  %3071 = vmatmul.mubr.bf16.gmra.mxu0 %v7593_v24  ;;  %3116 = vmatpush2.bf16.msra.mxu1 %v6787_v56  ;;  %v1026_v22 = vmin.f32 %v930_v8, 6.0  ;;  %v6810_v56 = vld [vmem:[#allocation4 + $0x64c] ss:$20 sps:$4 sm:$0xff]   ;;  %v6805_v50 = vld [vmem:[#allocation4 + $0x3c8] ss:$20 sps:$4 sm:$0xff]  }
 0x1a2   :  { %3080 = vmatprep.mubr.bf16.mxu0 %v7614_v18  ;;  %3229 = vmatpush2.bf16.msra.mxu0 %v6790_v46  ;;  %v6808_v8 = vld [vmem:[#allocation4 + $0x648] ss:$20 sps:$4 sm:$0xff]  }
 0x1a3   :  { %v1027_v2 = vmin.f32 %v931_v39, 6.0  ;;  %3117 = vmatprep.subr.bf16.mxu1 %v6795_v21  ;;  %3230 = vmatprep.subr.bf16.mxu0 %v6798_v59  ;;  %v7712_v23 = vpack.c.bf16 %v1026_v22, %v1020_v27  ;;  %v6811_v3 = vld [vmem:[#allocation4 + $0x268] ss:$20 sps:$4 sm:$0xff]   ;;  %v6813_v59 = vld [vmem:[#allocation4 + $0x240] ss:$20 sps:$4 sm:$0xff]  }
 0x1a4   :  { %v6820_v46 = vld [vmem:[#allocation4 + $0x4e8] ss:$20 sps:$4 sm:$0xff]   ;;  %v6823_v39 = vld [vmem:[#allocation4 + $0x4c0] ss:$20 sps:$4 sm:$0xff]   ;;  %v6829_v27 = vld [vmem:[#allocation4 + $0x470] ss:$20 sps:$4 sm:$0xff]  }
 0x1a5   :  { %v7710_v17 = vpack.c.bf16 %v1027_v2, %v1021_v25  ;;  %3118 = vmatpush2.bf16.msra.mxu1 %v6793_v42  ;;  %8668 = vst [vmem:[#allocation24_spill] sm:$0xff] %v7712_v23  ;;  %v6812_v21 = vld [vmem:[#allocation4 + $0x128] ss:$20 sps:$4 sm:$0xff]   ;;  %v6814_v42 = vld [vmem:[#allocation4 + $0x100] ss:$20 sps:$4 sm:$0xff]  }
 0x1a6   :  { %3231 = vmatpush2.bf16.msra.mxu0 %v6796_v13  ;;  %3119 = vmatprep.subr.bf16.mxu1 %v6801_v7  ;;  %v6822_v10 = vld [vmem:[#allocation4 + $0x3a8] ss:$20 sps:$4 sm:$0xff]   ;;  %v6815_v25 = vld [vmem:[#allocation4 + $0x218] ss:$20 sps:$4 sm:$0xff]   ;;  %v6824_v22 = vld [vmem:[#allocation4 + $0x380] ss:$20 sps:$4 sm:$0xff]  }
 0x1a7   :  { %8667 = vst [vmem:[#allocation23_spill] sm:$0xff] %v7710_v17  ;;  %2967 = vmatprep.mubr.bf16.mxu1 %v7710_v17  ;;  %3232 = vmatprep.subr.bf16.mxu0 %v6804_v6  ;;  %v6826_v2 = vld [vmem:[#allocation4 + $0x498] ss:$20 sps:$4 sm:$0xff]   ;;  %v6817_v7 = vld [vmem:[#allocation4 + $0x1f0] ss:$20 sps:$4 sm:$0xff]  }
 0x1a8   :  { %2968 = vmatmul.mubr.bf16.gmra.mxu1 %v7712_v23  ;;  %v6816_v13 = vld [vmem:[#allocation4 + $0xd8] ss:$20 sps:$4 sm:$0xff]  }
 0x1a9   :  { %3081 = vmatmul.mubr.bf16.gmra.mxu0 %v7618_v4  ;;  %3120 = vmatpush2.bf16.msra.mxu1 %v6799_v19  ;;  %v6828_v6 = vld [vmem:[#allocation4 + $0x358] ss:$20 sps:$4 sm:$0xff]   ;;  %v6818_v19 = vld [vmem:[#allocation4 + $0xb0] ss:$20 sps:$4 sm:$0xff]  }
 0x1aa   :  { %3123 = vmatprep.mubr.bf16.mxu1 %v7462_v12  ;;  %3233 = vmatpush2.bf16.msra.mxu0 %v6802_v0  ;;  %v6819_v0 = vld [vmem:[#allocation4 + $0x1c8] ss:$20 sps:$4 sm:$0xff]  }
 0x1ab   :  { %3236 = vmatprep.mubr.bf16.mxu0 %v7629_v29  ;;  %3121 = vmatprep.subr.bf16.mxu1 %v6807_v36  ;;  %v6830_v36 = vld [vmem:[#allocation4 + $0x330] ss:$20 sps:$4 sm:$0xff]  }
 0x1ac   :  { %3234 = vmatprep.subr.bf16.mxu0 %v6810_v56  ;;  %v6832_v56 = vld [vmem:[#allocation4 + $0x448] ss:$20 sps:$4 sm:$0xff]  }
 0x1ad   :  { %3122 = vmatpush2.bf16.msra.mxu1 %v6805_v50  ;;  %v6821_v50 = vld [vmem:[#allocation4 + $0x88] ss:$20 sps:$4 sm:$0xff]  }
 0x1ae   :  { %3235 = vmatpush2.bf16.msra.mxu0 %v6808_v8  ;;  %6125 = vmatprep.subr.bf16.mxu1 %v6811_v3  ;;  %v6825_v8 = vld [vmem:[#allocation4 + $0x1a0] ss:$20 sps:$4 sm:$0xff]   ;;  %v6834_v3 = vld [vmem:[#allocation4 + $0x308] ss:$20 sps:$4 sm:$0xff]  }
 0x1af   :  { %6189 = vmatprep.subr.bf16.mxu0 %v6820_v46  ;;  %v6835_v46 = vld [vmem:[#allocation4 + $0x420] ss:$20 sps:$4 sm:$0xff]  }
 0x1b0   :  { %3124 = vmatmul.mubr.bf16.vlgmr.msra.gmra.mxu1 %v7456_v55 }
 0x1b1   :  { %3237 = vmatmul.mubr.bf16.vlgmr.msra.gmra.mxu0 %v7631_v16  ;;  %3133 = vmatprep.mubr.bf16.mxu1 %v7482_v48 }
 0x1b2   :  { %3246 = vmatprep.mubr.bf16.mxu0 %v7641_v9  ;;  %6126 = vmatpush3.bf16.msra.mxu1 %v6812_v21  ;;  %v6827_v21 = vld [vmem:[#allocation4 + $0x60] ss:$20 sps:$4 sm:$0xff]  }
 0x1b3   :  { %6127 = vmatprep.subr.bf16.mxu1 %v6813_v59  ;;  %6190 = vmatpush3.bf16.msra.mxu0 %v6822_v10  ;;  %v6831_v59 = vld [vmem:[#allocation4 + $0x178] ss:$20 sps:$4 sm:$0xff]   ;;  %v6836_v10 = vld [vmem:[#allocation4 + $0x2e0] ss:$20 sps:$4 sm:$0xff]  }
 0x1b4   :  { %6191 = vmatprep.subr.bf16.mxu0 %v6823_v39  ;;  %v6838_v39 = vld [vmem:[#allocation4 + $0x3f8] ss:$20 sps:$4 sm:$0xff]  }
 0x1b6   :  { %6128 = vmatpush3.bf16.msra.mxu1 %v6814_v42  ;;  %v6833_v42 = vld [vmem:[#allocation4 + $0x38] ss:$20 sps:$4 sm:$0xff]  }
 0x1b7   :  { %6129 = vmatprep.subr.bf16.mxu1 %v6815_v25  ;;  %6192 = vmatpush3.bf16.msra.mxu0 %v6824_v22  ;;  %v6837_v25 = vld [vmem:[#allocation4 + $0x150] ss:$20 sps:$4 sm:$0xff]   ;;  %v6840_v22 = vld [vmem:[#allocation4 + $0x2b8] ss:$20 sps:$4 sm:$0xff]  }
 0x1b8   :  { %3134 = vmatmul.mubr.bf16.gmra.mxu1 %v7474_v37  ;;  %6193 = vmatprep.subr.bf16.mxu0 %v6826_v2  ;;  %v6841_v2 = vld [vmem:[#allocation4 + $0x3d0] ss:$20 sps:$4 sm:$0xff]  }
 0x1b9   :  { %3247 = vmatmul.mubr.bf16.gmra.mxu0 %v7643_v38  ;;  %3143 = vmatprep.mubr.bf16.mxu1 %v7505_v44 }
 0x1ba   :  { %3256 = vmatprep.mubr.bf16.mxu0 %v7653_v5  ;;  %6130 = vmatpush3.bf16.msra.mxu1 %v6816_v13  ;;  %v6839_v13 = vld [vmem:[#allocation4 + $0x10] ss:$20 sps:$4 sm:$0xff]  }
 0x1bb   :  { %6131 = vmatprep.subr.bf16.mxu1 %v6817_v7  ;;  %6194 = vmatpush3.bf16.msra.mxu0 %v6828_v6  ;;  %v6842_v7 = vld [vmem:[#allocation4 + $0x290] ss:$20 sps:$4 sm:$0xff]   ;;  %v6843_v6 = vld [vmem:[#allocation4 + $0x768] ss:$20 sps:$4 sm:$0xff]  }
 0x1bc   :  { %6195 = vmatprep.subr.bf16.mxu0 %v6829_v27  ;;  %v6850_v27 = vld [vmem:[#allocation6 + $0x74] ss:$8 sps:$4 sm:$0xff]  }
 0x1be   :  { %6132 = vmatpush3.bf16.msra.mxu1 %v6818_v19  ;;  %v1316_v19 = vld [vmem:[%s8627_s4] sm:$0x1f] }
 0x1bf   :  { %6133 = vmatprep.subr.bf16.mxu1 %v6819_v0  ;;  %6196 = vmatpush3.bf16.msra.mxu0 %v6830_v36  ;;  %v7755_v0 = vrot.slane %v1316_v19, %v7413_v63  ;;  %v6844_v36 = vld [vmem:[#allocation4 + $0x628] ss:$20 sps:$4 sm:$0xff]  }
 0x1c0   :  { %3144 = vmatmul.mubr.bf16.gmra.mxu1 %v7497_v32  ;;  %6197 = vmatprep.subr.bf16.mxu0 %v6832_v56  ;;  %v7758_v56 = vrot.slane %v1316_v19, %v7416_v1  ;;  %v6855_v19 = vld [vmem:[#allocation4 + $0x6f0] ss:$20 sps:$4 sm:$0xff]  }
 0x1c1   :  { %3257 = vmatmul.mubr.bf16.gmra.mxu0 %v7655_v20  ;;  %3153 = vmatprep.mubr.bf16.mxu1 %v7526_v52 }
 0x1c2   :  { %3266 = vmatprep.mubr.bf16.mxu0 %v7665_v45  ;;  %6134 = vmatpush3.bf16.msra.mxu1 %v6821_v50  ;;  %v6845_v50 = vld [vmem:[#allocation4 + $0x740] ss:$20 sps:$4 sm:$0xff]  }
 0x1c3   :  { %6135 = vmatprep.subr.bf16.mxu1 %v6825_v8  ;;  %6198 = vmatpush3.bf16.msra.mxu0 %v6834_v3  ;;  %v6848_v8 = vld [vmem:[#allocation6 + $0x70] ss:$8 sps:$4 sm:$0xff]  }
 0x1c4   :  { %6199 = vmatprep.subr.bf16.mxu0 %v6835_v46 }
 0x1c6   :  { %6136 = vmatpush3.bf16.msra.mxu1 %v6827_v21 }
 0x1c7   :  { %6137 = vmatprep.subr.bf16.mxu1 %v6831_v59  ;;  %6200 = vmatpush3.bf16.msra.mxu0 %v6836_v10  ;;  %v6846_v10 = vld [vmem:[#allocation4 + $0x600] ss:$20 sps:$4 sm:$0xff]  }
 0x1c8   :  { %3154 = vmatmul.mubr.bf16.gmra.mxu1 %v7518_v31  ;;  %6201 = vmatprep.subr.bf16.mxu0 %v6838_v39 }
 0x1c9   :  { %3267 = vmatmul.mubr.bf16.gmra.mxu0 %v7667_v35  ;;  %3163 = vmatprep.mubr.bf16.mxu1 %v7548_v58 }
 0x1ca   :  { %3276 = vmatprep.mubr.bf16.mxu0 %v7677_v30  ;;  %6138 = vmatpush3.bf16.msra.mxu1 %v6833_v42 }
 0x1cb   :  { %6139 = vmatprep.subr.bf16.mxu1 %v6837_v25  ;;  %6202 = vmatpush3.bf16.msra.mxu0 %v6840_v22  ;;  %v6847_v25 = vld [vmem:[#allocation4 + $0x718] ss:$20 sps:$4 sm:$0xff]  }
 0x1cc   :  { %6203 = vmatprep.subr.bf16.mxu0 %v6841_v2 }
 0x1ce   :  { %6140 = vmatpush3.bf16.msra.mxu1 %v6839_v13 }
 0x1cf   :  { %6204 = vmatpush3.bf16.msra.mxu0 %v6842_v7  ;;  %6253 = vmatprep.subr.bf16.mxu1 %v6843_v6  ;;  %v6851_v6 = vld [vmem:[#allocation4 + $0x5d8] ss:$20 sps:$4 sm:$0xff]  }
 0x1d0   :  { %3164 = vmatmul.mubr.bf16.gmra.mxu1 %v7540_v34  ;;  %4300 = vmatprep.subr.bf16.mxu0 %v6850_v27 }
 0x1d1   :  { %3277 = vmatmul.mubr.bf16.gmra.mxu0 %v7679_v62  ;;  %3173 = vmatprep.mubr.bf16.mxu1 %v7569_v15 }
 0x1d2   :  { %3286 = vmatprep.mubr.bf16.mxu0 %v7689_v26 }
 0x1d8   :  { %3174 = vmatmul.mubr.bf16.gmra.mxu1 %v7561_v57 }
 0x1d9   :  { %3287 = vmatmul.mubr.bf16.gmra.mxu0 %v7691_v60  ;;  %3183 = vmatprep.mubr.bf16.mxu1 %v7591_v41 }
 0x1da   :  { %3296 = vmatprep.mubr.bf16.mxu0 %v7701_v61 }
 0x1e0   :  { %3184 = vmatmul.mubr.bf16.gmra.mxu1 %v7583_v33 }
 0x1e1   :  { %3297 = vmatmul.mubr.bf16.gmra.mxu0 %v7703_v53  ;;  %3193 = vmatprep.mubr.bf16.mxu1 %v7616_v28 }
 0x1e2   :  { %3306 = vmatprep.mubr.bf16.mxu0 %v7710_v17 }
 0x1e8   :  { %3194 = vmatmul.mubr.bf16.gmra.mxu1 %v7611_v40 }
 0x1e9   :  { %3307 = vmatmul.mubr.bf16.gmra.mxu0 %v7712_v23  ;;  %3349 = vmatprep.mubr.bf16.mxu1 %v7460_v11  ;;  %v6854_v11 = vld [vmem:[#allocation6 + $0x64] ss:$8 sps:$4 sm:$0xff]  }
 0x1ea   :  { %3446 = vmatprep.mubr.bf16.mxu0 %v7462_v12 }
 0x1f0   :  { %v2673_v3 = vpop.f32.mrf.mxu1  ;;  %v2786_v46 = vpop.f32.mrf.mxu0  ;;  %3350 = vmatmul.mubr.bf16.vlgmr.msra.gmra.mxu1 %v7454_v54  ;;  %v6852_v54 = vld [vmem:[#allocation6 + $0x60] ss:$8 sps:$4 sm:$0xff]  }
 0x1f1   :  { %v2674_v12 = vadd.f32 %v2673_v3, %v7755_v0  ;;  %3447 = vmatmul.mubr.bf16.vlgmr.msra.gmra.mxu0 %v7456_v55  ;;  %3357 = vmatprep.mubr.bf16.mxu1 %v7480_v47  ;;  %v6858_v55 = vld [vmem:[#allocation6 + $0x54] ss:$8 sps:$4 sm:$0xff]   ;;  %v6862_v3 = vld [vmem:[#allocation6 + $0x44] ss:$8 sps:$4 sm:$0xff]  }
 0x1f2   :  { %3454 = vmatprep.mubr.bf16.mxu0 %v7482_v48  ;;  %6254 = vmatpush3.bf16.msra.mxu1 %v6844_v36  ;;  %v2675_v21 = vpop.f32.mrf.mxu1  ;;  %v2788_v59 = vpop.f32.mrf.mxu0  ;;  %v6856_v36 = vld [vmem:[#allocation6 + $0x50] ss:$8 sps:$4 sm:$0xff]  }
 0x1f3   :  { %v7765_v39 = vadd.f32 %v2786_v46, %v2674_v12  ;;  %v2676_v42 = vadd.f32 %v2675_v21, %v7758_v56  ;;  %6255 = vmatprep.subr.bf16.mxu1 %v6845_v50  ;;  %4301 = vmatpush1.bf16.msra.mxu0 %v6848_v8  ;;  %v6859_v21 = vld [vmem:[#allocation4 + $0x5b0] ss:$20 sps:$4 sm:$0xff]  }
 0x1f4   :  { %v2677_v22 = vpop.f32.mrf.mxu1  ;;  %v2790_v2 = vpop.f32.mrf.mxu0  ;;  %4302 = vmatprep.subr.bf16.mxu0 %v6854_v11 }
 0x1f5   :  { %v7768_v13 = vadd.f32 %v2788_v59, %v2676_v42  ;;  %v2678_v47 = vadd.f32 %v2677_v22, %v7755_v0  ;;  %v6863_v42 = vld [vmem:[#allocation4 + $0x6c8] ss:$20 sps:$4 sm:$0xff]  }
 0x1f6   :  { %v7771_v48 = vpop.f32.mrf.mxu1  ;;  %v7773_v7 = vpop.f32.mrf.mxu0  ;;  %6256 = vmatpush3.bf16.msra.mxu1 %v6846_v10 }
 0x1f7   :  { %v7775_v27 = vadd.f32 %v2790_v2, %v2678_v47  ;;  %6257 = vmatprep.subr.bf16.mxu1 %v6847_v25  ;;  %4303 = vmatpush1.bf16.msra.mxu0 %v6852_v54 }
 0x1f8   :  { %v2683_v50 = vpop.f32.mrf.mxu1  ;;  %3358 = vmatmul.mubr.bf16.gmra.mxu1 %v7484_v51  ;;  %4304 = vmatprep.subr.bf16.mxu0 %v6858_v55  ;;  %v6860_v51 = vld [vmem:[#allocation6 + $0x40] ss:$8 sps:$4 sm:$0xff]  }
 0x1f9   :  { %v2796_v8 = vpop.f32.mrf.mxu0  ;;  %v2684_v46 = vadd.f32 %v2683_v50, %v7755_v0  ;;  %3455 = vmatmul.mubr.bf16.gmra.mxu0 %v7474_v37  ;;  %3365 = vmatprep.mubr.bf16.mxu1 %v7503_v43  ;;  %v6866_v37 = vld [vmem:[#allocation6 + $0x34] ss:$8 sps:$4 sm:$0xff]  }
 0x1fa   :  { %3462 = vmatprep.mubr.bf16.mxu0 %v7505_v44  ;;  %v2685_v11 = vpop.f32.mrf.mxu1  ;;  %6258 = vmatpush3.bf16.msra.mxu1 %v6851_v6  ;;  %v6867_v55 = vld [vmem:[#allocation4 + $0x588] ss:$20 sps:$4 sm:$0xff]   ;;  %v6864_v6 = vld [vmem:[#allocation6 + $0x30] ss:$8 sps:$4 sm:$0xff]  }
 0x1fb   :  { %v2798_v12 = vpop.f32.mrf.mxu0  ;;  %v7782_v59 = vadd.f32 %v2796_v8, %v2684_v46  ;;  %v2686_v10 = vadd.f32 %v2685_v11, %v7758_v56  ;;  %6259 = vmatprep.subr.bf16.mxu1 %v6855_v19  ;;  %4305 = vmatpush1.bf16.msra.mxu0 %v6856_v36  ;;  %v6871_v19 = vld [vmem:[#allocation4 + $0x6a0] ss:$20 sps:$4 sm:$0xff]   ;;  %v6870_v8 = vld [vmem:[#allocation6 + $0x24] ss:$8 sps:$4 sm:$0xff]   ;;  %v8669_v46 = vld [vmem:[#allocation16_spill] sm:$0xff] }
 0x1fc   :  { %v2687_v25 = vpop.f32.mrf.mxu1  ;;  %4306 = vmatprep.subr.bf16.mxu0 %v6862_v3 }
 0x1fd   :  { %v2800_v54 = vpop.f32.mrf.mxu0  ;;  %v7785_v22 = vadd.f32 %v2798_v12, %v2686_v10  ;;  %v2688_v43 = vadd.f32 %v2687_v25, %v7755_v0 }
 0x1fe   :  { %v7788_v44 = vpop.f32.mrf.mxu1  ;;  %6260 = vmatpush3.bf16.msra.mxu1 %v6859_v21  ;;  %v6875_v21 = vld [vmem:[#allocation4 + $0x560] ss:$20 sps:$4 sm:$0xff]  }
 0x1ff   :  { %v7790_v2 = vpop.f32.mrf.mxu0  ;;  %v7792_v47 = vadd.f32 %v2800_v54, %v2688_v43  ;;  %4307 = vmatpush1.bf16.msra.mxu0 %v6860_v51  ;;  %6261 = vmatprep.subr.bf16.mxu1 %v6863_v42  ;;  %v6879_v42 = vld [vmem:[#allocation4 + $0x678] ss:$20 sps:$4 sm:$0xff]  }
 0x200   :  { %v2693_v36 = vpop.f32.mrf.mxu1  ;;  %3366 = vmatmul.mubr.bf16.gmra.mxu1 %v7507_v49  ;;  %4308 = vmatprep.subr.bf16.mxu0 %v6866_v37  ;;  %v6868_v49 = vld [vmem:[#allocation6 + $0x20] ss:$8 sps:$4 sm:$0xff]  }
 0x201   :  { %v2806_v50 = vpop.f32.mrf.mxu0  ;;  %v2694_v3 = vadd.f32 %v2693_v36, %v7755_v0  ;;  %3463 = vmatmul.mubr.bf16.gmra.mxu0 %v7497_v32  ;;  %3373 = vmatprep.mubr.bf16.mxu1 %v8669_v46  ;;  %v6874_v32 = vld [vmem:[#allocation6 + $0x14] ss:$8 sps:$4 sm:$0xff]   ;;  %v6883_v36 = vld [vmem:[#allocation4 + $0x538] ss:$20 sps:$4 sm:$0xff]  }
 0x202   :  { %3470 = vmatprep.mubr.bf16.mxu0 %v7526_v52  ;;  %v2695_v11 = vpop.f32.mrf.mxu1  ;;  %6262 = vmatpush3.bf16.msra.mxu1 %v6867_v55 }
 0x203   :  { %v2808_v12 = vpop.f32.mrf.mxu0  ;;  %v7799_v10 = vadd.f32 %v2806_v50, %v2694_v3  ;;  %v2696_v51 = vadd.f32 %v2695_v11, %v7758_v56  ;;  %4309 = vmatpush1.bf16.msra.mxu0 %v6864_v6  ;;  %6263 = vmatprep.subr.bf16.mxu1 %v6871_v19  ;;  %v6872_v6 = vld [vmem:[#allocation6 + $0x10] ss:$8 sps:$4 sm:$0xff]   ;;  %v6878_v11 = vld [vmem:[#allocation6 + $0x4] ss:$8 sps:$4 sm:$0xff]  }
 0x204   :  { %v2697_v25 = vpop.f32.mrf.mxu1  ;;  %4310 = vmatprep.subr.bf16.mxu0 %v6870_v8  ;;  %v6887_v19 = vld [vmem:[#allocation4 + $0x650] ss:$20 sps:$4 sm:$0xff]  }
 0x205   :  { %v2810_v54 = vpop.f32.mrf.mxu0  ;;  %v7802_v37 = vadd.f32 %v2808_v12, %v2696_v51  ;;  %v2698_v52 = vadd.f32 %v2697_v25, %v7755_v0  ;;  %v8670_v8 = vld [vmem:[#allocation17_spill] sm:$0xff]  ;;  %v8671_v51 = vld [vmem:[#allocation18_spill] sm:$0xff] }
 0x206   :  { %v7805_v43 = vpop.f32.mrf.mxu1  ;;  %6264 = vmatpush3.bf16.msra.mxu1 %v6875_v21 }
 0x207   :  { %v7807_v55 = vpop.f32.mrf.mxu0  ;;  %v7809_v50 = vadd.f32 %v2810_v54, %v2698_v52  ;;  %4311 = vmatpush1.bf16.msra.mxu0 %v6868_v49  ;;  %6265 = vmatprep.subr.bf16.mxu1 %v6879_v42  ;;  %v6891_v49 = vld [vmem:[#allocation4 + $0x510] ss:$20 sps:$4 sm:$0xff]   ;;  %v6876_v52 = vld [vmem:[#allocation6] ss:$8 sps:$4 sm:$0xff]  }
 0x208   :  { %v2703_v3 = vpop.f32.mrf.mxu1  ;;  %3374 = vmatmul.mubr.bf16.gmra.mxu1 %v8670_v8  ;;  %4312 = vmatprep.subr.bf16.mxu0 %v6874_v32  ;;  %v6909_v32 = vld [vmem:[#allocation6 + $0x174] ss:$8 sps:$4 sm:$0xff]  }
 0x209   :  { %v2816_v46 = vpop.f32.mrf.mxu0  ;;  %v2704_v12 = vadd.f32 %v2703_v3, %v7755_v0  ;;  %3471 = vmatmul.mubr.bf16.gmra.mxu0 %v7518_v31  ;;  %3381 = vmatprep.mubr.bf16.mxu1 %v8671_v51  ;;  %v6882_v31 = vld [vmem:[#allocation6 + $0xf4] ss:$8 sps:$4 sm:$0xff]  }
 0x20a   :  { %3478 = vmatprep.mubr.bf16.mxu0 %v7548_v58  ;;  %v2705_v21 = vpop.f32.mrf.mxu1  ;;  %6266 = vmatpush3.bf16.msra.mxu1 %v6883_v36 }
 0x20b   :  { %v2818_v25 = vpop.f32.mrf.mxu0  ;;  %v7816_v42 = vadd.f32 %v2816_v46, %v2704_v12  ;;  %v2706_v54 = vadd.f32 %v2705_v21, %v7758_v56  ;;  %4313 = vmatpush1.bf16.msra.mxu0 %v6872_v6  ;;  %6267 = vmatprep.subr.bf16.mxu1 %v6887_v19  ;;  %v6880_v6 = vld [vmem:[#allocation6 + $0xf0] ss:$8 sps:$4 sm:$0xff]  }
 0x20c   :  { %v2707_v8 = vpop.f32.mrf.mxu1  ;;  %4314 = vmatprep.subr.bf16.mxu0 %v6878_v11  ;;  %v8672_v21 = vld [vmem:[#allocation19_spill] sm:$0xff]  ;;  %v6886_v11 = vld [vmem:[#allocation6 + $0xe4] ss:$8 sps:$4 sm:$0xff]  }
 0x20d   :  { %v2820_v3 = vpop.f32.mrf.mxu0  ;;  %v7819_v63 = vadd.f32 %v2818_v25, %v2706_v54  ;;  %v2708_v58 = vadd.f32 %v2707_v8, %v7755_v0  ;;  %v8673_v54 = vld [vmem:[#allocation20_spill] sm:$0xff] }
 0x20e   :  { %v7822_v51 = vpop.f32.mrf.mxu1  ;;  %6268 = vmatpush3.bf16.msra.mxu1 %v6891_v49 }
 0x20f   :  { %v7824_v36 = vpop.f32.mrf.mxu0  ;;  %v7826_v46 = vadd.f32 %v2820_v3, %v2708_v58  ;;  %4315 = vmatpush1.bf16.msra.mxu0 %v6876_v52  ;;  %4413 = vmatprep.subr.bf16.mxu1 %v6909_v32  ;;  %v6884_v32 = vld [vmem:[#allocation6 + $0xe0] ss:$8 sps:$4 sm:$0xff]  }
 0x210   :  { %v2713_v19 = vpop.f32.mrf.mxu1  ;;  %3382 = vmatmul.mubr.bf16.gmra.mxu1 %v8672_v21  ;;  %4316 = vmatprep.subr.bf16.mxu0 %v6882_v31  ;;  %v6890_v31 = vld [vmem:[#allocation6 + $0xd4] ss:$8 sps:$4 sm:$0xff]  }
 0x211   :  { %v2826_v12 = vpop.f32.mrf.mxu0  ;;  %v2714_v25 = vadd.f32 %v2713_v19, %v7755_v0  ;;  %3479 = vmatmul.mubr.bf16.gmra.mxu0 %v7540_v34  ;;  %3389 = vmatprep.mubr.bf16.mxu1 %v8673_v54 }
 0x212   :  { %3486 = vmatprep.mubr.bf16.mxu0 %v7569_v15  ;;  %v2715_v49 = vpop.f32.mrf.mxu1 }
 0x213   :  { %v2828_v8 = vpop.f32.mrf.mxu0  ;;  %v7833_v3 = vadd.f32 %v2826_v12, %v2714_v25  ;;  %v2716_v52 = vadd.f32 %v2715_v49, %v7758_v56  ;;  %4317 = vmatpush2.bf16.msra.mxu0 %v6880_v6  ;;  %v6888_v12 = vld [vmem:[#allocation6 + $0xd0] ss:$8 sps:$4 sm:$0xff]   ;;  %v6894_v6 = vld [vmem:[#allocation6 + $0xc4] ss:$8 sps:$4 sm:$0xff]  }
 0x214   :  { %v2717_v58 = vpop.f32.mrf.mxu1  ;;  %4318 = vmatprep.subr.bf16.mxu0 %v6886_v11 }
 0x215   :  { %v2830_v21 = vpop.f32.mrf.mxu0  ;;  %v7836_v1 = vadd.f32 %v2828_v8, %v2716_v52  ;;  %v2718_v34 = vadd.f32 %v2717_v58, %v7755_v0  ;;  %v8674_v8 = vld [vmem:[#allocation21_spill] sm:$0xff] }
 0x216   :  { %v7839_v19 = vpop.f32.mrf.mxu1 }
 0x217   :  { %v7841_v54 = vpop.f32.mrf.mxu0  ;;  %v7843_v15 = vadd.f32 %v2830_v21, %v2718_v34  ;;  %4319 = vmatpush2.bf16.msra.mxu0 %v6884_v32  ;;  %v6892_v34 = vld [vmem:[#allocation6 + $0xc0] ss:$8 sps:$4 sm:$0xff]  }
 0x218   :  { %v2723_v25 = vpop.f32.mrf.mxu1  ;;  %3390 = vmatmul.mubr.bf16.gmra.mxu1 %v7571_v14  ;;  %4320 = vmatprep.subr.bf16.mxu0 %v6890_v31  ;;  %v6897_v31 = vld [vmem:[#allocation6 + $0xb4] ss:$8 sps:$4 sm:$0xff]  }
 0x219   :  { %v2836_v49 = vpop.f32.mrf.mxu0  ;;  %v2724_v11 = vadd.f32 %v2723_v25, %v7755_v0  ;;  %3487 = vmatmul.mubr.bf16.gmra.mxu0 %v7561_v57  ;;  %3397 = vmatprep.mubr.bf16.mxu1 %v8674_v8 }
 0x21a   :  { %3494 = vmatprep.mubr.bf16.mxu0 %v7591_v41  ;;  %v2725_v52 = vpop.f32.mrf.mxu1 }
 0x21b   :  { %v2838_v58 = vpop.f32.mrf.mxu0  ;;  %v7850_v21 = vadd.f32 %v2836_v49, %v2724_v11  ;;  %v2726_v32 = vadd.f32 %v2725_v52, %v7758_v56  ;;  %4321 = vmatpush2.bf16.msra.mxu0 %v6888_v12  ;;  %v6895_v49 = vld [vmem:[#allocation6 + $0xb0] ss:$8 sps:$4 sm:$0xff]   ;;  %v6900_v12 = vld [vmem:[#allocation6 + $0xa4] ss:$8 sps:$4 sm:$0xff]  }
 0x21c   :  { %v2727_v23 = vpop.f32.mrf.mxu1  ;;  %4322 = vmatprep.subr.bf16.mxu0 %v6894_v6 }
 0x21d   :  { %v2840_v14 = vpop.f32.mrf.mxu0  ;;  %v7853_v17 = vadd.f32 %v2838_v58, %v2726_v32  ;;  %v2728_v57 = vadd.f32 %v2727_v23, %v7755_v0 }
 0x21e   :  { %v7856_v25 = vpop.f32.mrf.mxu1 }
 0x21f   :  { %v7858_v8 = vpop.f32.mrf.mxu0  ;;  %v7860_v41 = vadd.f32 %v2840_v14, %v2728_v57  ;;  %4323 = vmatpush2.bf16.msra.mxu0 %v6892_v34  ;;  %v6898_v14 = vld [vmem:[#allocation6 + $0xa0] ss:$8 sps:$4 sm:$0xff]  }
 0x220   :  { %v2733_v11 = vpop.f32.mrf.mxu1  ;;  %3398 = vmatmul.mubr.bf16.gmra.mxu1 %v7593_v24  ;;  %4324 = vmatprep.subr.bf16.mxu0 %v6897_v31  ;;  %v6903_v31 = vld [vmem:[#allocation6 + $0x94] ss:$8 sps:$4 sm:$0xff]  }
 0x221   :  { %v2846_v52 = vpop.f32.mrf.mxu0  ;;  %v2734_v6 = vadd.f32 %v2733_v11, %v7755_v0  ;;  %3495 = vmatmul.mubr.bf16.gmra.mxu0 %v7583_v33  ;;  %3405 = vmatprep.mubr.bf16.mxu1 %v7614_v18 }
 0x222   :  { %3502 = vmatprep.mubr.bf16.mxu0 %v7616_v28  ;;  %v2735_v23 = vpop.f32.mrf.mxu1 }
 0x223   :  { %v2848_v58 = vpop.f32.mrf.mxu0  ;;  %v7867_v32 = vadd.f32 %v2846_v52, %v2734_v6  ;;  %v2736_v34 = vadd.f32 %v2735_v23, %v7758_v56  ;;  %4325 = vmatpush2.bf16.msra.mxu0 %v6895_v49  ;;  %v6901_v52 = vld [vmem:[#allocation6 + $0x90] ss:$8 sps:$4 sm:$0xff]   ;;  %v6906_v49 = vld [vmem:[#allocation6 + $0x84] ss:$8 sps:$4 sm:$0xff]  }
 0x224   :  { %v2737_v57 = vpop.f32.mrf.mxu1  ;;  %4326 = vmatprep.subr.bf16.mxu0 %v6900_v12 }
 0x225   :  { %v2850_v24 = vpop.f32.mrf.mxu0  ;;  %v7870_v53 = vadd.f32 %v2848_v58, %v2736_v34  ;;  %v2738_v33 = vadd.f32 %v2737_v57, %v7755_v0 }
 0x226   :  { %v7873_v11 = vpop.f32.mrf.mxu1 }
 0x227   :  { %8675 = vst [vmem:[#allocation16_spill] sm:$0xff] %v7870_v53  ;;  %v7875_v18 = vpop.f32.mrf.mxu0  ;;  %v7877_v28 = vadd.f32 %v2850_v24, %v2738_v33  ;;  %4327 = vmatpush2.bf16.msra.mxu0 %v6898_v14  ;;  %v6904_v14 = vld [vmem:[#allocation6 + $0x80] ss:$8 sps:$4 sm:$0xff]  }
 0x228   :  { %8676 = vst [vmem:[#allocation17_spill] sm:$0xff] %v7875_v18  ;;  %v2743_v6 = vpop.f32.mrf.mxu1  ;;  %3406 = vmatmul.mubr.bf16.gmra.mxu1 %v7618_v4  ;;  %4328 = vmatprep.subr.bf16.mxu0 %v6903_v31 }
 0x229   :  { %8677 = vst [vmem:[#allocation18_spill] sm:$0xff] %v7877_v28  ;;  %v2856_v23 = vpop.f32.mrf.mxu0  ;;  %v2744_v12 = vadd.f32 %v2743_v6, %v7755_v0  ;;  %3503 = vmatmul.mubr.bf16.gmra.mxu0 %v7611_v40  ;;  %3543 = vmatprep.mubr.bf16.mxu1 %v7629_v29  ;;  %v6907_v6 = vld [vmem:[#allocation6 + $0x170] ss:$8 sps:$4 sm:$0xff]   ;;  %v6912_v29 = vld [vmem:[#allocation6 + $0x164] ss:$8 sps:$4 sm:$0xff]  }
 0x22a   :  { %v2745_v58 = vpop.f32.mrf.mxu1 }
 0x22b   :  { %v2858_v34 = vpop.f32.mrf.mxu0  ;;  %v7883_v57 = vadd.f32 %v2856_v23, %v2744_v12  ;;  %v2746_v24 = vadd.f32 %v2745_v58, %v7758_v56  ;;  %4329 = vmatpush2.bf16.msra.mxu0 %v6901_v52  ;;  %v2680_v52 = vadd.f32 %v7771_v48, %v7758_v56 }
 0x22c   :  { %v2747_v33 = vpop.f32.mrf.mxu1  ;;  %4330 = vmatprep.subr.bf16.mxu0 %v6906_v49 }
 0x22d   :  { %v2860_v28 = vpop.f32.mrf.mxu0  ;;  %v7886_v4 = vadd.f32 %v2858_v34, %v2746_v24  ;;  %v2748_v31 = vadd.f32 %v2747_v33, %v7755_v0  ;;  %v6910_v0 = vld [vmem:[#allocation6 + $0x160] ss:$8 sps:$4 sm:$0xff]  }
 0x22e   :  { %v7889_v18 = vpop.f32.mrf.mxu1 }
 0x22f   :  { %v7891_v40 = vpop.f32.mrf.mxu0  ;;  %v7893_v53 = vadd.f32 %v2860_v28, %v2748_v31  ;;  %4331 = vmatpush2.bf16.msra.mxu0 %v6904_v14  ;;  %v6915_v28 = vld [vmem:[#allocation6 + $0x154] ss:$8 sps:$4 sm:$0xff]  }
 0x230   :  { %v2899_v23 = vpop.f32.mrf.mxu1  ;;  %3544 = vmatmul.mubr.bf16.vlgmr.msra.gmra.mxu1 %v7631_v16  ;;  %v2793_v16 = vadd.f32 %v7773_v7, %v2680_v52 }
 0x231   :  { %v7895_v12 = vpop.f32.mrf.mxu0  ;;  %v2900_v49 = vadd.f32 %v2899_v23, %v7765_v39  ;;  %3551 = vmatprep.mubr.bf16.mxu1 %v7641_v9  ;;  %4414 = vmatpush1.bf16.msra.mxu1 %v6907_v6  ;;  %v6913_v39 = vld [vmem:[#allocation6 + $0x150] ss:$8 sps:$4 sm:$0xff]   ;;  %v6918_v23 = vld [vmem:[#allocation6 + $0x144] ss:$8 sps:$4 sm:$0xff]  }
 0x232   :  { %8678 = vst [vmem:[#allocation19_spill] sm:$0xff] %v7895_v12  ;;  %v2901_v58 = vpop.f32.mrf.mxu1  ;;  %4415 = vmatprep.subr.bf16.mxu1 %v6912_v29 }
 0x233   :  { %v7902_v34 = vpop.f32.mrf.mxu0  ;;  %v2902_v24 = vadd.f32 %v2901_v58, %v7768_v13  ;;  %v3608_v31 = vmax.f32 %v2900_v49, 0.0  ;;  %v2690_v13 = vadd.f32 %v7788_v44, %v7758_v56  ;;  %v6921_v44 = vld [vmem:[#allocation6 + $0x134] ss:$8 sps:$4 sm:$0xff]  }
 0x234   :  { %8679 = vst [vmem:[#allocation20_spill] sm:$0xff] %v7902_v34  ;;  %v2903_v14 = vpop.f32.mrf.mxu1 }
 0x235   :  { %v7905_v33 = vpop.f32.mrf.mxu0  ;;  %v2904_v48 = vadd.f32 %v2903_v14, %v7775_v27  ;;  %4416 = vmatpush1.bf16.msra.mxu1 %v6910_v0  ;;  %v3609_v58 = vmax.f32 %v2902_v24, 0.0  ;;  %v3688_v7 = vmin.f32 %v3608_v31, 6.0  ;;  %v6916_v0 = vld [vmem:[#allocation6 + $0x140] ss:$8 sps:$4 sm:$0xff]  }
 0x236   :  { %8680 = vst [vmem:[#allocation21_spill] sm:$0xff] %v7905_v33  ;;  %v2905_v9 = vpop.f32.mrf.mxu1  ;;  %4417 = vmatprep.subr.bf16.mxu1 %v6915_v28 }
 0x237   :  { %v7909_v6 = vpop.f32.mrf.mxu0  ;;  %v3613_v34 = vmax.f32 %v2904_v48, 0.0  ;;  %v2906_v29 = vadd.f32 %v2905_v9, %v2793_v16  ;;  %v3689_v48 = vmin.f32 %v3609_v58, 6.0  ;;  %v6924_v58 = vld [vmem:[#allocation6 + $0x124] ss:$8 sps:$4 sm:$0xff]  }
 0x238   :  { %v2909_v12 = vpop.f32.mrf.mxu1  ;;  %3552 = vmatmul.mubr.bf16.gmra.mxu1 %v7643_v38 }
 0x239   :  { %v7913_v33 = vpop.f32.mrf.mxu0  ;;  %v3693_v27 = vmin.f32 %v3613_v34, 6.0  ;;  %v3614_v52 = vmax.f32 %v2906_v29, 0.0  ;;  %v2910_v49 = vadd.f32 %v2909_v12, %v7782_v59  ;;  %3559 = vmatprep.mubr.bf16.mxu1 %v7653_v5  ;;  %4418 = vmatpush1.bf16.msra.mxu1 %v6913_v39  ;;  %v2803_v34 = vadd.f32 %v7790_v2, %v2690_v13 }
 0x23a   :  { %v2911_v28 = vpop.f32.mrf.mxu1  ;;  %4419 = vmatprep.subr.bf16.mxu1 %v6918_v23  ;;  %v6919_v23 = vld [vmem:[#allocation6 + $0x130] ss:$8 sps:$4 sm:$0xff]  }
 0x23b   :  { %v7918_v14 = vpop.f32.mrf.mxu0  ;;  %v3849_v24 = vpack.c.bf16 %v3693_v27, %v3688_v7  ;;  %v3694_v16 = vmin.f32 %v3614_v52, 6.0  ;;  %v2912_v9 = vadd.f32 %v2911_v28, %v7785_v22  ;;  %v3618_v59 = vmax.f32 %v2910_v49, 0.0 }
 0x23c   :  { %v2913_v38 = vpop.f32.mrf.mxu1  ;;  %v2700_v22 = vadd.f32 %v7805_v43, %v7758_v56  ;;  %v6922_v43 = vld [vmem:[#allocation6 + $0x120] ss:$8 sps:$4 sm:$0xff]  }
 0x23d   :  { %v7921_v31 = vpop.f32.mrf.mxu0  ;;  %v2914_v5 = vadd.f32 %v2913_v38, %v7792_v47  ;;  %4420 = vmatpush1.bf16.msra.mxu1 %v6916_v0  ;;  %v3850_v29 = vpack.c.bf16 %v3694_v16, %v3689_v48  ;;  %v3619_v52 = vmax.f32 %v2912_v9, 0.0  ;;  %v3698_v47 = vmin.f32 %v3618_v59, 6.0  ;;  %v6927_v48 = vld [vmem:[#allocation6 + $0x114] ss:$8 sps:$4 sm:$0xff]  }
 0x23e   :  { %v2915_v12 = vpop.f32.mrf.mxu1  ;;  %4421 = vmatprep.subr.bf16.mxu1 %v6921_v44 }
 0x23f   :  { %v7925_v39 = vpop.f32.mrf.mxu0  ;;  %v3623_v7 = vmax.f32 %v2914_v5, 0.0  ;;  %v2916_v27 = vadd.f32 %v2915_v12, %v2803_v34  ;;  %4332 = vmatprep.mubr.bf16.mxu0 %v3850_v29  ;;  %v6955_v34 = vld [vmem:[#allocation6 + $0x270] ss:$8 sps:$4 sm:$0xff]   ;;  %v6957_v5 = vld [vmem:[#allocation6 + $0x274] ss:$8 sps:$4 sm:$0xff]  }
 0x240   :  { %v2919_v28 = vpop.f32.mrf.mxu1  ;;  %3560 = vmatmul.mubr.bf16.gmra.mxu1 %v7655_v20  ;;  %4333 = vmatmul.mubr.bf16.vlgmr.msra.gmra.mxu0 %v3849_v24  ;;  %v3699_v20 = vmin.f32 %v3619_v52, 6.0 }
 0x241   :  { %v7929_v2 = vpop.f32.mrf.mxu0  ;;  %v3703_v13 = vmin.f32 %v3623_v7, 6.0  ;;  %v3624_v49 = vmax.f32 %v2916_v27, 0.0  ;;  %v2920_v0 = vadd.f32 %v2919_v28, %v7799_v10  ;;  %3567 = vmatprep.mubr.bf16.mxu1 %v7665_v45  ;;  %4422 = vmatpush1.bf16.msra.mxu1 %v6919_v23  ;;  %v2813_v10 = vadd.f32 %v7807_v55, %v2700_v22 }
 0x242   :  { %v2921_v44 = vpop.f32.mrf.mxu1  ;;  %4423 = vmatprep.subr.bf16.mxu1 %v6924_v58  ;;  %4526 = vmatprep.subr.bf16.mxu0 %v6957_v5  ;;  %v6925_v58 = vld [vmem:[#allocation6 + $0x110] ss:$8 sps:$4 sm:$0xff]  }
 0x243   :  { %v7934_v16 = vpop.f32.mrf.mxu0  ;;  %v3854_v9 = vpack.c.bf16 %v3703_v13, %v3698_v47  ;;  %v3704_v38 = vmin.f32 %v3624_v49, 6.0  ;;  %v2922_v59 = vadd.f32 %v2921_v44, %v7802_v37  ;;  %v3628_v45 = vmax.f32 %v2920_v0, 0.0  ;;  %4527 = vmatpush1.bf16.msra.mxu0 %v6955_v34  ;;  %v6930_v37 = vld [vmem:[#allocation6 + $0x104] ss:$8 sps:$4 sm:$0xff]  }
 0x244   :  { %v2923_v12 = vpop.f32.mrf.mxu1  ;;  %v2710_v47 = vadd.f32 %v7822_v51, %v7758_v56  ;;  %v6928_v51 = vld [vmem:[#allocation6 + $0x100] ss:$8 sps:$4 sm:$0xff]  }
 0x245   :  { %v7937_v29 = vpop.f32.mrf.mxu0  ;;  %v2924_v24 = vadd.f32 %v2923_v12, %v7809_v50  ;;  %v3855_v27 = vpack.c.bf16 %v3704_v38, %v3699_v20  ;;  %4424 = vmatpush1.bf16.msra.mxu1 %v6922_v43  ;;  %v3629_v13 = vmax.f32 %v2922_v59, 0.0  ;;  %v3708_v50 = vmin.f32 %v3628_v45, 6.0  ;;  %v6933_v38 = vld [vmem:[#allocation6 + $0x1f4] ss:$8 sps:$4 sm:$0xff]   ;;  %v6958_v20 = vld [vmem:[#allocation6 + $0x260] ss:$8 sps:$4 sm:$0xff]  }
 0x246   :  { %v2925_v23 = vpop.f32.mrf.mxu1  ;;  %4425 = vmatprep.subr.bf16.mxu1 %v6927_v48  ;;  %v6960_v59 = vld [vmem:[#allocation6 + $0x264] ss:$8 sps:$4 sm:$0xff]  }
 0x247   :  { %v7941_v7 = vpop.f32.mrf.mxu0  ;;  %v3633_v28 = vmax.f32 %v2924_v24, 0.0  ;;  %v2926_v52 = vadd.f32 %v2925_v23, %v2813_v10  ;;  %4342 = vmatprep.mubr.bf16.mxu0 %v3855_v27  ;;  %4528 = vmatprep.subr.bf16.mxu0 %v6960_v59 }
 0x248   :  { %v2929_v55 = vpop.f32.mrf.mxu1  ;;  %3568 = vmatmul.mubr.bf16.gmra.mxu1 %v7667_v35  ;;  %4343 = vmatmul.mubr.bf16.gmra.mxu0 %v3854_v9  ;;  %v3709_v35 = vmin.f32 %v3629_v13, 6.0 }
 0x249   :  { %v7945_v22 = vpop.f32.mrf.mxu0  ;;  %v3713_v49 = vmin.f32 %v3633_v28, 6.0  ;;  %v3634_v0 = vmax.f32 %v2926_v52, 0.0  ;;  %v2930_v44 = vadd.f32 %v2929_v55, %v7816_v42  ;;  %3575 = vmatprep.mubr.bf16.mxu1 %v7677_v30  ;;  %4426 = vmatpush1.bf16.msra.mxu1 %v6925_v58  ;;  %v2823_v42 = vadd.f32 %v7824_v36, %v2710_v47  ;;  %v6931_v58 = vld [vmem:[#allocation6 + $0x1f0] ss:$8 sps:$4 sm:$0xff]  }
 0x24a   :  { %v2931_v43 = vpop.f32.mrf.mxu1  ;;  %4427 = vmatprep.subr.bf16.mxu1 %v6930_v37  ;;  %4529 = vmatpush1.bf16.msra.mxu0 %v6958_v20  ;;  %v2720_v37 = vadd.f32 %v7839_v19, %v7758_v56  ;;  %v6934_v19 = vld [vmem:[#allocation6 + $0x1e0] ss:$8 sps:$4 sm:$0xff]   ;;  %v6963_v20 = vld [vmem:[#allocation6 + $0x254] ss:$8 sps:$4 sm:$0xff]  }
 0x24b   :  { %v7950_v48 = vpop.f32.mrf.mxu0  ;;  %v3859_v34 = vpack.c.bf16 %v3713_v49, %v3708_v50  ;;  %v3714_v5 = vmin.f32 %v3634_v0, 6.0  ;;  %v2932_v12 = vadd.f32 %v2931_v43, %v7819_v63  ;;  %v3638_v30 = vmax.f32 %v2930_v44, 0.0  ;;  %v6936_v63 = vld [vmem:[#allocation6 + $0x1e4] ss:$8 sps:$4 sm:$0xff]   ;;  %v6939_v43 = vld [vmem:[#allocation6 + $0x1d4] ss:$8 sps:$4 sm:$0xff]   ;;  %4530 = vmatprep.subr.bf16.mxu0 %v6963_v20 }
 0x24c   :  { %v2933_v10 = vpop.f32.mrf.mxu1 }
 0x24d   :  { %v7953_v45 = vpop.f32.mrf.mxu0  ;;  %v2934_v9 = vadd.f32 %v2933_v10, %v7826_v46  ;;  %v3860_v27 = vpack.c.bf16 %v3714_v5, %v3709_v35  ;;  %4428 = vmatpush1.bf16.msra.mxu1 %v6928_v51  ;;  %v3639_v13 = vmax.f32 %v2932_v12, 0.0  ;;  %v3718_v46 = vmin.f32 %v3638_v30, 6.0  ;;  %v6961_v5 = vld [vmem:[#allocation6 + $0x250] ss:$8 sps:$4 sm:$0xff]  }
 0x24e   :  { %v2935_v24 = vpop.f32.mrf.mxu1  ;;  %4429 = vmatprep.subr.bf16.mxu1 %v6933_v38  ;;  %4531 = vmatpush1.bf16.msra.mxu0 %v6961_v5 }
 0x24f   :  { %v7957_v23 = vpop.f32.mrf.mxu0  ;;  %v3643_v28 = vmax.f32 %v2934_v9, 0.0  ;;  %v2936_v52 = vadd.f32 %v2935_v24, %v2823_v42  ;;  %4352 = vmatprep.mubr.bf16.mxu0 %v3860_v27  ;;  %v6937_v9 = vld [vmem:[#allocation6 + $0x1d0] ss:$8 sps:$4 sm:$0xff]  }
 0x250   :  { %v2939_v36 = vpop.f32.mrf.mxu1  ;;  %3576 = vmatmul.mubr.bf16.gmra.mxu1 %v7679_v62  ;;  %4353 = vmatmul.mubr.bf16.gmra.mxu0 %v3859_v34  ;;  %v3719_v62 = vmin.f32 %v3639_v13, 6.0 }
 0x251   :  { %v7961_v47 = vpop.f32.mrf.mxu0  ;;  %v3723_v55 = vmin.f32 %v3643_v28, 6.0  ;;  %v3644_v50 = vmax.f32 %v2936_v52, 0.0  ;;  %v2940_v49 = vadd.f32 %v2939_v36, %v7833_v3  ;;  %3583 = vmatprep.mubr.bf16.mxu1 %v7689_v26  ;;  %4430 = vmatpush2.bf16.msra.mxu1 %v6931_v58  ;;  %v2833_v3 = vadd.f32 %v7841_v54, %v2720_v37 }
 0x252   :  { %v2941_v0 = vpop.f32.mrf.mxu1  ;;  %4431 = vmatprep.subr.bf16.mxu1 %v6936_v63  ;;  %v2730_v58 = vadd.f32 %v7856_v25, %v7758_v56  ;;  %v6940_v25 = vld [vmem:[#allocation6 + $0x1c0] ss:$8 sps:$4 sm:$0xff]  }
 0x253   :  { %v7966_v44 = vpop.f32.mrf.mxu0  ;;  %v3864_v51 = vpack.c.bf16 %v3723_v55, %v3718_v46  ;;  %v3724_v38 = vmin.f32 %v3644_v50, 6.0  ;;  %v2942_v59 = vadd.f32 %v2941_v0, %v7836_v1  ;;  %v3648_v26 = vmax.f32 %v2940_v49, 0.0  ;;  %v6942_v1 = vld [vmem:[#allocation6 + $0x1c4] ss:$8 sps:$4 sm:$0xff]   ;;  %v6945_v55 = vld [vmem:[#allocation6 + $0x1b4] ss:$8 sps:$4 sm:$0xff]  }
 0x254   :  { %v2943_v35 = vpop.f32.mrf.mxu1  ;;  %v6964_v0 = vld [vmem:[#allocation6 + $0x240] ss:$8 sps:$4 sm:$0xff]  }
 0x255   :  { %v7969_v12 = vpop.f32.mrf.mxu0  ;;  %v2944_v34 = vadd.f32 %v2943_v35, %v7843_v15  ;;  %v3865_v30 = vpack.c.bf16 %v3724_v38, %v3719_v62  ;;  %4432 = vmatpush2.bf16.msra.mxu1 %v6934_v19  ;;  %v3649_v28 = vmax.f32 %v2942_v59, 0.0  ;;  %v3728_v15 = vmin.f32 %v3648_v26, 6.0  ;;  %v6966_v19 = vld [vmem:[#allocation6 + $0x244] ss:$8 sps:$4 sm:$0xff]   ;;  %v6943_v35 = vld [vmem:[#allocation6 + $0x1b0] ss:$8 sps:$4 sm:$0xff]  }
 0x256   :  { %v2945_v10 = vpop.f32.mrf.mxu1  ;;  %4433 = vmatprep.subr.bf16.mxu1 %v6939_v43  ;;  %4532 = vmatprep.subr.bf16.mxu0 %v6966_v19 }
 0x257   :  { %v7973_v42 = vpop.f32.mrf.mxu0  ;;  %v3653_v24 = vmax.f32 %v2944_v34, 0.0  ;;  %v2946_v27 = vadd.f32 %v2945_v10, %v2833_v3  ;;  %4362 = vmatprep.mubr.bf16.mxu0 %v3865_v30  ;;  %4533 = vmatpush1.bf16.msra.mxu0 %v6964_v0  ;;  %v2740_v34 = vadd.f32 %v7873_v11, %v7758_v56  ;;  %v6946_v11 = vld [vmem:[#allocation6 + $0x1a0] ss:$8 sps:$4 sm:$0xff]  }
 0x258   :  { %v2949_v54 = vpop.f32.mrf.mxu1  ;;  %3584 = vmatmul.mubr.bf16.gmra.mxu1 %v7691_v60  ;;  %4363 = vmatmul.mubr.bf16.gmra.mxu0 %v3864_v51  ;;  %v3729_v60 = vmin.f32 %v3649_v28, 6.0 }
 0x259   :  { %v7977_v52 = vpop.f32.mrf.mxu0  ;;  %v3733_v63 = vmin.f32 %v3653_v24, 6.0  ;;  %v3654_v37 = vmax.f32 %v2946_v27, 0.0  ;;  %v2950_v13 = vadd.f32 %v2949_v54, %v7850_v21  ;;  %3591 = vmatprep.mubr.bf16.mxu1 %v7701_v61  ;;  %4434 = vmatpush2.bf16.msra.mxu1 %v6937_v9  ;;  %v2843_v21 = vadd.f32 %v7858_v8, %v2730_v58  ;;  %v8682_v58 = vld [vmem:[#allocation23_spill] sm:$0xff] }
 0x25a   :  { %v2951_v36 = vpop.f32.mrf.mxu1  ;;  %4435 = vmatprep.subr.bf16.mxu1 %v6942_v1 }
 0x25b   :  { %v7982_v46 = vpop.f32.mrf.mxu0  ;;  %v3869_v50 = vpack.c.bf16 %v3733_v63, %v3728_v15  ;;  %v3734_v49 = vmin.f32 %v3654_v37, 6.0  ;;  %v2952_v43 = vadd.f32 %v2951_v36, %v7853_v17  ;;  %v3658_v61 = vmax.f32 %v2950_v13, 0.0  ;;  %v6948_v17 = vld [vmem:[#allocation6 + $0x1a4] ss:$8 sps:$4 sm:$0xff]   ;;  %v6951_v15 = vld [vmem:[#allocation6 + $0x194] ss:$8 sps:$4 sm:$0xff]  }
 0x25c   :  { %v2953_v38 = vpop.f32.mrf.mxu1  ;;  %v6967_v13 = vld [vmem:[#allocation6 + $0x230] ss:$8 sps:$4 sm:$0xff]   ;;  %v6969_v36 = vld [vmem:[#allocation6 + $0x234] ss:$8 sps:$4 sm:$0xff]  }
 0x25d   :  { %v7985_v5 = vpop.f32.mrf.mxu0  ;;  %v2954_v51 = vadd.f32 %v2953_v38, %v7860_v41  ;;  %v3870_v59 = vpack.c.bf16 %v3734_v49, %v3729_v60  ;;  %4436 = vmatpush2.bf16.msra.mxu1 %v6940_v25  ;;  %v3659_v10 = vmax.f32 %v2952_v43, 0.0  ;;  %v8681_v41 = vld [vmem:[#allocation22_spill] sm:$0xff]  ;;  %v3738_v9 = vmin.f32 %v3658_v61, 6.0  ;;  %4534 = vmatprep.subr.bf16.mxu0 %v6969_v36  ;;  %v8687_v36 = vld [vmem:[#allocation13_spill] sm:$0xff] }
 0x25e   :  { %v2955_v20 = vpop.f32.mrf.mxu1  ;;  %4437 = vmatprep.subr.bf16.mxu1 %v6945_v55  ;;  %v8683_v55 = vld [vmem:[#allocation16_spill] sm:$0xff]  ;;  %v8685_v43 = vld [vmem:[#allocation18_spill] sm:$0xff]  ;;  %4535 = vmatpush1.bf16.msra.mxu0 %v6967_v13  ;;  %v8019_v13 = vld [vmem:[%s8627_s4] sm:$0x1f] }
 0x25f   :  { %v7989_v62 = vpop.f32.mrf.mxu0  ;;  %v3663_v3 = vmax.f32 %v2954_v51, 0.0  ;;  %v2956_v26 = vadd.f32 %v2955_v20, %v2843_v21  ;;  %4372 = vmatprep.mubr.bf16.mxu0 %v3870_v59  ;;  %v3739_v25 = vmin.f32 %v3659_v10, 6.0  ;;  %v6949_v20 = vld [vmem:[#allocation6 + $0x190] ss:$8 sps:$4 sm:$0xff]  }
 0x260   :  { %v2959_v8 = vpop.f32.mrf.mxu1  ;;  %3592 = vmatmul.mubr.bf16.gmra.mxu1 %v8681_v41  ;;  %4373 = vmatmul.mubr.bf16.gmra.mxu0 %v3869_v50 }
 0x261   :  { %v7993_v30 = vpop.f32.mrf.mxu0  ;;  %v3743_v24 = vmin.f32 %v3663_v3, 6.0  ;;  %v3664_v27 = vmax.f32 %v2956_v26, 0.0  ;;  %v2960_v1 = vadd.f32 %v2959_v8, %v7867_v32  ;;  %3599 = vmatprep.mubr.bf16.mxu1 %v8682_v58  ;;  %4438 = vmatpush2.bf16.msra.mxu1 %v6943_v35  ;;  %v8684_v32 = vld [vmem:[#allocation17_spill] sm:$0xff]  ;;  %v2750_v26 = vadd.f32 %v7889_v18, %v7758_v56  ;;  %v8686_v8 = vld [vmem:[#allocation24_spill] sm:$0xff] }
 0x262   :  { %v2961_v28 = vpop.f32.mrf.mxu1  ;;  %4439 = vmatprep.subr.bf16.mxu1 %v6948_v17  ;;  %v2853_v50 = vadd.f32 %v8684_v32, %v2740_v34  ;;  %v6954_v3 = vld [vmem:[#allocation6 + $0x184] ss:$8 sps:$4 sm:$0xff]  }
 0x263   :  { %v7998_v54 = vpop.f32.mrf.mxu0  ;;  %v3874_v63 = vpack.c.bf16 %v3743_v24, %v3738_v9  ;;  %v3744_v37 = vmin.f32 %v3664_v27, 6.0  ;;  %v2962_v49 = vadd.f32 %v2961_v28, %v8683_v55  ;;  %v3668_v60 = vmax.f32 %v2960_v1, 0.0  ;;  %v6952_v28 = vld [vmem:[#allocation6 + $0x180] ss:$8 sps:$4 sm:$0xff]  }
 0x264   :  { %v2963_v0 = vpop.f32.mrf.mxu1 }
 0x265   :  { %v8001_v19 = vpop.f32.mrf.mxu0  ;;  %v2964_v38 = vadd.f32 %v2963_v0, %v8685_v43  ;;  %v3875_v51 = vpack.c.bf16 %v3744_v37, %v3739_v25  ;;  %4440 = vmatpush2.bf16.msra.mxu1 %v6946_v11  ;;  %v3669_v17 = vmax.f32 %v2962_v49, 0.0  ;;  %v3748_v41 = vmin.f32 %v3668_v60, 6.0  ;;  %v6972_v37 = vld [vmem:[#allocation6 + $0x224] ss:$8 sps:$4 sm:$0xff]  }
 0x266   :  { %v2965_v21 = vpop.f32.mrf.mxu1  ;;  %4441 = vmatprep.subr.bf16.mxu1 %v6951_v15  ;;  %v6970_v15 = vld [vmem:[#allocation6 + $0x220] ss:$8 sps:$4 sm:$0xff]   ;;  %v2863_v0 = vadd.f32 %v7891_v40, %v2750_v26  ;;  %4536 = vmatprep.subr.bf16.mxu0 %v6972_v37  ;;  %v8690_v40 = vld [vmem:[#allocation19_spill] sm:$0xff]  ;;  %v8691_v26 = vld [vmem:[#allocation20_spill] sm:$0xff] }
 0x267   :  { %v8005_v61 = vpop.f32.mrf.mxu0  ;;  %v3673_v59 = vmax.f32 %v2964_v38, 0.0  ;;  %v2966_v35 = vadd.f32 %v2965_v21, %v2853_v50  ;;  %4382 = vmatprep.mubr.bf16.mxu0 %v3875_v51  ;;  %v3749_v25 = vmin.f32 %v3669_v17, 6.0  ;;  %4537 = vmatpush1.bf16.msra.mxu0 %v6970_v15 }
 0x268   :  { %v2969_v34 = vpop.f32.mrf.mxu1  ;;  %3600 = vmatmul.mubr.bf16.gmra.mxu1 %v8686_v8  ;;  %4383 = vmatmul.mubr.bf16.gmra.mxu0 %v3874_v63 }
 0x269   :  { %v8009_v10 = vpop.f32.mrf.mxu0  ;;  %v3753_v9 = vmin.f32 %v3673_v59, 6.0  ;;  %v3674_v24 = vmax.f32 %v2966_v35, 0.0  ;;  %v2970_v27 = vadd.f32 %v2969_v34, %v7883_v57  ;;  %4442 = vmatpush2.bf16.msra.mxu1 %v6949_v20  ;;  %v8688_v57 = vsub.s32 2, %v8687_v36 }
 0x26a   :  { %v2971_v1 = vpop.f32.mrf.mxu1  ;;  %4443 = vmatprep.subr.bf16.mxu1 %v6954_v3 }
 0x26b   :  { %v8013_v58 = vpop.f32.mrf.mxu0  ;;  %v3879_v11 = vpack.c.bf16 %v3753_v9, %v3748_v41  ;;  %v3754_v56 = vmin.f32 %v3674_v24, 6.0  ;;  %v2972_v18 = vadd.f32 %v2971_v1, %v7886_v4  ;;  %v8024_v63 = vrot.slane %v8019_v13, %v8688_v57  ;;  %v8692_v9 = vld [vmem:[#allocation21_spill] sm:$0xff]  ;;  %v6973_v57 = vld [vmem:[#allocation6 + $0x210] ss:$8 sps:$4 sm:$0xff]  }
 0x26c   :  { %v2973_v55 = vpop.f32.mrf.mxu1  ;;  %v8689_v4 = vsub.s32 3, %v8687_v36  ;;  %v3678_v50 = vmax.f32 %v2970_v27, 0.0 }
 0x26d   :  { %v8026_v49 = vpop.f32.mrf.mxu0  ;;  %v2974_v60 = vadd.f32 %v2973_v55, %v7893_v53  ;;  %v3880_v21 = vpack.c.bf16 %v3754_v56, %v3749_v25  ;;  %4444 = vmatpush2.bf16.msra.mxu1 %v6952_v28  ;;  %v3679_v51 = vmax.f32 %v2972_v18, 0.0  ;;  %v3013_v35 = vadd.f32 %v8690_v40, %v8024_v63  ;;  %v6975_v25 = vld [vmem:[#allocation6 + $0x214] ss:$8 sps:$4 sm:$0xff]  }
 0x26e   :  { %v8032_v32 = vrot.slane %v8019_v13, %v8689_v4  ;;  %v2975_v43 = vpop.f32.mrf.mxu1  ;;  %v3758_v34 = vmin.f32 %v3678_v50, 6.0  ;;  %v3017_v24 = vadd.f32 %v8692_v9, %v8024_v63  ;;  %4538 = vmatprep.subr.bf16.mxu0 %v6975_v25  ;;  %v8693_v9 = vmov 0  }
 0x26f   :  { %v8035_v38 = vpop.f32.mrf.mxu0  ;;  %v3683_v20 = vmax.f32 %v2974_v60, 0.0  ;;  %v2976_v59 = vadd.f32 %v2975_v43, %v2863_v0  ;;  %4392 = vmatprep.mubr.bf16.mxu0 %v3880_v21  ;;  %v3759_v28 = vmin.f32 %v3679_v51, 6.0  ;;  %4539 = vmatpush1.bf16.msra.mxu0 %v6973_v57  ;;  %v3023_v51 = vadd.f32 %v7913_v33, %v8024_v63 }
 0x270   :  { %v3125_v3 = vpop.f32.mrf.mxu1  ;;  %v3015_v17 = vadd.f32 %v8691_v26, %v8032_v32  ;;  %4393 = vmatmul.mubr.bf16.gmra.mxu0 %v3879_v11  ;;  %v3019_v0 = vadd.f32 %v7909_v6, %v8032_v32 }
 0x271   :  { %v3763_v53 = vmin.f32 %v3683_v20, 6.0  ;;  %v3684_v8 = vmax.f32 %v2976_v59, 0.0  ;;  %v3238_v41 = vpop.f32.mrf.mxu0  ;;  %v3126_v27 = vadd.f32 %v3125_v3, %v3013_v35  ;;  %v3025_v35 = vadd.f32 %v7918_v14, %v8032_v32 }
 0x272   :  { %v3127_v1 = vpop.f32.mrf.mxu1 }
 0x273   :  { %v3884_v56 = vpack.c.bf16 %v3763_v53, %v3758_v34  ;;  %v3764_v18 = vmin.f32 %v3684_v8, 6.0  ;;  %v3128_v15 = vadd.f32 %v3127_v1, %v3015_v17  ;;  %v3240_v37 = vpop.f32.mrf.mxu0  ;;  %v3239_v43 = vadd.f32 %v3238_v41, %v3126_v27 }
 0x274   :  { %v3129_v55 = vpop.f32.mrf.mxu1  ;;  %v3027_v1 = vadd.f32 %v7921_v31, %v8024_v63 }
 0x275   :  { %v3241_v4 = vadd.f32 %v3240_v37, %v3128_v15  ;;  %v3130_v50 = vadd.f32 %v3129_v55, %v3017_v24  ;;  %v3242_v60 = vpop.f32.mrf.mxu0  ;;  %v3885_v11 = vpack.c.bf16 %v3764_v18, %v3759_v28  ;;  %v3610_v8 = vmax.f32 %v3239_v43, 0.0  ;;  %v6978_v15 = vld [vmem:[#allocation6 + $0x204] ss:$8 sps:$4 sm:$0xff]   ;;  %v6976_v55 = vld [vmem:[#allocation6 + $0x200] ss:$8 sps:$4 sm:$0xff]  }
 0x276   :  { %v3131_v21 = vpop.f32.mrf.mxu1  ;;  %v3029_v37 = vadd.f32 %v7925_v39, %v8032_v32  ;;  %4540 = vmatprep.subr.bf16.mxu0 %v6978_v15 }
 0x277   :  { %v3243_v20 = vadd.f32 %v3242_v60, %v3130_v50  ;;  %v3132_v59 = vadd.f32 %v3131_v21, %v3019_v0  ;;  %v3244_v40 = vpop.f32.mrf.mxu0  ;;  %4402 = vmatprep.mubr.bf16.mxu0 %v3885_v11  ;;  %v3611_v6 = vmax.f32 %v3241_v4, 0.0  ;;  %v3690_v0 = vmin.f32 %v3610_v8, 6.0  ;;  %4541 = vmatpush1.bf16.msra.mxu0 %v6976_v55 }
 0x278   :  { %v3135_v3 = vpop.f32.mrf.mxu1  ;;  %4403 = vmatmul.mubr.bf16.gmra.mxu0 %v3884_v56  ;;  %v3033_v11 = vadd.f32 %v7929_v2, %v8024_v63  ;;  %v3037_v2 = vadd.f32 %v7937_v29, %v8024_v63  ;;  %v3043_v29 = vadd.f32 %v7945_v22, %v8024_v63 }
 0x279   :  { %v3615_v26 = vmax.f32 %v3243_v20, 0.0  ;;  %v3245_v17 = vadd.f32 %v3244_v40, %v3132_v59  ;;  %v3136_v34 = vadd.f32 %v3135_v3, %v3023_v51  ;;  %v3248_v53 = vpop.f32.mrf.mxu0  ;;  %4558 = vmatprep.mubr.bf16.mxu0 %v8693_v9  ;;  %v3691_v57 = vmin.f32 %v3611_v6, 6.0 }
 0x27a   :  { %v3137_v41 = vpop.f32.mrf.mxu1  ;;  %v3035_v40 = vadd.f32 %v7934_v16, %v8032_v32  ;;  %v3039_v16 = vadd.f32 %v7941_v7, %v8032_v32 }
 0x27b   :  { %v3616_v24 = vmax.f32 %v3245_v17, 0.0  ;;  %v3138_v33 = vadd.f32 %v3137_v41, %v3025_v35  ;;  %v3250_v27 = vpop.f32.mrf.mxu0  ;;  %v3695_v28 = vmin.f32 %v3615_v26, 6.0  ;;  %v3249_v18 = vadd.f32 %v3248_v53, %v3136_v34 }
 0x27c   :  { %v3139_v14 = vpop.f32.mrf.mxu1 }
 0x27d   :  { %v3696_v25 = vmin.f32 %v3616_v24, 6.0  ;;  %v3252_v56 = vpop.f32.mrf.mxu0  ;;  %v3251_v4 = vadd.f32 %v3250_v27, %v3138_v33  ;;  %v3140_v50 = vadd.f32 %v3139_v14, %v3027_v1  ;;  %v3851_v51 = vpack.c.bf16 %v3695_v28, %v3690_v0 }
 0x27e   :  { %v3141_v60 = vpop.f32.mrf.mxu1  ;;  %v3620_v20 = vmax.f32 %v3249_v18, 0.0 }
 0x27f   :  { %v3142_v31 = vadd.f32 %v3141_v60, %v3029_v37  ;;  %v3254_v43 = vpop.f32.mrf.mxu0  ;;  %v3852_v21 = vpack.c.bf16 %v3696_v25, %v3691_v57  ;;  %v3253_v59 = vadd.f32 %v3252_v56, %v3140_v50  ;;  %v3621_v26 = vmax.f32 %v3251_v4, 0.0 }
 0x280   :  { %v3145_v39 = vpop.f32.mrf.mxu1  ;;  %v3700_v33 = vmin.f32 %v3620_v20, 6.0  ;;  %v3045_v50 = vadd.f32 %v7950_v48, %v8032_v32 }
 0x281   :  { %v3255_v35 = vadd.f32 %v3254_v43, %v3142_v31  ;;  %v3146_v3 = vadd.f32 %v3145_v39, %v3033_v11  ;;  %v3258_v6 = vpop.f32.mrf.mxu0  ;;  %4445 = vmatprep.mubr.bf16.mxu1 %v3852_v21  ;;  %v3625_v17 = vmax.f32 %v3253_v59, 0.0  ;;  %v3701_v37 = vmin.f32 %v3621_v26, 6.0 }
 0x282   :  { %v3147_v34 = vpop.f32.mrf.mxu1  ;;  %4446 = vmatmul.mubr.bf16.vlgmr.msra.gmra.mxu1 %v3851_v51  ;;  %v3049_v26 = vadd.f32 %v7957_v23, %v8032_v32 }
 0x283   :  { %v3626_v53 = vmax.f32 %v3255_v35, 0.0  ;;  %v3259_v8 = vadd.f32 %v3258_v6, %v3146_v3  ;;  %v3148_v41 = vadd.f32 %v3147_v34, %v3035_v40  ;;  %v3260_v24 = vpop.f32.mrf.mxu0  ;;  %v3705_v27 = vmin.f32 %v3625_v17, 6.0 }
 0x284   :  { %v3149_v1 = vpop.f32.mrf.mxu1  ;;  %v3047_v3 = vadd.f32 %v7953_v45, %v8024_v63 }
 0x285   :  { %v3706_v28 = vmin.f32 %v3626_v53, 6.0  ;;  %v3261_v18 = vadd.f32 %v3260_v24, %v3148_v41  ;;  %v3150_v14 = vadd.f32 %v3149_v1, %v3037_v2  ;;  %v3262_v15 = vpop.f32.mrf.mxu0  ;;  %v3856_v57 = vpack.c.bf16 %v3705_v27, %v3700_v33 }
 0x286   :  { %v3151_v25 = vpop.f32.mrf.mxu1  ;;  %v3630_v56 = vmax.f32 %v3259_v8, 0.0  ;;  %v3053_v33 = vadd.f32 %v7961_v47, %v8024_v63 }
 0x287   :  { %v3263_v55 = vadd.f32 %v3262_v15, %v3150_v14  ;;  %v3152_v0 = vadd.f32 %v3151_v25, %v3039_v16  ;;  %v3264_v4 = vpop.f32.mrf.mxu0  ;;  %v3857_v11 = vpack.c.bf16 %v3706_v28, %v3701_v37  ;;  %v3631_v7 = vmax.f32 %v3261_v18, 0.0 }
 0x288   :  { %v3155_v60 = vpop.f32.mrf.mxu1  ;;  %v3710_v59 = vmin.f32 %v3630_v56, 6.0  ;;  %v3055_v14 = vadd.f32 %v7966_v44, %v8032_v32  ;;  %v3057_v56 = vadd.f32 %v7969_v12, %v8024_v63  ;;  %v3059_v44 = vadd.f32 %v7973_v42, %v8032_v32 }
 0x289   :  { %v3635_v31 = vmax.f32 %v3263_v55, 0.0  ;;  %v3265_v43 = vadd.f32 %v3264_v4, %v3152_v0  ;;  %v3156_v21 = vadd.f32 %v3155_v60, %v3043_v29  ;;  %v3268_v51 = vpop.f32.mrf.mxu0  ;;  %4455 = vmatprep.mubr.bf16.mxu1 %v3857_v11  ;;  %v3711_v17 = vmin.f32 %v3631_v7, 6.0 }
 0x28a   :  { %v3157_v20 = vpop.f32.mrf.mxu1  ;;  %4456 = vmatmul.mubr.bf16.gmra.mxu1 %v3856_v57  ;;  %v3063_v12 = vadd.f32 %v7977_v52, %v8024_v63 }
 0x28b   :  { %v3715_v39 = vmin.f32 %v3635_v31, 6.0  ;;  %v3636_v40 = vmax.f32 %v3265_v43, 0.0  ;;  %v3158_v22 = vadd.f32 %v3157_v20, %v3045_v50  ;;  %v3270_v35 = vpop.f32.mrf.mxu0  ;;  %v3269_v6 = vadd.f32 %v3268_v51, %v3156_v21 }
 0x28c   :  { %v3159_v48 = vpop.f32.mrf.mxu1 }
 0x28d   :  { %v3861_v34 = vpack.c.bf16 %v3715_v39, %v3710_v59  ;;  %v3716_v2 = vmin.f32 %v3636_v40, 6.0  ;;  %v3272_v53 = vpop.f32.mrf.mxu0  ;;  %v3271_v8 = vadd.f32 %v3270_v35, %v3158_v22  ;;  %v3160_v41 = vadd.f32 %v3159_v48, %v3047_v3 }
 0x28e   :  { %v3161_v24 = vpop.f32.mrf.mxu1  ;;  %v3640_v28 = vmax.f32 %v3269_v6, 0.0  ;;  %v3065_v3 = vadd.f32 %v7982_v46, %v8032_v32 }
 0x28f   :  { %v3162_v27 = vadd.f32 %v3161_v24, %v3049_v26  ;;  %v3274_v1 = vpop.f32.mrf.mxu0  ;;  %v3862_v16 = vpack.c.bf16 %v3716_v2, %v3711_v17  ;;  %v3273_v45 = vadd.f32 %v3272_v53, %v3160_v41  ;;  %v3641_v57 = vmax.f32 %v3271_v8, 0.0 }
 0x290   :  { %v3165_v18 = vpop.f32.mrf.mxu1  ;;  %v3720_v50 = vmin.f32 %v3640_v28, 6.0 }
 0x291   :  { %v3275_v23 = vadd.f32 %v3274_v1, %v3162_v27  ;;  %v3166_v15 = vadd.f32 %v3165_v18, %v3053_v33  ;;  %v3278_v37 = vpop.f32.mrf.mxu0  ;;  %4465 = vmatprep.mubr.bf16.mxu1 %v3862_v16  ;;  %v3645_v25 = vmax.f32 %v3273_v45, 0.0  ;;  %v3721_v51 = vmin.f32 %v3641_v57, 6.0 }
 0x292   :  { %v3167_v29 = vpop.f32.mrf.mxu1  ;;  %4466 = vmatmul.mubr.bf16.gmra.mxu1 %v3861_v34  ;;  %v3067_v27 = vadd.f32 %v7985_v5, %v8024_v63  ;;  %v3069_v16 = vadd.f32 %v7989_v62, %v8032_v32  ;;  %v3073_v57 = vadd.f32 %v7993_v30, %v8024_v63 }
 0x293   :  { %v3646_v47 = vmax.f32 %v3275_v23, 0.0  ;;  %v3279_v55 = vadd.f32 %v3278_v37, %v3166_v15  ;;  %v3168_v0 = vadd.f32 %v3167_v29, %v3055_v14  ;;  %v3280_v4 = vpop.f32.mrf.mxu0  ;;  %v3725_v60 = vmin.f32 %v3645_v25, 6.0 }
 0x294   :  { %v3169_v11 = vpop.f32.mrf.mxu1 }
 0x295   :  { %v3726_v7 = vmin.f32 %v3646_v47, 6.0  ;;  %v3281_v31 = vadd.f32 %v3280_v4, %v3168_v0  ;;  %v3170_v43 = vadd.f32 %v3169_v11, %v3057_v56  ;;  %v3282_v21 = vpop.f32.mrf.mxu0  ;;  %v3866_v20 = vpack.c.bf16 %v3725_v60, %v3720_v50 }
 0x296   :  { %v3171_v59 = vpop.f32.mrf.mxu1  ;;  %v3650_v39 = vmax.f32 %v3279_v55, 0.0  ;;  %v3075_v0 = vadd.f32 %v7998_v54, %v8032_v32  ;;  %v3079_v54 = vadd.f32 %v8005_v61, %v8032_v32 }
 0x297   :  { %v3283_v40 = vadd.f32 %v3282_v21, %v3170_v43  ;;  %v3172_v22 = vadd.f32 %v3171_v59, %v3059_v44  ;;  %v3284_v35 = vpop.f32.mrf.mxu0  ;;  %v3867_v48 = vpack.c.bf16 %v3726_v7, %v3721_v51  ;;  %v3651_v42 = vmax.f32 %v3281_v31, 0.0 }
 0x298   :  { %v3175_v6 = vpop.f32.mrf.mxu1  ;;  %v3730_v8 = vmin.f32 %v3650_v39, 6.0  ;;  %v3077_v7 = vadd.f32 %v8001_v19, %v8024_v63  ;;  %v3083_v19 = vadd.f32 %v8009_v10, %v8024_v63 }
 0x299   :  { %v3655_v26 = vmax.f32 %v3283_v40, 0.0  ;;  %v3285_v17 = vadd.f32 %v3284_v35, %v3172_v22  ;;  %v3176_v34 = vadd.f32 %v3175_v6, %v3063_v12  ;;  %v3288_v2 = vpop.f32.mrf.mxu0  ;;  %4475 = vmatprep.mubr.bf16.mxu1 %v3867_v48  ;;  %v3731_v28 = vmin.f32 %v3651_v42, 6.0 }
 0x29a   :  { %v3177_v53 = vpop.f32.mrf.mxu1  ;;  %4476 = vmatmul.mubr.bf16.gmra.mxu1 %v3866_v20 }
 0x29b   :  { %v3735_v41 = vmin.f32 %v3655_v26, 6.0  ;;  %v3656_v24 = vmax.f32 %v3285_v17, 0.0  ;;  %v3178_v52 = vadd.f32 %v3177_v53, %v3065_v3  ;;  %v3290_v33 = vpop.f32.mrf.mxu0  ;;  %v3289_v1 = vadd.f32 %v3288_v2, %v3176_v34 }
 0x29c   :  { %v3179_v46 = vpop.f32.mrf.mxu1  ;;  %v3085_v34 = vadd.f32 %v8013_v58, %v8032_v32  ;;  %v3089_v58 = vadd.f32 %v8035_v38, %v8032_v32 }
 0x29d   :  { %v3871_v45 = vpack.c.bf16 %v3735_v41, %v3730_v8  ;;  %v3736_v18 = vmin.f32 %v3656_v24, 6.0  ;;  %v3292_v14 = vpop.f32.mrf.mxu0  ;;  %v3291_v23 = vadd.f32 %v3290_v33, %v3178_v52  ;;  %v3180_v15 = vadd.f32 %v3179_v46, %v3067_v27 }
 0x29e   :  { %v3181_v37 = vpop.f32.mrf.mxu1  ;;  %v3660_v47 = vmax.f32 %v3289_v1, 0.0 }
 0x29f   :  { %v3182_v25 = vadd.f32 %v3181_v37, %v3069_v16  ;;  %v3294_v29 = vpop.f32.mrf.mxu0  ;;  %v3872_v56 = vpack.c.bf16 %v3736_v18, %v3731_v28  ;;  %v3293_v5 = vadd.f32 %v3292_v14, %v3180_v15  ;;  %v3661_v60 = vmax.f32 %v3291_v23, 0.0 }
 0x2a0   :  { %v3185_v55 = vpop.f32.mrf.mxu1  ;;  %v3740_v51 = vmin.f32 %v3660_v47, 6.0  ;;  %v3087_v28 = vadd.f32 %v8026_v49, %v8024_v63 }
 0x2a1   :  { %v3295_v62 = vadd.f32 %v3294_v29, %v3182_v25  ;;  %v3186_v4 = vadd.f32 %v3185_v55, %v3073_v57  ;;  %v3298_v50 = vpop.f32.mrf.mxu0  ;;  %4485 = vmatprep.mubr.bf16.mxu1 %v3872_v56  ;;  %v3665_v11 = vmax.f32 %v3293_v5, 0.0  ;;  %v3741_v35 = vmin.f32 %v3661_v60, 6.0 }
 0x2a2   :  { %v3187_v44 = vpop.f32.mrf.mxu1  ;;  %4486 = vmatmul.mubr.bf16.gmra.mxu1 %v3871_v45 }
 0x2a3   :  { %v3666_v30 = vmax.f32 %v3295_v62, 0.0  ;;  %v3299_v31 = vadd.f32 %v3298_v50, %v3186_v4  ;;  %v3188_v43 = vadd.f32 %v3187_v44, %v3075_v0  ;;  %v3300_v21 = vpop.f32.mrf.mxu0  ;;  %v3745_v20 = vmin.f32 %v3665_v11, 6.0 }
 0x2a4   :  { %v3189_v59 = vpop.f32.mrf.mxu1 }
 0x2a5   :  { %v3746_v12 = vmin.f32 %v3666_v30, 6.0  ;;  %v3301_v39 = vadd.f32 %v3300_v21, %v3188_v43  ;;  %v3190_v40 = vadd.f32 %v3189_v59, %v3077_v7  ;;  %v3302_v22 = vpop.f32.mrf.mxu0  ;;  %v3876_v3 = vpack.c.bf16 %v3745_v20, %v3740_v51 }
 0x2a6   :  { %v3191_v6 = vpop.f32.mrf.mxu1  ;;  %v3670_v48 = vmax.f32 %v3299_v31, 0.0 }
 0x2a7   :  { %v3303_v42 = vadd.f32 %v3302_v22, %v3190_v40  ;;  %v3192_v26 = vadd.f32 %v3191_v6, %v3079_v54  ;;  %v3304_v17 = vpop.f32.mrf.mxu0  ;;  %v3877_v53 = vpack.c.bf16 %v3746_v12, %v3741_v35  ;;  %v3671_v61 = vmax.f32 %v3301_v39, 0.0 }
 0x2a8   :  { %v3195_v2 = vpop.f32.mrf.mxu1  ;;  %v3750_v27 = vmin.f32 %v3670_v48, 6.0 }
 0x2a9   :  { %v3675_v8 = vmax.f32 %v3303_v42, 0.0  ;;  %v3305_v41 = vadd.f32 %v3304_v17, %v3192_v26  ;;  %v3196_v24 = vadd.f32 %v3195_v2, %v3083_v19  ;;  %v3308_v52 = vpop.f32.mrf.mxu0  ;;  %4495 = vmatprep.mubr.bf16.mxu1 %v3877_v53  ;;  %v3751_v14 = vmin.f32 %v3671_v61, 6.0 }
 0x2aa   :  { %v3197_v33 = vpop.f32.mrf.mxu1  ;;  %4496 = vmatmul.mubr.bf16.gmra.mxu1 %v3876_v3 }
 0x2ab   :  { %v3755_v1 = vmin.f32 %v3675_v8, 6.0  ;;  %v3676_v46 = vmax.f32 %v3305_v41, 0.0  ;;  %v3198_v10 = vadd.f32 %v3197_v33, %v3085_v34  ;;  %v3310_v16 = vpop.f32.mrf.mxu0  ;;  %v3309_v45 = vadd.f32 %v3308_v52, %v3196_v24 }
 0x2ac   :  { %v3199_v18 = vpop.f32.mrf.mxu1 }
 0x2ad   :  { %v3881_v23 = vpack.c.bf16 %v3755_v1, %v3750_v27  ;;  %v3756_v15 = vmin.f32 %v3676_v46, 6.0  ;;  %v3311_v37 = vadd.f32 %v3310_v16, %v3198_v10  ;;  %v3312_v57 = vpop.f32.mrf.mxu0  ;;  %v3200_v25 = vadd.f32 %v3199_v18, %v3087_v28 }
 0x2ae   :  { %v3201_v29 = vpop.f32.mrf.mxu1  ;;  %v3680_v55 = vmax.f32 %v3309_v45, 0.0 }
 0x2af   :  { %v3202_v56 = vadd.f32 %v3201_v29, %v3089_v58  ;;  %v3314_v47 = vpop.f32.mrf.mxu0  ;;  %v3882_v5 = vpack.c.bf16 %v3756_v15, %v3751_v14  ;;  %v3313_v0 = vadd.f32 %v3312_v57, %v3200_v25  ;;  %v3681_v4 = vmax.f32 %v3311_v37, 0.0 }
 0x2b0   :  { %v6141_v62 = vpop.f32.mrf.mxu1  ;;  %v3760_v44 = vmin.f32 %v3680_v55, 6.0 }
 0x2b1   :  { %v3315_v63 = vadd.f32 %v3314_v47, %v3202_v56  ;;  %v8102_v49 = vpop.f32.mrf.mxu0  ;;  %4505 = vmatprep.mubr.bf16.mxu1 %v3882_v5  ;;  %v3685_v32 = vmax.f32 %v3313_v0, 0.0  ;;  %v3761_v31 = vmin.f32 %v3681_v4, 6.0 }
 0x2b2   :  { %v6142_v38 = vpop.f32.mrf.mxu1  ;;  %4506 = vmatmul.mubr.bf16.gmra.mxu1 %v3881_v23 }
 0x2b3   :  { %v3686_v50 = vmax.f32 %v3315_v63, 0.0  ;;  %v8104_v60 = vadd.f32 %v6142_v38, %v6141_v62  ;;  %v8106_v11 = vpop.f32.mrf.mxu0  ;;  %v3765_v7 = vmin.f32 %v3685_v32, 6.0  ;;  %v8694_v63 = vsub.s32 4, %v8687_v36 }
 0x2b4   :  { %v6144_v30 = vpop.f32.mrf.mxu1 }
 0x2b5   :  { %v3766_v43 = vmin.f32 %v3686_v50, 6.0  ;;  %v3886_v21 = vpack.c.bf16 %v3765_v7, %v3760_v44  ;;  %v8108_v51 = vpop.f32.mrf.mxu0  ;;  %v8167_v32 = vrot.slane %v8019_v13, %v8694_v63 }
 0x2b6   :  { %v6145_v20 = vpop.f32.mrf.mxu1 }
 0x2b7   :  { %v3887_v59 = vpack.c.bf16 %v3766_v43, %v3761_v31  ;;  %v6209_v12 = vpop.f32.mrf.mxu0  ;;  %v3352_v31 = vadd.f32 %v8104_v60, %v8167_v32  ;;  %v6146_v43 = vadd.f32 %v6145_v20, %v6144_v30 }
 0x2b8   :  { %v6147_v54 = vpop.f32.mrf.mxu1 }
 0x2b9   :  { %4515 = vmatprep.mubr.bf16.mxu1 %v3887_v59  ;;  %v8112_v35 = vpop.f32.mrf.mxu0  ;;  %v6207_v59 = vadd.f32 %v8106_v11, %v8102_v49 }
 0x2ba   :  { %v6148_v39 = vpop.f32.mrf.mxu1  ;;  %4516 = vmatmul.mubr.bf16.gmra.mxu1 %v3886_v21 }
 0x2bb   :  { %v8110_v40 = vadd.f32 %v6148_v39, %v6147_v54  ;;  %v6212_v19 = vpop.f32.mrf.mxu0  ;;  %v3449_v54 = vadd.f32 %v6207_v59, %v3352_v31  ;;  %v3355_v39 = vadd.f32 %v6146_v43, %v8167_v32 }
 0x2bc   :  { %v6150_v22 = vpop.f32.mrf.mxu1 }
 0x2bd   :  { %v8118_v17 = vpop.f32.mrf.mxu0  ;;  %v3360_v30 = vadd.f32 %v8110_v40, %v8167_v32 }
 0x2be   :  { %v6151_v3 = vpop.f32.mrf.mxu1 }
 0x2bf   :  { %v8122_v53 = vpop.f32.mrf.mxu0  ;;  %v6152_v20 = vadd.f32 %v6151_v3, %v6150_v22 }
 0x2c0   :  { %v6153_v6 = vpop.f32.mrf.mxu1  ;;  %v6216_v43 = vadd.f32 %v8122_v53, %v8118_v17 }
 0x2c1   :  { %v8128_v24 = vpop.f32.mrf.mxu0 }
 0x2c2   :  { %v6154_v48 = vpop.f32.mrf.mxu1 }
 0x2c3   :  { %v8114_v42 = vadd.f32 %v6154_v48, %v6153_v6  ;;  %v8132_v27 = vpop.f32.mrf.mxu0 }
 0x2c4   :  { %v8116_v26 = vpop.f32.mrf.mxu1 }
 0x2c5   :  { %v8138_v16 = vpop.f32.mrf.mxu0 }
 0x2c6   :  { %v8120_v34 = vpop.f32.mrf.mxu1 }
 0x2c7   :  { %v8142_v45 = vpop.f32.mrf.mxu0 }
 0x2c8   :  { %v6159_v2 = vpop.f32.mrf.mxu1 }
 0x2c9   :  { %v8148_v15 = vpop.f32.mrf.mxu0 }
 0x2ca   :  { %v6160_v61 = vpop.f32.mrf.mxu1 }
 0x2cb   :  { %v8124_v8 = vadd.f32 %v6160_v61, %v6159_v2  ;;  %v8152_v25 = vpop.f32.mrf.mxu0  ;;  %v6210_v2 = vadd.f32 %v6209_v12, %v8108_v51  ;;  %v3363_v51 = vadd.f32 %v6152_v20, %v8167_v32  ;;  %v6984_v20 = vld [vmem:[#allocation7 + $0x64] ss:$8 sps:$4 sm:$0xff]  }
 0x2cc   :  { %v8126_v41 = vpop.f32.mrf.mxu1 }
 0x2cd   :  { %v8158_v5 = vpop.f32.mrf.mxu0  ;;  %v3452_v60 = vadd.f32 %v6210_v2, %v3355_v39  ;;  %v3460_v59 = vadd.f32 %v6216_v43, %v3363_v51  ;;  %v6987_v51 = vld [vmem:[#allocation7 + $0x54] ss:$8 sps:$4 sm:$0xff]   ;;  %v6225_v43 = vadd.f32 %v8152_v25, %v8148_v15 }
 0x2ce   :  { %v8130_v52 = vpop.f32.mrf.mxu1 }
 0x2cf   :  { %v8162_v62 = vpop.f32.mrf.mxu0 }
 0x2d0   :  { %v6165_v33 = vpop.f32.mrf.mxu1  ;;  %v6228_v15 = vadd.f32 %v8162_v62, %v8158_v5 }
 0x2d1   :  { %v8173_v44 = vpop.f32.mrf.mxu0 }
 0x2d2   :  { %v6166_v1 = vpop.f32.mrf.mxu1 }
 0x2d3   :  { %v8134_v46 = vadd.f32 %v6166_v1, %v6165_v33  ;;  %v8181_v36 = vpop.f32.mrf.mxu0 }
 0x2d4   :  { %v8136_v10 = vpop.f32.mrf.mxu1  ;;  %v6231_v62 = vadd.f32 %v8181_v36, %v8173_v44 }
 0x2d5   :  { %v8185_v33 = vpop.f32.mrf.mxu0 }
 0x2d6   :  { %v8140_v28 = vpop.f32.mrf.mxu1 }
 0x2d8   :  { %v6171_v58 = vpop.f32.mrf.mxu1 }
 0x2da   :  { %v6172_v18 = vpop.f32.mrf.mxu1 }
 0x2db   :  { %v8144_v14 = vadd.f32 %v6172_v18, %v6171_v58  ;;  %v6213_v58 = vadd.f32 %v6212_v19, %v8112_v35  ;;  %v6158_v35 = vadd.f32 %v8120_v34, %v8116_v26  ;;  %v6979_v34 = vld [vmem:[#allocation7 + $0x70] ss:$8 sps:$4 sm:$0xff]  }
 0x2dc   :  { %v8146_v23 = vpop.f32.mrf.mxu1 }
 0x2dd   :  { %v3371_v2 = vadd.f32 %v6158_v35, %v8167_v32 }
 0x2de   :  { %v8150_v37 = vpop.f32.mrf.mxu1 }
 0x2e0   :  { %v6177_v57 = vpop.f32.mrf.mxu1 }
 0x2e2   :  { %v6178_v29 = vpop.f32.mrf.mxu1 }
 0x2e3   :  { %v8154_v56 = vadd.f32 %v6178_v29, %v6177_v57  ;;  %v8190_v29 = vpop.f32.mrf.mxu0 }
 0x2e4   :  { %v8156_v47 = vpop.f32.mrf.mxu1 }
 0x2e5   :  { %v8197_v19 = vpop.f32.mrf.mxu0 }
 0x2e6   :  { %v8160_v55 = vpop.f32.mrf.mxu1 }
 0x2e8   :  { %v6183_v0 = vpop.f32.mrf.mxu1 }
 0x2ea   :  { %v6184_v4 = vpop.f32.mrf.mxu1 }
 0x2eb   :  { %v8169_v38 = vadd.f32 %v6184_v4, %v6183_v0  ;;  %v3457_v4 = vadd.f32 %v6213_v58, %v3360_v30 }
 0x2ec   :  { %v8171_v50 = vpop.f32.mrf.mxu1 }
 0x2ee   :  { %v8175_v7 = vpop.f32.mrf.mxu1 }
 0x2f0   :  { %v6269_v21 = vpop.f32.mrf.mxu1 }
 0x2f2   :  { %v6270_v13 = vpop.f32.mrf.mxu1 }
 0x2f3   :  { %v6271_v6 = vadd.f32 %v6270_v13, %v6269_v21  ;;  %v3368_v13 = vadd.f32 %v8114_v42, %v8167_v32 }
 0x2f4   :  { %v6272_v48 = vpop.f32.mrf.mxu1 }
 0x2f5   :  { %v3546_v61 = vadd.f32 %v6271_v6, %v3449_v54 }
 0x2f6   :  { %v6273_v1 = vpop.f32.mrf.mxu1 }
 0x2f7   :  { %v6274_v49 = vadd.f32 %v6273_v1, %v6272_v48  ;;  %v3612_v18 = vmax.f32 %v3546_v61, 0.0  ;;  %v6219_v48 = vadd.f32 %v8132_v27, %v8128_v24  ;;  %v8204_v61 = vpop.f32.mrf.mxu0  ;;  %v6981_v1 = vld [vmem:[#allocation7 + $0x74] ss:$8 sps:$4 sm:$0xff]  }
 0x2f8   :  { %v6275_v11 = vpop.f32.mrf.mxu1  ;;  %4923 = vmatprep.subr.bf16.mxu1 %v6981_v1  ;;  %v3384_v1 = vadd.f32 %v8134_v46, %v8167_v32 }
 0x2f9   :  { %v3549_v57 = vadd.f32 %v6274_v49, %v3452_v60  ;;  %v3692_v40 = vmin.f32 %v3612_v18, 6.0  ;;  %v3465_v60 = vadd.f32 %v6219_v48, %v3368_v13  ;;  %v6222_v49 = vadd.f32 %v8142_v45, %v8138_v16  ;;  %4924 = vmatpush1.bf16.msra.mxu1 %v6979_v34  ;;  %v6982_v18 = vld [vmem:[#allocation7 + $0x60] ss:$8 sps:$4 sm:$0xff]  }
 0x2fa   :  { %v6276_v0 = vpop.f32.mrf.mxu1  ;;  %4925 = vmatprep.subr.bf16.mxu1 %v6984_v20  ;;  %v6988_v48 = vld [vmem:[#allocation7 + $0x40] ss:$8 sps:$4 sm:$0xff]   ;;  %v3481_v46 = vadd.f32 %v6231_v62, %v3384_v1  ;;  %v7003_v62 = vld [vmem:[#allocation7 + $0xf0] ss:$8 sps:$4 sm:$0xff]  }
 0x2fb   :  { %v3617_v12 = vmax.f32 %v3549_v57, 0.0  ;;  %v6277_v63 = vadd.f32 %v6276_v0, %v6275_v11  ;;  %v3468_v57 = vadd.f32 %v6222_v49, %v3371_v2  ;;  %v8209_v0 = vpop.f32.mrf.mxu0 }
 0x2fc   :  { %v6278_v31 = vpop.f32.mrf.mxu1 }
 0x2fd   :  { %v3697_v22 = vmin.f32 %v3617_v12, 6.0  ;;  %v3554_v3 = vadd.f32 %v6277_v63, %v3457_v4  ;;  %v3376_v12 = vadd.f32 %v8124_v8, %v8167_v32  ;;  %v6164_v63 = vadd.f32 %v8130_v52, %v8126_v41  ;;  %4926 = vmatpush1.bf16.msra.mxu1 %v6982_v18  ;;  %v8217_v35 = vpop.f32.mrf.mxu0  ;;  %v6990_v8 = vld [vmem:[#allocation7 + $0x44] ss:$8 sps:$4 sm:$0xff]  }
 0x2fe   :  { %v6279_v21 = vpop.f32.mrf.mxu1  ;;  %4927 = vmatprep.subr.bf16.mxu1 %v6987_v51  ;;  %v6234_v18 = vadd.f32 %v8190_v29, %v8185_v33  ;;  %v6994_v51 = vld [vmem:[#allocation7 + $0x20] ss:$8 sps:$4 sm:$0xff]   ;;  %v6237_v29 = vadd.f32 %v8204_v61, %v8197_v19  ;;  %v6240_v19 = vadd.f32 %v8217_v35, %v8209_v0 }
 0x2ff   :  { %v3853_v54 = vpack.c.bf16 %v3697_v22, %v3692_v40  ;;  %v6280_v39 = vadd.f32 %v6279_v21, %v6278_v31  ;;  %v3622_v17 = vmax.f32 %v3554_v3, 0.0  ;;  %v6985_v3 = vld [vmem:[#allocation7 + $0x50] ss:$8 sps:$4 sm:$0xff]   ;;  %v3379_v41 = vadd.f32 %v6164_v63, %v8167_v32 }
 0x300   :  { %v6281_v6 = vpop.f32.mrf.mxu1 }
 0x301   :  { %v3557_v53 = vadd.f32 %v6280_v39, %v3460_v59  ;;  %4559 = vmatmul.mubr.bf16.vlgmr.msra.gmra.mxu0 %v3853_v54  ;;  %v3702_v27 = vmin.f32 %v3622_v17, 6.0  ;;  %v3473_v59 = vadd.f32 %v6225_v43, %v3376_v12  ;;  %4928 = vmatpush1.bf16.msra.mxu1 %v6985_v3  ;;  %v6170_v17 = vadd.f32 %v8140_v28, %v8136_v10  ;;  %v6991_v10 = vld [vmem:[#allocation7 + $0x30] ss:$8 sps:$4 sm:$0xff]  }
 0x302   :  { %v6282_v26 = vpop.f32.mrf.mxu1  ;;  %4568 = vmatprep.mubr.bf16.mxu0 %v8693_v9  ;;  %4929 = vmatprep.subr.bf16.mxu1 %v6990_v8  ;;  %v3476_v34 = vadd.f32 %v6228_v15, %v3379_v41  ;;  %v6176_v43 = vadd.f32 %v8150_v37, %v8146_v23  ;;  %v6997_v8 = vld [vmem:[#allocation7 + $0x10] ss:$8 sps:$4 sm:$0xff]  }
 0x303   :  { %v3627_v42 = vmax.f32 %v3557_v53, 0.0  ;;  %v6283_v30 = vadd.f32 %v6282_v26, %v6281_v6  ;;  %v8225_v53 = vpop.f32.mrf.mxu0  ;;  %v6993_v26 = vld [vmem:[#allocation7 + $0x34] ss:$8 sps:$4 sm:$0xff]   ;;  %v3387_v28 = vadd.f32 %v6170_v17, %v8167_v32 }
 0x304   :  { %v6284_v24 = vpop.f32.mrf.mxu1  ;;  %v3395_v23 = vadd.f32 %v6176_v43, %v8167_v32  ;;  %v7009_v43 = vld [vmem:[#allocation7 + $0xd0] ss:$8 sps:$4 sm:$0xff]  }
 0x305   :  { %v3707_v11 = vmin.f32 %v3627_v42, 6.0  ;;  %v3562_v58 = vadd.f32 %v6283_v30, %v3465_v60  ;;  %4930 = vmatpush1.bf16.msra.mxu1 %v6988_v48  ;;  %v6242_v49 = vpop.f32.mrf.mxu0  ;;  %v3484_v12 = vadd.f32 %v6234_v18, %v3387_v28 }
 0x306   :  { %v6285_v4 = vpop.f32.mrf.mxu1  ;;  %4931 = vmatprep.subr.bf16.mxu1 %v6993_v26  ;;  %v3492_v26 = vadd.f32 %v6240_v19, %v3395_v23  ;;  %v6243_v0 = vadd.f32 %v6242_v49, %v8225_v53 }
 0x307   :  { %v3858_v16 = vpack.c.bf16 %v3707_v11, %v3702_v27  ;;  %v6286_v45 = vadd.f32 %v6285_v4, %v6284_v24  ;;  %v3632_v40 = vmax.f32 %v3562_v58, 0.0  ;;  %v6996_v27 = vld [vmem:[#allocation7 + $0x24] ss:$8 sps:$4 sm:$0xff]   ;;  %v6244_v63 = vpop.f32.mrf.mxu0 }
 0x308   :  { %v6287_v31 = vpop.f32.mrf.mxu1 }
 0x309   :  { %v3565_v22 = vadd.f32 %v6286_v45, %v3468_v57  ;;  %4569 = vmatmul.mubr.bf16.gmra.mxu0 %v3858_v16  ;;  %v3712_v25 = vmin.f32 %v3632_v40, 6.0  ;;  %4932 = vmatpush1.bf16.msra.mxu1 %v6991_v10  ;;  %v6999_v45 = vld [vmem:[#allocation7 + $0x14] ss:$8 sps:$4 sm:$0xff]  }
 0x30a   :  { %v6288_v21 = vpop.f32.mrf.mxu1  ;;  %4578 = vmatprep.mubr.bf16.mxu0 %v8693_v9  ;;  %4933 = vmatprep.subr.bf16.mxu1 %v6996_v27 }
 0x30b   :  { %v3637_v52 = vmax.f32 %v3565_v22, 0.0  ;;  %v6289_v13 = vadd.f32 %v6288_v21, %v6287_v31  ;;  %v3392_v31 = vadd.f32 %v8144_v14, %v8167_v32  ;;  %v7002_v14 = vld [vmem:[#allocation7 + $0x4] ss:$8 sps:$4 sm:$0xff]  }
 0x30c   :  { %v6290_v54 = vpop.f32.mrf.mxu1 }
 0x30d   :  { %v3717_v39 = vmin.f32 %v3637_v52, 6.0  ;;  %v3570_v6 = vadd.f32 %v6289_v13, %v3473_v59  ;;  %4934 = vmatpush1.bf16.msra.mxu1 %v6994_v51  ;;  %v6245_v59 = vpop.f32.mrf.mxu0  ;;  %v3489_v52 = vadd.f32 %v6237_v29, %v3392_v31 }
 0x30e   :  { %v6291_v2 = vpop.f32.mrf.mxu1  ;;  %4935 = vmatprep.subr.bf16.mxu1 %v6999_v45 }
 0x30f   :  { %v3863_v60 = vpack.c.bf16 %v3717_v39, %v3712_v25  ;;  %v6292_v42 = vadd.f32 %v6291_v2, %v6290_v54  ;;  %v3642_v30 = vmax.f32 %v3570_v6, 0.0  ;;  %v7000_v39 = vld [vmem:[#allocation7] ss:$8 sps:$4 sm:$0xff]   ;;  %v6182_v6 = vadd.f32 %v8160_v55, %v8156_v47  ;;  %v6247_v48 = vpop.f32.mrf.mxu0  ;;  %v7005_v2 = vld [vmem:[#allocation7 + $0xf4] ss:$8 sps:$4 sm:$0xff]  }
 0x310   :  { %v6293_v5 = vpop.f32.mrf.mxu1 }
 0x311   :  { %v3573_v20 = vadd.f32 %v6292_v42, %v3476_v34  ;;  %4579 = vmatmul.mubr.bf16.gmra.mxu0 %v3863_v60  ;;  %v3722_v36 = vmin.f32 %v3642_v30, 6.0  ;;  %4936 = vmatpush1.bf16.msra.mxu1 %v6997_v8  ;;  %v3400_v34 = vadd.f32 %v8154_v56, %v8167_v32  ;;  %v3403_v47 = vadd.f32 %v6182_v6, %v8167_v32  ;;  %v6248_v55 = vpop.f32.mrf.mxu0  ;;  %v7015_v6 = vld [vmem:[#allocation7 + $0xb0] ss:$8 sps:$4 sm:$0xff]  }
 0x312   :  { %v6294_v24 = vpop.f32.mrf.mxu1  ;;  %4588 = vmatprep.mubr.bf16.mxu0 %v8693_v9  ;;  %4937 = vmatprep.subr.bf16.mxu1 %v7002_v14  ;;  %v7012_v14 = vld [vmem:[#allocation7 + $0xc0] ss:$8 sps:$4 sm:$0xff]  }
 0x313   :  { %v3647_v11 = vmax.f32 %v3573_v20, 0.0  ;;  %v6295_v58 = vadd.f32 %v6294_v24, %v6293_v5  ;;  %v7008_v20 = vld [vmem:[#allocation7 + $0xe4] ss:$8 sps:$4 sm:$0xff]   ;;  %v3497_v10 = vadd.f32 %v6243_v0, %v3400_v34  ;;  %v6246_v24 = vadd.f32 %v6245_v59, %v6244_v63  ;;  %v6250_v18 = vpop.f32.mrf.mxu0  ;;  %v7023_v34 = vld [vmem:[#allocation7 + $0x94] ss:$8 sps:$4 sm:$0xff]  }
 0x314   :  { %v6296_v44 = vpop.f32.mrf.mxu1 }
 0x315   :  { %v3727_v57 = vmin.f32 %v3647_v11, 6.0  ;;  %v3578_v4 = vadd.f32 %v6295_v58, %v3481_v46  ;;  %4938 = vmatpush1.bf16.msra.mxu1 %v7000_v39  ;;  %v7006_v11 = vld [vmem:[#allocation7 + $0xe0] ss:$8 sps:$4 sm:$0xff]   ;;  %v3500_v58 = vadd.f32 %v6246_v24, %v3403_v47  ;;  %v7017_v39 = vld [vmem:[#allocation7 + $0xb4] ss:$8 sps:$4 sm:$0xff]  }
 0x316   :  { %v6297_v16 = vpop.f32.mrf.mxu1  ;;  %4939 = vmatprep.subr.bf16.mxu1 %v7005_v2  ;;  %v7018_v2 = vld [vmem:[#allocation7 + $0xa0] ss:$8 sps:$4 sm:$0xff]  }
 0x317   :  { %v3868_v40 = vpack.c.bf16 %v3727_v57, %v3722_v36  ;;  %v6298_v22 = vadd.f32 %v6297_v16, %v6296_v44  ;;  %v3652_v3 = vmax.f32 %v3578_v4, 0.0  ;;  %v7011_v36 = vld [vmem:[#allocation7 + $0xd4] ss:$8 sps:$4 sm:$0xff]   ;;  %v3408_v57 = vadd.f32 %v8169_v38, %v8167_v32 }
 0x318   :  { %v6299_v33 = vpop.f32.mrf.mxu1  ;;  %v6188_v4 = vadd.f32 %v8175_v7, %v8171_v50  ;;  %v6249_v16 = vadd.f32 %v6248_v55, %v6247_v48 }
 0x319   :  { %v3581_v21 = vadd.f32 %v6298_v22, %v3484_v12  ;;  %4589 = vmatmul.mubr.bf16.gmra.mxu0 %v3868_v40  ;;  %v3732_v61 = vmin.f32 %v3652_v3, 6.0  ;;  %4940 = vmatpush2.bf16.msra.mxu1 %v7003_v62  ;;  %v6251_v40 = vpop.f32.mrf.mxu0 }
 0x31a   :  { %v6300_v41 = vpop.f32.mrf.mxu1  ;;  %4598 = vmatprep.mubr.bf16.mxu0 %v8693_v9  ;;  %4941 = vmatprep.subr.bf16.mxu1 %v7008_v20  ;;  %v3505_v29 = vadd.f32 %v6249_v16, %v3408_v57  ;;  %v3411_v38 = vadd.f32 %v6188_v4, %v8167_v32 }
 0x31b   :  { %v3657_v37 = vmax.f32 %v3581_v21, 0.0  ;;  %v6301_v13 = vadd.f32 %v6300_v41, %v6299_v33  ;;  %v7014_v33 = vld [vmem:[#allocation7 + $0xc4] ss:$8 sps:$4 sm:$0xff]   ;;  %v6252_v21 = vadd.f32 %v6251_v40, %v6250_v18  ;;  %v8259_v48 = vpop.f32.mrf.mxu0  ;;  %v7027_v18 = vld [vmem:[#allocation9 + $0x78] sm:$0xff]  }
 0x31c   :  { %v6302_v54 = vpop.f32.mrf.mxu1  ;;  %6317 = vmatprep.subr.bf16.mxu0 %v7027_v18 }
 0x31d   :  { %v3737_v15 = vmin.f32 %v3657_v37, 6.0  ;;  %v3586_v25 = vadd.f32 %v6301_v13, %v3489_v52  ;;  %4942 = vmatpush2.bf16.msra.mxu1 %v7006_v11  ;;  %v3508_v23 = vadd.f32 %v6252_v21, %v3411_v38 }
 0x31e   :  { %v6303_v17 = vpop.f32.mrf.mxu1  ;;  %4943 = vmatprep.subr.bf16.mxu1 %v7011_v36  ;;  %v7029_v36 = vld [vmem:[#allocation9 + $0x70] sm:$0xff]  }
 0x31f   :  { %v3873_v1 = vpack.c.bf16 %v3737_v15, %v3732_v61  ;;  %v6304_v60 = vadd.f32 %v6303_v17, %v6302_v54  ;;  %v3662_v35 = vmax.f32 %v3586_v25, 0.0  ;;  %v7020_v17 = vld [vmem:[#allocation7 + $0xa4] ss:$8 sps:$4 sm:$0xff]  }
 0x320   :  { %v6305_v42 = vpop.f32.mrf.mxu1 }
 0x321   :  { %v3589_v5 = vadd.f32 %v6304_v60, %v3492_v26  ;;  %4599 = vmatmul.mubr.bf16.gmra.mxu0 %v3873_v1  ;;  %v3742_v46 = vmin.f32 %v3662_v35, 6.0  ;;  %4944 = vmatpush2.bf16.msra.mxu1 %v7009_v43  ;;  %v8261_v26 = vpop.f32.mrf.mxu0  ;;  %v7021_v1 = vld [vmem:[#allocation7 + $0x90] ss:$8 sps:$4 sm:$0xff]   ;;  %v7026_v60 = vld [vmem:[#allocation7 + $0x84] ss:$8 sps:$4 sm:$0xff]  }
 0x322   :  { %v6306_v30 = vpop.f32.mrf.mxu1  ;;  %4608 = vmatprep.mubr.bf16.mxu0 %v8693_v9  ;;  %4945 = vmatprep.subr.bf16.mxu1 %v7014_v33  ;;  %v7035_v33 = vld [vmem:[#allocation9 + $0x58] sm:$0xff]  }
 0x323   :  { %v3667_v56 = vmax.f32 %v3589_v5, 0.0  ;;  %v6307_v28 = vadd.f32 %v6306_v30, %v6305_v42  ;;  %v7024_v42 = vld [vmem:[#allocation7 + $0x80] ss:$8 sps:$4 sm:$0xff]  }
 0x324   :  { %v6308_v27 = vpop.f32.mrf.mxu1 }
 0x325   :  { %v3747_v53 = vmin.f32 %v3667_v56, 6.0  ;;  %v3594_v49 = vadd.f32 %v6307_v28, %v3497_v10  ;;  %4946 = vmatpush2.bf16.msra.mxu1 %v7012_v14 }
 0x326   :  { %v6309_v44 = vpop.f32.mrf.mxu1  ;;  %4947 = vmatprep.subr.bf16.mxu1 %v7017_v39 }
 0x327   :  { %v3878_v51 = vpack.c.bf16 %v3747_v53, %v3742_v46  ;;  %v6310_v12 = vadd.f32 %v6309_v44, %v6308_v27  ;;  %v3672_v45 = vmax.f32 %v3594_v49, 0.0  ;;  %v7028_v44 = vld [vmem:[#allocation9 + $0x38] sm:$0xff]  }
 0x328   :  { %v6311_v63 = vpop.f32.mrf.mxu1  ;;  %6318 = vmatpush3.bf16.msra.mxu0 %v7028_v44 }
 0x329   :  { %v3597_v31 = vadd.f32 %v6310_v12, %v3500_v58  ;;  %4609 = vmatmul.mubr.bf16.gmra.mxu0 %v3878_v51  ;;  %v3752_v8 = vmin.f32 %v3672_v45, 6.0  ;;  %4948 = vmatpush2.bf16.msra.mxu1 %v7015_v6  ;;  %v7030_v51 = vld [vmem:[#allocation9 + $0x30] sm:$0xff]   ;;  %v7031_v12 = vld [vmem:[#allocation9 + $0x68] sm:$0xff]   ;;  %v3848_v6 = vld [vmem:[%s8629_s6] sm:$0x3] }
 0x32a   :  { %v6312_v22 = vpop.f32.mrf.mxu1  ;;  %4618 = vmatprep.mubr.bf16.mxu0 %v8693_v9  ;;  %4949 = vmatprep.subr.bf16.mxu1 %v7020_v17  ;;  %v7032_v45 = vld [vmem:[#allocation9 + $0x28] sm:$0xff]  }
 0x32b   :  { %v3677_v3 = vmax.f32 %v3597_v31, 0.0  ;;  %v6313_v50 = vadd.f32 %v6312_v22, %v6311_v63  ;;  %6319 = vmatprep.subr.bf16.mxu0 %v7029_v36  ;;  %v7033_v31 = vld [vmem:[#allocation9 + $0x60] sm:$0xff]  }
 0x32c   :  { %v6314_v7 = vpop.f32.mrf.mxu1  ;;  %6320 = vmatpush3.bf16.msra.mxu0 %v7030_v51  ;;  %v7034_v22 = vld [vmem:[#allocation9 + $0x20] sm:$0xff]  }
 0x32d   :  { %v3757_v59 = vmin.f32 %v3677_v3, 6.0  ;;  %v3602_v41 = vadd.f32 %v6313_v50, %v3505_v29  ;;  %4950 = vmatpush2.bf16.msra.mxu1 %v7018_v2  ;;  %6321 = vmatprep.subr.bf16.mxu0 %v7031_v12  ;;  %v7036_v3 = vld [vmem:[#allocation9 + $0x18] sm:$0xff]   ;;  %v7037_v50 = vld [vmem:[#allocation9 + $0x50] sm:$0xff]  }
 0x32e   :  { %v6315_v52 = vpop.f32.mrf.mxu1  ;;  %4951 = vmatprep.subr.bf16.mxu1 %v7023_v34  ;;  %v8696_v34 = vld [vmem:[#allocation15_spill] sm:$0xff] }
 0x32f   :  { %v3883_v37 = vpack.c.bf16 %v3757_v59, %v3752_v8  ;;  %v6316_v13 = vadd.f32 %v6315_v52, %v6314_v7  ;;  %v3682_v54 = vmax.f32 %v3602_v41, 0.0  ;;  %v7038_v8 = vld [vmem:[#allocation9 + $0x10] sm:$0xff]  }
 0x330   :  { %6322 = vmatpush3.bf16.msra.mxu0 %v7032_v45 }
 0x331   :  { %v3605_v19 = vadd.f32 %v6316_v13, %v3508_v23  ;;  %4619 = vmatmul.mubr.bf16.gmra.mxu0 %v3883_v37  ;;  %v3762_v61 = vmin.f32 %v3682_v54, 6.0  ;;  %4952 = vmatpush2.bf16.msra.mxu1 %v7021_v1  ;;  %v8355_v1 = vrot.slane %v3848_v6, %v8696_v34 }
 0x332   :  { %4628 = vmatprep.mubr.bf16.mxu0 %v8693_v9  ;;  %v8263_v9 = vpop.f32.mrf.mxu0  ;;  %4953 = vmatprep.subr.bf16.mxu1 %v7026_v60  ;;  %v8697_v60 = vld [vmem:[#allocation14_spill] sm:$0xff] }
 0x333   :  { %v3687_v32 = vmax.f32 %v3605_v19, 0.0  ;;  %6323 = vmatprep.subr.bf16.mxu0 %v7033_v31  ;;  %v4337_v36 = vadd.f32 %v8261_v26, %v8355_v1 }
 0x334   :  { %v8265_v0 = vpop.f32.mrf.mxu0  ;;  %6324 = vmatpush3.bf16.msra.mxu0 %v7034_v22 }
 0x335   :  { %v3767_v15 = vmin.f32 %v3687_v32, 6.0  ;;  %4954 = vmatpush2.bf16.msra.mxu1 %v7024_v42  ;;  %6325 = vmatprep.subr.bf16.mxu0 %v7035_v33  ;;  %v8358_v42 = vrot.slane %v3848_v6, %v8697_v60 }
 0x336   :  { %v8267_v35 = vpop.f32.mrf.mxu0 }
 0x337   :  { %v3888_v25 = vpack.c.bf16 %v3767_v15, %v3762_v61  ;;  %v4335_v51 = vadd.f32 %v8259_v48, %v8358_v42  ;;  %v4339_v45 = vadd.f32 %v8263_v9, %v8358_v42 }
 0x338   :  { %v8269_v5 = vpop.f32.mrf.mxu0  ;;  %6326 = vmatpush3.bf16.msra.mxu0 %v7036_v3 }
 0x339   :  { %4629 = vmatmul.mubr.bf16.gmra.mxu0 %v3888_v25  ;;  %6327 = vmatprep.subr.bf16.mxu0 %v7037_v50  ;;  %v4341_v50 = vadd.f32 %v8265_v0, %v8355_v1  ;;  %v4345_v0 = vadd.f32 %v8267_v35, %v8358_v42 }
 0x33a   :  { %v8271_v62 = vpop.f32.mrf.mxu0 }
 0x33c   :  { %v8273_v47 = vpop.f32.mrf.mxu0  ;;  %6328 = vmatpush3.bf16.msra.mxu0 %v7038_v8 }
 0x33e   :  { %v8275_v55 = vpop.f32.mrf.mxu0 }
 0x340   :  { %v8277_v30 = vpop.f32.mrf.mxu0 }
 0x342   :  { %v8279_v20 = vpop.f32.mrf.mxu0  ;;  %v8291_v46 = vpop.f32.mrf.mxu1 }
 0x343   :  { %v4448_v22 = vadd.f32 %v8291_v46, %v4335_v51  ;;  %v4347_v46 = vadd.f32 %v8269_v5, %v8355_v1 }
 0x344   :  { %v8281_v10 = vpop.f32.mrf.mxu0  ;;  %v4449_v49 = vpop.f32.mrf.mxu1 }
 0x345   :  { %v4450_v31 = vadd.f32 %v4449_v49, %v4337_v36 }
 0x346   :  { %v8283_v56 = vpop.f32.mrf.mxu0  ;;  %v8297_v58 = vpop.f32.mrf.mxu1 }
 0x347   :  { %v4452_v8 = vadd.f32 %v8297_v58, %v4339_v45  ;;  %v4351_v45 = vadd.f32 %v8273_v47, %v8355_v1 }
 0x348   :  { %v8285_v28 = vpop.f32.mrf.mxu0  ;;  %v8301_v4 = vpop.f32.mrf.mxu1 }
 0x349   :  { %v4454_v48 = vadd.f32 %v8301_v4, %v4341_v50 }
 0x34a   :  { %v8287_v24 = vpop.f32.mrf.mxu0  ;;  %v8305_v16 = vpop.f32.mrf.mxu1 }
 0x34c   :  { %v8289_v27 = vpop.f32.mrf.mxu0  ;;  %v8309_v40 = vpop.f32.mrf.mxu1 }
 0x34d   :  { %v4460_v4 = vadd.f32 %v8309_v40, %v4347_v46 }
 0x34e   :  { %v8293_v53 = vpop.f32.mrf.mxu0  ;;  %v8313_v38 = vpop.f32.mrf.mxu1 }
 0x350   :  { %v8295_v11 = vpop.f32.mrf.mxu0  ;;  %v8317_v21 = vpop.f32.mrf.mxu1 }
 0x351   :  { %v4464_v40 = vadd.f32 %v8317_v21, %v4351_v45  ;;  %v4359_v21 = vadd.f32 %v8279_v20, %v8358_v42 }
 0x352   :  { %v8299_v57 = vpop.f32.mrf.mxu0  ;;  %v8321_v41 = vpop.f32.mrf.mxu1 }
 0x354   :  { %v8303_v63 = vpop.f32.mrf.mxu0  ;;  %v8325_v52 = vpop.f32.mrf.mxu1 }
 0x356   :  { %v8307_v43 = vpop.f32.mrf.mxu0  ;;  %v8329_v37 = vpop.f32.mrf.mxu1 }
 0x358   :  { %v8311_v29 = vpop.f32.mrf.mxu0  ;;  %v8333_v54 = vpop.f32.mrf.mxu1 }
 0x35a   :  { %v8315_v7 = vpop.f32.mrf.mxu0  ;;  %v8337_v32 = vpop.f32.mrf.mxu1 }
 0x35c   :  { %v8319_v59 = vpop.f32.mrf.mxu0  ;;  %v8341_v15 = vpop.f32.mrf.mxu1 }
 0x35e   :  { %v8323_v14 = vpop.f32.mrf.mxu0  ;;  %v8345_v39 = vpop.f32.mrf.mxu1 }
 0x360   :  { %v8327_v23 = vpop.f32.mrf.mxu0  ;;  %v8352_v2 = vpop.f32.mrf.mxu1 }
 0x362   :  { %v8331_v13 = vpop.f32.mrf.mxu0  ;;  %v8362_v44 = vpop.f32.mrf.mxu1 }
 0x364   :  { %v8335_v19 = vpop.f32.mrf.mxu0  ;;  %v8371_v33 = vpop.f32.mrf.mxu1 }
 0x366   :  { %v8339_v61 = vpop.f32.mrf.mxu0 }
 0x368   :  { %v8343_v25 = vpop.f32.mrf.mxu0 }
 0x36a   :  { %v8350_v17 = vpop.f32.mrf.mxu0 }
 0x36b   :  { %8695 = vst [vmem:[#allocation22_spill] sm:$0xff] %v8350_v17 }
 0x36c   :  { %v8360_v18 = vpop.f32.mrf.mxu0 }
 0x36d   :  { %8698 = vst [vmem:[#allocation23_spill] sm:$0xff] %v8360_v18  ;;  %v8377_v18 = vpop.f32.mrf.mxu1 }
 0x36f   :  { %v8389_v5 = vpop.f32.mrf.mxu1 }
 0x371   :  { %v8393_v46 = vpop.f32.mrf.mxu1 }
 0x373   :  { %v8405_v45 = vpop.f32.mrf.mxu1 }
 0x3c1   :  { %v4560_v12 = vpop.f32.mrf.mxu0 }
 0x3c2   :  { %v4561_v26 = vadd.f32 %v4560_v12, %v4448_v22  ;;  %v4349_v12 = vadd.f32 %v8271_v62, %v8358_v42 }
 0x3c3   :  { %v4562_v3 = vpop.f32.mrf.mxu0 }
 0x3c4   :  { %v4563_v6 = vadd.f32 %v4562_v3, %v4450_v31  ;;  %v4639_v17 = vmax.f32 %v4561_v26, 0.0  ;;  %v4458_v31 = vadd.f32 %v8305_v16, %v4345_v0  ;;  %v4462_v3 = vadd.f32 %v8313_v38, %v4349_v12 }
 0x3c5   :  { %v4564_v60 = vpop.f32.mrf.mxu0 }
 0x3c6   :  { %v4565_v34 = vadd.f32 %v4564_v60, %v4452_v8  ;;  %v4640_v49 = vmax.f32 %v4563_v6, 0.0  ;;  %v4671_v6 = vmin.f32 %v4639_v17, 6.0  ;;  %v4355_v17 = vadd.f32 %v8275_v55, %v8358_v42 }
 0x3c7   :  { %v4566_v9 = vpop.f32.mrf.mxu0  ;;  %v4472_v55 = vadd.f32 %v8329_v37, %v4359_v21 }
 0x3c8   :  { %v4641_v36 = vmax.f32 %v4565_v34, 0.0  ;;  %v4567_v51 = vadd.f32 %v4566_v9, %v4454_v48  ;;  %v4672_v35 = vmin.f32 %v4640_v49, 6.0 }
 0x3c9   :  { %v4570_v58 = vpop.f32.mrf.mxu0 }
 0x3ca   :  { %v4642_v60 = vmax.f32 %v4567_v51, 0.0  ;;  %v4673_v34 = vmin.f32 %v4641_v36, 6.0  ;;  %v4571_v26 = vadd.f32 %v4570_v58, %v4458_v31  ;;  %v4357_v36 = vadd.f32 %v8277_v30, %v8355_v1 }
 0x3cb   :  { %v4572_v22 = vpop.f32.mrf.mxu0  ;;  %v4468_v30 = vadd.f32 %v8321_v41, %v4355_v17 }
 0x3cc   :  { %v4674_v50 = vmin.f32 %v4642_v60, 6.0  ;;  %v4573_v8 = vadd.f32 %v4572_v22, %v4460_v4  ;;  %v4736_v47 = vpack.c.bf16 %v4673_v34, %v4671_v6  ;;  %v4643_v49 = vmax.f32 %v4571_v26, 0.0 }
 0x3cd   :  { %v4574_v62 = vpop.f32.mrf.mxu0  ;;  %v4470_v12 = vadd.f32 %v8325_v52, %v4357_v36  ;;  %v4361_v60 = vadd.f32 %v8281_v10, %v8355_v1 }
 0x3ce   :  { %v4737_v48 = vpack.c.bf16 %v4674_v50, %v4672_v35  ;;  %v4575_v9 = vadd.f32 %v4574_v62, %v4462_v3  ;;  %v4644_v51 = vmax.f32 %v4573_v8, 0.0  ;;  %v4675_v50 = vmin.f32 %v4643_v49, 6.0  ;;  %v8409_v62 = vpop.f32.mrf.mxu1 }
 0x3cf   :  { %v4576_v16 = vpop.f32.mrf.mxu0  ;;  %v4474_v52 = vadd.f32 %v8333_v54, %v4361_v60  ;;  %v4369_v54 = vadd.f32 %v8287_v24, %v8358_v42 }
 0x3d0   :  { %v4645_v0 = vmax.f32 %v4575_v9, 0.0  ;;  %v4577_v38 = vadd.f32 %v4576_v16, %v4464_v40  ;;  %4955 = vmatprep.mubr.bf16.mxu1 %v4737_v48  ;;  %v4676_v22 = vmin.f32 %v4644_v51, 6.0  ;;  %v4367_v40 = vadd.f32 %v8285_v28, %v8355_v1  ;;  %v8421_v17 = vpop.f32.mrf.mxu1 }
 0x3d1   :  { %v4580_v58 = vpop.f32.mrf.mxu0  ;;  %4956 = vmatmul.mubr.bf16.vlgmr.msra.gmra.mxu1 %v4736_v47  ;;  %v4365_v47 = vadd.f32 %v8283_v56, %v8358_v42  ;;  %v4482_v56 = vadd.f32 %v8345_v39, %v4369_v54 }
 0x3d2   :  { %v4646_v4 = vmax.f32 %v4577_v38, 0.0  ;;  %v4677_v31 = vmin.f32 %v4645_v0, 6.0  ;;  %v4581_v8 = vadd.f32 %v4580_v58, %v4468_v30  ;;  %v4480_v51 = vadd.f32 %v8341_v15, %v4367_v40 }
 0x3d3   :  { %v4582_v34 = vpop.f32.mrf.mxu0  ;;  %v4371_v38 = vadd.f32 %v8289_v27, %v8355_v1  ;;  %v4478_v28 = vadd.f32 %v8337_v32, %v4365_v47 }
 0x3d4   :  { %v4678_v3 = vmin.f32 %v4646_v4, 6.0  ;;  %v4583_v35 = vadd.f32 %v4582_v34, %v4470_v12  ;;  %v4738_v10 = vpack.c.bf16 %v4677_v31, %v4675_v50  ;;  %v4647_v16 = vmax.f32 %v4581_v8, 0.0 }
 0x3d5   :  { %v4584_v20 = vpop.f32.mrf.mxu0  ;;  %v4484_v15 = vadd.f32 %v8352_v2, %v4371_v38  ;;  %v4375_v50 = vadd.f32 %v8293_v53, %v8358_v42  ;;  %v4379_v2 = vadd.f32 %v8299_v57, %v8358_v42 }
 0x3d6   :  { %v4739_v6 = vpack.c.bf16 %v4678_v3, %v4676_v22  ;;  %v4585_v26 = vadd.f32 %v4584_v20, %v4472_v55  ;;  %v4648_v48 = vmax.f32 %v4583_v35, 0.0  ;;  %v4679_v60 = vmin.f32 %v4647_v16, 6.0  ;;  %v8425_v55 = vpop.f32.mrf.mxu1 }
 0x3d7   :  { %v4586_v41 = vpop.f32.mrf.mxu0  ;;  %v4377_v22 = vadd.f32 %v8295_v11, %v8355_v1  ;;  %v4488_v11 = vadd.f32 %v8362_v44, %v4375_v50  ;;  %v4387_v44 = vadd.f32 %v8311_v29, %v8355_v1 }
 0x3d8   :  { %v4649_v9 = vmax.f32 %v4585_v26, 0.0  ;;  %v4587_v37 = vadd.f32 %v4586_v41, %v4474_v52  ;;  %4965 = vmatprep.mubr.bf16.mxu1 %v4739_v6  ;;  %v4680_v21 = vmin.f32 %v4648_v48, 6.0  ;;  %v4381_v26 = vadd.f32 %v8303_v63, %v8355_v1 }
 0x3d9   :  { %v4590_v36 = vpop.f32.mrf.mxu0  ;;  %4966 = vmatmul.mubr.bf16.gmra.mxu1 %v4738_v10  ;;  %v4490_v52 = vadd.f32 %v8371_v33, %v4377_v22  ;;  %v4509_v10 = vpop.f32.mrf.mxu1  ;;  %v4492_v48 = vadd.f32 %v8377_v18, %v4379_v2  ;;  %v4385_v18 = vadd.f32 %v8307_v43, %v8358_v42 }
 0x3da   :  { %v4650_v0 = vmax.f32 %v4587_v37, 0.0  ;;  %v4681_v49 = vmin.f32 %v4649_v9, 6.0  ;;  %v4591_v30 = vadd.f32 %v4590_v36, %v4478_v28  ;;  %v4494_v57 = vadd.f32 %v8389_v5, %v4381_v26 }
 0x3db   :  { %v4592_v58 = vpop.f32.mrf.mxu0  ;;  %v4389_v5 = vadd.f32 %v8315_v7, %v8358_v42  ;;  %v4498_v29 = vadd.f32 %v8393_v46, %v4385_v18  ;;  %v4397_v46 = vadd.f32 %v8327_v23, %v8355_v1 }
 0x3dc   :  { %v4682_v12 = vmin.f32 %v4650_v0, 6.0  ;;  %v4593_v4 = vadd.f32 %v4592_v58, %v4480_v51  ;;  %v4740_v27 = vpack.c.bf16 %v4681_v49, %v4679_v60  ;;  %v4651_v8 = vmax.f32 %v4591_v30, 0.0  ;;  %v4511_v51 = vpop.f32.mrf.mxu1 }
 0x3dd   :  { %v4594_v24 = vpop.f32.mrf.mxu0 }
 0x3de   :  { %v4741_v31 = vpack.c.bf16 %v4682_v12, %v4680_v21  ;;  %v4595_v34 = vadd.f32 %v4594_v24, %v4482_v56  ;;  %v4652_v3 = vmax.f32 %v4593_v4, 0.0  ;;  %v4683_v47 = vmin.f32 %v4651_v8, 6.0  ;;  %v4513_v60 = vpop.f32.mrf.mxu1 }
 0x3df   :  { %v4596_v32 = vpop.f32.mrf.mxu0  ;;  %v4500_v21 = vadd.f32 %v8405_v45, %v4387_v44  ;;  %v4391_v4 = vadd.f32 %v8319_v59, %v8355_v1 }
 0x3e0   :  { %v4653_v35 = vmax.f32 %v4595_v34, 0.0  ;;  %v4597_v39 = vadd.f32 %v4596_v32, %v4484_v15  ;;  %4975 = vmatprep.mubr.bf16.mxu1 %v4741_v31  ;;  %v4684_v53 = vmin.f32 %v4652_v3, 6.0  ;;  %v4502_v15 = vadd.f32 %v8409_v62, %v4389_v5  ;;  %v8700_v5 = vld [vmem:[#allocation23_spill] sm:$0xff] }
 0x3e1   :  { %v4600_v20 = vpop.f32.mrf.mxu0  ;;  %4976 = vmatmul.mubr.bf16.gmra.mxu1 %v4740_v27  ;;  %v4504_v7 = vadd.f32 %v8421_v17, %v4391_v4  ;;  %v4395_v62 = vadd.f32 %v8323_v14, %v8358_v42  ;;  %v4399_v17 = vadd.f32 %v8331_v13, %v8358_v42 }
 0x3e2   :  { %v4654_v6 = vmax.f32 %v4597_v39, 0.0  ;;  %v4685_v41 = vmin.f32 %v4653_v35, 6.0  ;;  %v4601_v16 = vadd.f32 %v4600_v20, %v4488_v11  ;;  %v4517_v35 = vpop.f32.mrf.mxu1  ;;  %v4401_v11 = vadd.f32 %v8335_v19, %v8355_v1 }
 0x3e3   :  { %v4602_v40 = vpop.f32.mrf.mxu0  ;;  %v4508_v23 = vadd.f32 %v8425_v55, %v4395_v62  ;;  %v4407_v19 = vadd.f32 %v8343_v25, %v8355_v1  ;;  %v7039_v62 = vld [vmem:[#allocation9 + $0x48] sm:$0xff]  }
 0x3e4   :  { %v4686_v9 = vmin.f32 %v4654_v6, 6.0  ;;  %v4603_v37 = vadd.f32 %v4602_v40, %v4490_v52  ;;  %v4742_v0 = vpack.c.bf16 %v4685_v41, %v4683_v47  ;;  %v4655_v58 = vmax.f32 %v4601_v16, 0.0  ;;  %v4519_v41 = vpop.f32.mrf.mxu1  ;;  %6329 = vmatprep.subr.bf16.mxu0 %v7039_v62 }
 0x3e5   :  { %v4604_v36 = vpop.f32.mrf.mxu0  ;;  %v4510_v6 = vadd.f32 %v4509_v10, %v4397_v46 }
 0x3e6   :  { %v4743_v33 = vpack.c.bf16 %v4686_v9, %v4684_v53  ;;  %v4605_v54 = vadd.f32 %v4604_v36, %v4492_v48  ;;  %v4656_v38 = vmax.f32 %v4603_v37, 0.0  ;;  %v4687_v27 = vmin.f32 %v4655_v58, 6.0  ;;  %v4521_v10 = vpop.f32.mrf.mxu1 }
 0x3e7   :  { %v4606_v63 = vpop.f32.mrf.mxu0  ;;  %v4512_v53 = vadd.f32 %v4511_v51, %v4399_v17  ;;  %v4405_v51 = vadd.f32 %v8339_v61, %v8358_v42  ;;  %v4520_v58 = vadd.f32 %v4519_v41, %v4407_v19  ;;  %v7042_v17 = vld [vmem:[#allocation9] sm:$0xff]  }
 0x3e8   :  { %v4657_v28 = vmax.f32 %v4605_v54, 0.0  ;;  %v4607_v49 = vadd.f32 %v4606_v63, %v4494_v57  ;;  %4985 = vmatprep.mubr.bf16.mxu1 %v4743_v33  ;;  %v4688_v43 = vmin.f32 %v4656_v38, 6.0  ;;  %v4514_v57 = vadd.f32 %v4513_v60, %v4401_v11  ;;  %v4523_v25 = vpop.f32.mrf.mxu1  ;;  %v4735_v11 = vld [vmem:[%s8631_s8] sm:$0x3] }
 0x3e9   :  { %v4610_v56 = vpop.f32.mrf.mxu0  ;;  %4986 = vmatmul.mubr.bf16.gmra.mxu1 %v4742_v0 }
 0x3ea   :  { %v4658_v12 = vmax.f32 %v4607_v49, 0.0  ;;  %v4689_v30 = vmin.f32 %v4657_v28, 6.0  ;;  %v4611_v32 = vadd.f32 %v4610_v56, %v4498_v29  ;;  %v8699_v49 = vld [vmem:[#allocation22_spill] sm:$0xff] }
 0x3eb   :  { %v4612_v24 = vpop.f32.mrf.mxu0  ;;  %v4409_v18 = vadd.f32 %v8699_v49, %v8358_v42 }
 0x3ec   :  { %v4690_v31 = vmin.f32 %v4658_v12, 6.0  ;;  %v4613_v34 = vadd.f32 %v4612_v24, %v4500_v21  ;;  %v4744_v39 = vpack.c.bf16 %v4689_v30, %v4687_v27  ;;  %v4659_v2 = vmax.f32 %v4611_v32, 0.0 }
 0x3ed   :  { %v4614_v22 = vpop.f32.mrf.mxu0  ;;  %v4411_v21 = vadd.f32 %v8700_v5, %v8355_v1  ;;  %v4518_v12 = vadd.f32 %v4517_v35, %v4405_v51  ;;  %v4522_v60 = vadd.f32 %v4521_v10, %v4409_v18 }
 0x3ee   :  { %v4745_v45 = vpack.c.bf16 %v4690_v31, %v4688_v43  ;;  %v4615_v3 = vadd.f32 %v4614_v22, %v4502_v15  ;;  %v4660_v50 = vmax.f32 %v4613_v34, 0.0  ;;  %v4691_v47 = vmin.f32 %v4659_v2, 6.0  ;;  %v7040_v2 = vld [vmem:[#allocation9 + $0x8] sm:$0xff]  }
 0x3ef   :  { %v4616_v59 = vpop.f32.mrf.mxu0  ;;  %v4524_v34 = vadd.f32 %v4523_v25, %v4411_v21  ;;  %6330 = vmatpush3.bf16.msra.mxu0 %v7040_v2 }
 0x3f0   :  { %v4661_v8 = vmax.f32 %v4615_v3, 0.0  ;;  %v4617_v20 = vadd.f32 %v4616_v59, %v4504_v7  ;;  %4995 = vmatprep.mubr.bf16.mxu1 %v4745_v45  ;;  %v4692_v9 = vmin.f32 %v4660_v50, 6.0 }
 0x3f1   :  { %v4620_v52 = vpop.f32.mrf.mxu0  ;;  %4996 = vmatmul.mubr.bf16.gmra.mxu1 %v4744_v39 }
 0x3f2   :  { %v4662_v26 = vmax.f32 %v4617_v20, 0.0  ;;  %v4693_v40 = vmin.f32 %v4661_v8, 6.0  ;;  %v4621_v16 = vadd.f32 %v4620_v52, %v4508_v23  ;;  %v7041_v52 = vld [vmem:[#allocation9 + $0x40] sm:$0xff]   ;;  %v8701_v23 = vld [vmem:[#allocation15_spill] sm:$0xff] }
 0x3f3   :  { %v4622_v48 = vpop.f32.mrf.mxu0  ;;  %6331 = vmatprep.subr.bf16.mxu0 %v7041_v52  ;;  %v8478_v41 = vrot.slane %v4735_v11, %v8701_v23 }
 0x3f4   :  { %v4694_v37 = vmin.f32 %v4662_v26, 6.0  ;;  %v4623_v14 = vadd.f32 %v4622_v48, %v4510_v6  ;;  %v4746_v54 = vpack.c.bf16 %v4693_v40, %v4691_v47  ;;  %v4663_v38 = vmax.f32 %v4621_v16, 0.0  ;;  %6332 = vmatpush3.bf16.msra.mxu0 %v7042_v17  ;;  %v7043_v6 = vld [vmem:[%s8634_s11 + $0x38] sm:$0xff]   ;;  %v7044_v26 = vld [vmem:[%s8634_s11 + $0x30] sm:$0xff]   ;;  %v8702_v40 = vld [vmem:[#allocation14_spill] sm:$0xff] }
 0x3f5   :  { %v4624_v36 = vpop.f32.mrf.mxu0  ;;  %6397 = vmatprep.subr.bf16.mxu1 %v7043_v6  ;;  %v8481_v48 = vrot.slane %v4735_v11, %v8702_v40 }
 0x3f6   :  { %v4747_v33 = vpack.c.bf16 %v4694_v37, %v4692_v9  ;;  %v4625_v13 = vadd.f32 %v4624_v36, %v4512_v53  ;;  %v4664_v55 = vmax.f32 %v4623_v14, 0.0  ;;  %v4695_v61 = vmin.f32 %v4663_v38, 6.0  ;;  %6398 = vmatpush3.bf16.msra.mxu1 %v7043_v6 }
 0x3f7   :  { %v4626_v0 = vpop.f32.mrf.mxu0  ;;  %6399 = vmatprep.subr.bf16.mxu1 %v7044_v26 }
 0x3f8   :  { %v4665_v63 = vmax.f32 %v4625_v13, 0.0  ;;  %v4627_v44 = vadd.f32 %v4626_v0, %v4514_v57  ;;  %5005 = vmatprep.mubr.bf16.mxu1 %v4747_v33  ;;  %v4696_v30 = vmin.f32 %v4664_v55, 6.0 }
 0x3f9   :  { %v4630_v28 = vpop.f32.mrf.mxu0  ;;  %5006 = vmatmul.mubr.bf16.gmra.mxu1 %v4746_v54 }
 0x3fa   :  { %v4666_v56 = vmax.f32 %v4627_v44, 0.0  ;;  %v4697_v4 = vmin.f32 %v4665_v63, 6.0  ;;  %v4631_v43 = vadd.f32 %v4630_v28, %v4518_v12  ;;  %6400 = vmatpush3.bf16.msra.mxu1 %v7044_v26 }
 0x3fb   :  { %v4632_v29 = vpop.f32.mrf.mxu0 }
 0x3fc   :  { %v4698_v24 = vmin.f32 %v4666_v56, 6.0  ;;  %v4633_v15 = vadd.f32 %v4632_v29, %v4520_v58  ;;  %v4748_v42 = vpack.c.bf16 %v4697_v4, %v4695_v61  ;;  %v4667_v1 = vmax.f32 %v4631_v43, 0.0 }
 0x3fd   :  { %v4634_v31 = vpop.f32.mrf.mxu0 }
 0x3fe   :  { %v4749_v27 = vpack.c.bf16 %v4698_v24, %v4696_v30  ;;  %v4635_v32 = vadd.f32 %v4634_v31, %v4522_v60  ;;  %v4668_v7 = vmax.f32 %v4633_v15, 0.0  ;;  %v4699_v50 = vmin.f32 %v4667_v1, 6.0 }
 0x3ff   :  { %v4636_v22 = vpop.f32.mrf.mxu0 }
 0x400   :  { %v4669_v45 = vmax.f32 %v4635_v32, 0.0  ;;  %v4637_v3 = vadd.f32 %v4636_v22, %v4524_v34  ;;  %5015 = vmatprep.mubr.bf16.mxu1 %v4749_v27  ;;  %v4700_v59 = vmin.f32 %v4668_v7, 6.0 }
 0x401   :  { %5016 = vmatmul.mubr.bf16.gmra.mxu1 %v4748_v42 }
 0x402   :  { %v4670_v35 = vmax.f32 %v4637_v3, 0.0  ;;  %v4701_v39 = vmin.f32 %v4669_v45, 6.0 }
 0x404   :  { %v4702_v46 = vmin.f32 %v4670_v35, 6.0  ;;  %v4750_v20 = vpack.c.bf16 %v4701_v39, %v4699_v50 }
 0x406   :  { %v4751_v8 = vpack.c.bf16 %v4702_v46, %v4700_v59 }
 0x408   :  { %5025 = vmatprep.mubr.bf16.mxu1 %v4751_v8 }
 0x409   :  { %5026 = vmatmul.mubr.bf16.gmra.mxu1 %v4750_v20 }
 0x491   :  { %v4957_v53 = vpop.f32.mrf.mxu1 }
 0x492   :  { %v4958_v14 = vadd.f32 %v4957_v53, %v8481_v48 }
 0x493   :  { %v4959_v9 = vpop.f32.mrf.mxu1 }
 0x494   :  { %v4960_v37 = vadd.f32 %v4959_v9, %v8478_v41  ;;  %v5036_v10 = vmax.f32 %v4958_v14, 0.0 }
 0x495   :  { %v4961_v47 = vpop.f32.mrf.mxu1 }
 0x496   :  { %v4962_v16 = vadd.f32 %v4961_v47, %v8481_v48  ;;  %v5037_v57 = vmax.f32 %v4960_v37, 0.0  ;;  %v5068_v38 = vmin.f32 %v5036_v10, 6.0 }
 0x497   :  { %v4963_v36 = vpop.f32.mrf.mxu1 }
 0x498   :  { %v5038_v33 = vmax.f32 %v4962_v16, 0.0  ;;  %v4964_v13 = vadd.f32 %v4963_v36, %v8478_v41  ;;  %v5069_v63 = vmin.f32 %v5037_v57, 6.0 }
 0x499   :  { %v4967_v54 = vpop.f32.mrf.mxu1 }
 0x49a   :  { %v5039_v0 = vmax.f32 %v4964_v13, 0.0  ;;  %v5070_v19 = vmin.f32 %v5038_v33, 6.0  ;;  %v4968_v28 = vadd.f32 %v4967_v54, %v8481_v48 }
 0x49b   :  { %v4969_v55 = vpop.f32.mrf.mxu1 }
 0x49c   :  { %v5071_v44 = vmin.f32 %v5039_v0, 6.0  ;;  %v4970_v51 = vadd.f32 %v4969_v55, %v8478_v41  ;;  %v5133_v56 = vpack.c.bf16 %v5070_v19, %v5068_v38  ;;  %v5040_v4 = vmax.f32 %v4968_v28, 0.0 }
 0x49d   :  { %v4971_v49 = vpop.f32.mrf.mxu1 }
 0x49e   :  { %v5134_v18 = vpack.c.bf16 %v5071_v44, %v5069_v63  ;;  %v4972_v58 = vadd.f32 %v4971_v49, %v8481_v48  ;;  %v5041_v21 = vmax.f32 %v4970_v51, 0.0  ;;  %v5072_v31 = vmin.f32 %v5040_v4, 6.0 }
 0x49f   :  { %v4973_v5 = vpop.f32.mrf.mxu1 }
 0x4a0   :  { %v5042_v12 = vmax.f32 %v4972_v58, 0.0  ;;  %v4974_v25 = vadd.f32 %v4973_v5, %v8478_v41  ;;  %5283 = vmatprep.mubr.bf16.mxu0 %v5134_v18  ;;  %v5073_v15 = vmin.f32 %v5041_v21, 6.0 }
 0x4a1   :  { %v4977_v29 = vpop.f32.mrf.mxu1  ;;  %5284 = vmatmul.mubr.bf16.vlgmr.msra.gmra.mxu0 %v5133_v56 }
 0x4a2   :  { %v5043_v60 = vmax.f32 %v4974_v25, 0.0  ;;  %v5074_v30 = vmin.f32 %v5042_v12, 6.0  ;;  %v4978_v34 = vadd.f32 %v4977_v29, %v8481_v48 }
 0x4a3   :  { %v4979_v24 = vpop.f32.mrf.mxu1 }
 0x4a4   :  { %v5075_v61 = vmin.f32 %v5043_v60, 6.0  ;;  %v4980_v43 = vadd.f32 %v4979_v24, %v8478_v41  ;;  %v5135_v22 = vpack.c.bf16 %v5074_v30, %v5072_v31  ;;  %v5044_v35 = vmax.f32 %v4978_v34, 0.0 }
 0x4a5   :  { %v4981_v27 = vpop.f32.mrf.mxu1 }
 0x4a6   :  { %v5136_v32 = vpack.c.bf16 %v5075_v61, %v5073_v15  ;;  %v4982_v42 = vadd.f32 %v4981_v27, %v8481_v48  ;;  %v5045_v45 = vmax.f32 %v4980_v43, 0.0  ;;  %v5076_v2 = vmin.f32 %v5044_v35, 6.0 }
 0x4a7   :  { %v4983_v7 = vpop.f32.mrf.mxu1 }
 0x4a8   :  { %v5046_v3 = vmax.f32 %v4982_v42, 0.0  ;;  %v4984_v1 = vadd.f32 %v4983_v7, %v8478_v41  ;;  %5291 = vmatprep.mubr.bf16.mxu0 %v5136_v32  ;;  %v5077_v8 = vmin.f32 %v5045_v45, 6.0 }
 0x4a9   :  { %v4987_v39 = vpop.f32.mrf.mxu1  ;;  %5292 = vmatmul.mubr.bf16.gmra.mxu0 %v5135_v22 }
 0x4aa   :  { %v5047_v59 = vmax.f32 %v4984_v1, 0.0  ;;  %v5078_v46 = vmin.f32 %v5046_v3, 6.0  ;;  %v4988_v52 = vadd.f32 %v4987_v39, %v8481_v48 }
 0x4ab   :  { %v4989_v50 = vpop.f32.mrf.mxu1 }
 0x4ac   :  { %v5079_v20 = vmin.f32 %v5047_v59, 6.0  ;;  %v4990_v62 = vadd.f32 %v4989_v50, %v8478_v41  ;;  %v5137_v11 = vpack.c.bf16 %v5078_v46, %v5076_v2  ;;  %v5048_v37 = vmax.f32 %v4988_v52, 0.0 }
 0x4ad   :  { %v4991_v17 = vpop.f32.mrf.mxu1 }
 0x4ae   :  { %v5138_v6 = vpack.c.bf16 %v5079_v20, %v5077_v8  ;;  %v4992_v26 = vadd.f32 %v4991_v17, %v8481_v48  ;;  %v5049_v40 = vmax.f32 %v4990_v62, 0.0  ;;  %v5080_v10 = vmin.f32 %v5048_v37, 6.0 }
 0x4af   :  { %v4993_v23 = vpop.f32.mrf.mxu1 }
 0x4b0   :  { %v5050_v53 = vmax.f32 %v4992_v26, 0.0  ;;  %v4994_v9 = vadd.f32 %v4993_v23, %v8478_v41  ;;  %5299 = vmatprep.mubr.bf16.mxu0 %v5138_v6  ;;  %v5081_v57 = vmin.f32 %v5049_v40, 6.0 }
 0x4b1   :  { %v4997_v14 = vpop.f32.mrf.mxu1  ;;  %5300 = vmatmul.mubr.bf16.gmra.mxu0 %v5137_v11 }
 0x4b2   :  { %v5051_v47 = vmax.f32 %v4994_v9, 0.0  ;;  %v5082_v16 = vmin.f32 %v5050_v53, 6.0  ;;  %v4998_v54 = vadd.f32 %v4997_v14, %v8481_v48 }
 0x4b3   :  { %v4999_v36 = vpop.f32.mrf.mxu1 }
 0x4b4   :  { %v5083_v33 = vmin.f32 %v5051_v47, 6.0  ;;  %v5000_v13 = vadd.f32 %v4999_v36, %v8478_v41  ;;  %v5139_v63 = vpack.c.bf16 %v5082_v16, %v5080_v10  ;;  %v5052_v49 = vmax.f32 %v4998_v54, 0.0 }
 0x4b5   :  { %v5001_v0 = vpop.f32.mrf.mxu1 }
 0x4b6   :  { %v5140_v19 = vpack.c.bf16 %v5083_v33, %v5081_v57  ;;  %v5002_v55 = vadd.f32 %v5001_v0, %v8481_v48  ;;  %v5053_v51 = vmax.f32 %v5000_v13, 0.0  ;;  %v5084_v4 = vmin.f32 %v5052_v49, 6.0  ;;  %v7047_v49 = vld [vmem:[%s8634_s11 + $0x18] sm:$0xff]  }
 0x4b7   :  { %v5003_v44 = vpop.f32.mrf.mxu1 }
 0x4b8   :  { %v5054_v38 = vmax.f32 %v5002_v55, 0.0  ;;  %v5004_v28 = vadd.f32 %v5003_v44, %v8478_v41  ;;  %5307 = vmatprep.mubr.bf16.mxu0 %v5140_v19  ;;  %v5085_v21 = vmin.f32 %v5053_v51, 6.0 }
 0x4b9   :  { %v5007_v18 = vpop.f32.mrf.mxu1  ;;  %5308 = vmatmul.mubr.bf16.gmra.mxu0 %v5139_v63 }
 0x4ba   :  { %v5055_v58 = vmax.f32 %v5004_v28, 0.0  ;;  %v5086_v56 = vmin.f32 %v5054_v38, 6.0  ;;  %v5008_v29 = vadd.f32 %v5007_v18, %v8481_v48  ;;  %v7048_v18 = vld [vmem:[%s8634_s11 + $0x10] sm:$0xff]  }
 0x4bb   :  { %v5009_v5 = vpop.f32.mrf.mxu1 }
 0x4bc   :  { %v5087_v12 = vmin.f32 %v5055_v58, 6.0  ;;  %v5010_v25 = vadd.f32 %v5009_v5, %v8478_v41  ;;  %v5141_v15 = vpack.c.bf16 %v5086_v56, %v5084_v4  ;;  %v5056_v27 = vmax.f32 %v5008_v29, 0.0  ;;  %v7049_v58 = vld [vmem:[%s8634_s11 + $0x8] sm:$0xff]   ;;  %v7050_v56 = vld [vmem:[%s8634_s11] sm:$0xff]  }
 0x4bd   :  { %v5011_v60 = vpop.f32.mrf.mxu1 }
 0x4be   :  { %v5142_v30 = vpack.c.bf16 %v5087_v12, %v5085_v21  ;;  %v5012_v24 = vadd.f32 %v5011_v60, %v8481_v48  ;;  %v5057_v43 = vmax.f32 %v5010_v25, 0.0  ;;  %v5088_v35 = vmin.f32 %v5056_v27, 6.0  ;;  %v8536_v21 = vld [vmem:[%s8633_s10] ss:$0 sm:$0xff] }
 0x4bf   :  { %v5013_v61 = vpop.f32.mrf.mxu1 }
 0x4c0   :  { %v5058_v31 = vmax.f32 %v5012_v24, 0.0  ;;  %v5014_v34 = vadd.f32 %v5013_v61, %v8478_v41  ;;  %5315 = vmatprep.mubr.bf16.mxu0 %v5142_v30  ;;  %v5089_v45 = vmin.f32 %v5057_v43, 6.0 }
 0x4c1   :  { %v5017_v32 = vpop.f32.mrf.mxu1  ;;  %5316 = vmatmul.mubr.bf16.gmra.mxu0 %v5141_v15 }
 0x4c2   :  { %v5059_v42 = vmax.f32 %v5014_v34, 0.0  ;;  %v5090_v22 = vmin.f32 %v5058_v31, 6.0  ;;  %v5018_v39 = vadd.f32 %v5017_v32, %v8481_v48 }
 0x4c3   :  { %v5019_v7 = vpop.f32.mrf.mxu1 }
 0x4c4   :  { %v5091_v3 = vmin.f32 %v5059_v42, 6.0  ;;  %v5020_v1 = vadd.f32 %v5019_v7, %v8478_v41  ;;  %v5143_v8 = vpack.c.bf16 %v5090_v22, %v5088_v35  ;;  %v5060_v17 = vmax.f32 %v5018_v39, 0.0 }
 0x4c5   :  { %v5021_v59 = vpop.f32.mrf.mxu1 }
 0x4c6   :  { %v5144_v46 = vpack.c.bf16 %v5091_v3, %v5089_v45  ;;  %v5022_v50 = vadd.f32 %v5021_v59, %v8481_v48  ;;  %v5061_v62 = vmax.f32 %v5020_v1, 0.0  ;;  %v5092_v37 = vmin.f32 %v5060_v17, 6.0 }
 0x4c7   :  { %v5023_v20 = vpop.f32.mrf.mxu1 }
 0x4c8   :  { %v5062_v2 = vmax.f32 %v5022_v50, 0.0  ;;  %v5024_v52 = vadd.f32 %v5023_v20, %v8478_v41  ;;  %5323 = vmatprep.mubr.bf16.mxu0 %v5144_v46  ;;  %v5093_v40 = vmin.f32 %v5061_v62, 6.0 }
 0x4c9   :  { %v5027_v6 = vpop.f32.mrf.mxu1  ;;  %5324 = vmatmul.mubr.bf16.gmra.mxu0 %v5143_v8 }
 0x4ca   :  { %v5063_v26 = vmax.f32 %v5024_v52, 0.0  ;;  %v5094_v11 = vmin.f32 %v5062_v2, 6.0  ;;  %v5028_v14 = vadd.f32 %v5027_v6, %v8481_v48 }
 0x4cb   :  { %v5029_v23 = vpop.f32.mrf.mxu1 }
 0x4cc   :  { %v5095_v53 = vmin.f32 %v5063_v26, 6.0  ;;  %v5030_v9 = vadd.f32 %v5029_v23, %v8478_v41  ;;  %v5145_v57 = vpack.c.bf16 %v5094_v11, %v5092_v37  ;;  %v5064_v0 = vmax.f32 %v5028_v14, 0.0 }
 0x4cd   :  { %v5031_v47 = vpop.f32.mrf.mxu1 }
 0x4ce   :  { %v5146_v16 = vpack.c.bf16 %v5095_v53, %v5093_v40  ;;  %v5032_v36 = vadd.f32 %v5031_v47, %v8481_v48  ;;  %v5065_v13 = vmax.f32 %v5030_v9, 0.0  ;;  %v5096_v51 = vmin.f32 %v5064_v0, 6.0  ;;  %v7045_v48 = vld [vmem:[%s8634_s11 + $0x28] sm:$0xff]  }
 0x4cf   :  { %v5033_v33 = vpop.f32.mrf.mxu1  ;;  %6401 = vmatprep.subr.bf16.mxu1 %v7045_v48 }
 0x4d0   :  { %v5066_v10 = vmax.f32 %v5032_v36, 0.0  ;;  %v5034_v54 = vadd.f32 %v5033_v33, %v8478_v41  ;;  %5331 = vmatprep.mubr.bf16.mxu0 %v5146_v16  ;;  %v5097_v63 = vmin.f32 %v5065_v13, 6.0  ;;  %6402 = vmatpush3.bf16.msra.mxu1 %v7045_v48  ;;  %v7046_v41 = vld [vmem:[%s8634_s11 + $0x20] sm:$0xff]  }
 0x4d1   :  { %5332 = vmatmul.mubr.bf16.gmra.mxu0 %v5145_v57  ;;  %6403 = vmatprep.subr.bf16.mxu1 %v7046_v41 }
 0x4d2   :  { %v5067_v19 = vmax.f32 %v5034_v54, 0.0  ;;  %v5098_v55 = vmin.f32 %v5066_v10, 6.0 }
 0x4d4   :  { %v5099_v44 = vmin.f32 %v5067_v19, 6.0  ;;  %v5147_v28 = vpack.c.bf16 %v5098_v55, %v5096_v51  ;;  %6404 = vmatpush3.bf16.msra.mxu1 %v7046_v41 }
 0x4d5   :  { %6405 = vmatprep.subr.bf16.mxu1 %v7047_v49 }
 0x4d6   :  { %v5148_v38 = vpack.c.bf16 %v5099_v44, %v5097_v63 }
 0x4d8   :  { %5339 = vmatprep.mubr.bf16.mxu0 %v5148_v38  ;;  %6406 = vmatpush3.bf16.msra.mxu1 %v7047_v49 }
 0x4d9   :  { %5340 = vmatmul.mubr.bf16.gmra.mxu0 %v5147_v28  ;;  %6407 = vmatprep.subr.bf16.mxu1 %v7048_v18 }
 0x4dc   :  { %6408 = vmatpush3.bf16.msra.mxu1 %v7048_v18 }
 0x4dd   :  { %6409 = vmatprep.subr.bf16.mxu1 %v7049_v58 }
 0x4e0   :  { %6410 = vmatpush3.bf16.msra.mxu1 %v7049_v58 }
 0x4e1   :  { %6411 = vmatprep.subr.bf16.mxu1 %v7050_v56 }
 0x4e4   :  { %6412 = vmatpush3.bf16.msra.mxu1 %v7050_v56 }
 0x561   :  { %v6333_v5 = vpop.f32.mrf.mxu0 }
 0x563   :  { %v6334_v12 = vpop.f32.mrf.mxu0 }
 0x564   :  { %v6335_v25 = vadd.f32 %v6334_v12, %v6333_v5 }
 0x565   :  { %v6336_v4 = vpop.f32.mrf.mxu0 }
 0x566   :  { %v5286_v29 = vadd.f32 %v6335_v25, %v8536_v21 }
 0x567   :  { %v6337_v60 = vpop.f32.mrf.mxu0 }
 0x568   :  { %v6338_v30 = vadd.f32 %v6337_v60, %v6336_v4  ;;  %v5348_v15 = vmax.f32 %v5286_v29, 0.0 }
 0x569   :  { %v6339_v24 = vpop.f32.mrf.mxu0 }
 0x56a   :  { %v5289_v61 = vadd.f32 %v6338_v30, %v8536_v21  ;;  %v5364_v32 = vmin.f32 %v5348_v15, 6.0 }
 0x56b   :  { %v6340_v43 = vpop.f32.mrf.mxu0 }
 0x56c   :  { %v5349_v31 = vmax.f32 %v5289_v61, 0.0  ;;  %v6341_v34 = vadd.f32 %v6340_v43, %v6339_v24 }
 0x56d   :  { %v6342_v27 = vpop.f32.mrf.mxu0 }
 0x56e   :  { %v5365_v42 = vmin.f32 %v5349_v31, 6.0  ;;  %v5294_v22 = vadd.f32 %v6341_v34, %v8536_v21 }
 0x56f   :  { %v6343_v7 = vpop.f32.mrf.mxu0 }
 0x570   :  { %v6344_v45 = vadd.f32 %v6343_v7, %v6342_v27  ;;  %v5397_v3 = vpack.c.bf16 %v5365_v42, %v5364_v32  ;;  %v5350_v35 = vmax.f32 %v5294_v22, 0.0 }
 0x571   :  { %v6345_v1 = vpop.f32.mrf.mxu0 }
 0x572   :  { %v5297_v39 = vadd.f32 %v6344_v45, %v8536_v21  ;;  %6413 = vmatprep.mubr.bf16.mxu1 %v5397_v3  ;;  %v5366_v20 = vmin.f32 %v5350_v35, 6.0 }
 0x573   :  { %v6346_v59 = vpop.f32.mrf.mxu0 }
 0x574   :  { %v5351_v46 = vmax.f32 %v5297_v39, 0.0  ;;  %v6347_v50 = vadd.f32 %v6346_v59, %v6345_v1 }
 0x575   :  { %v6348_v8 = vpop.f32.mrf.mxu0 }
 0x576   :  { %v5367_v62 = vmin.f32 %v5351_v46, 6.0  ;;  %v5302_v2 = vadd.f32 %v6347_v50, %v8536_v21 }
 0x577   :  { %v6349_v52 = vpop.f32.mrf.mxu0 }
 0x578   :  { %v5398_v17 = vpack.c.bf16 %v5367_v62, %v5366_v20  ;;  %v6350_v6 = vadd.f32 %v6349_v52, %v6348_v8  ;;  %v5352_v11 = vmax.f32 %v5302_v2, 0.0 }
 0x579   :  { %v6351_v26 = vpop.f32.mrf.mxu0 }
 0x57a   :  { %v5305_v23 = vadd.f32 %v6350_v6, %v8536_v21  ;;  %6414 = vmatmul.mubr.bf16.vlgmr.msra.gmra.mxu1 %v5398_v17  ;;  %v5368_v14 = vmin.f32 %v5352_v11, 6.0 }
 0x57b   :  { %v6352_v40 = vpop.f32.mrf.mxu0 }
 0x57c   :  { %v5353_v53 = vmax.f32 %v5305_v23, 0.0  ;;  %v6353_v9 = vadd.f32 %v6352_v40, %v6351_v26 }
 0x57d   :  { %v6354_v37 = vpop.f32.mrf.mxu0 }
 0x57e   :  { %v5369_v47 = vmin.f32 %v5353_v53, 6.0  ;;  %v5310_v16 = vadd.f32 %v6353_v9, %v8536_v21 }
 0x57f   :  { %v6355_v36 = vpop.f32.mrf.mxu0 }
 0x580   :  { %v6356_v57 = vadd.f32 %v6355_v36, %v6354_v37  ;;  %v5399_v33 = vpack.c.bf16 %v5369_v47, %v5368_v14  ;;  %v5354_v10 = vmax.f32 %v5310_v16, 0.0  ;;  %v8557_v47 = vld [vmem:[%s8635_s12] ss:$0 sm:$0xff] }
 0x581   :  { %v6357_v13 = vpop.f32.mrf.mxu0 }
 0x582   :  { %v5313_v54 = vadd.f32 %v6356_v57, %v8536_v21  ;;  %6417 = vmatprep.mubr.bf16.mxu1 %v5399_v33  ;;  %v5370_v44 = vmin.f32 %v5354_v10, 6.0 }
 0x583   :  { %v6358_v0 = vpop.f32.mrf.mxu0 }
 0x584   :  { %v5355_v19 = vmax.f32 %v5313_v54, 0.0  ;;  %v6359_v55 = vadd.f32 %v6358_v0, %v6357_v13 }
 0x585   :  { %v6360_v63 = vpop.f32.mrf.mxu0 }
 0x586   :  { %v5371_v51 = vmin.f32 %v5355_v19, 6.0  ;;  %v5318_v38 = vadd.f32 %v6359_v55, %v8536_v21 }
 0x587   :  { %v6361_v28 = vpop.f32.mrf.mxu0 }
 0x588   :  { %v5400_v48 = vpack.c.bf16 %v5371_v51, %v5370_v44  ;;  %v6362_v41 = vadd.f32 %v6361_v28, %v6360_v63  ;;  %v5356_v18 = vmax.f32 %v5318_v38, 0.0 }
 0x589   :  { %v6363_v49 = vpop.f32.mrf.mxu0 }
 0x58a   :  { %v5321_v58 = vadd.f32 %v6362_v41, %v8536_v21  ;;  %6418 = vmatmul.mubr.bf16.gmra.mxu1 %v5400_v48  ;;  %v5372_v4 = vmin.f32 %v5356_v18, 6.0 }
 0x58b   :  { %v6364_v56 = vpop.f32.mrf.mxu0 }
 0x58c   :  { %v5357_v5 = vmax.f32 %v5321_v58, 0.0  ;;  %v6365_v12 = vadd.f32 %v6364_v56, %v6363_v49 }
 0x58d   :  { %v6366_v25 = vpop.f32.mrf.mxu0 }
 0x58e   :  { %v5373_v29 = vmin.f32 %v5357_v5, 6.0  ;;  %v5326_v60 = vadd.f32 %v6365_v12, %v8536_v21 }
 0x58f   :  { %v6367_v30 = vpop.f32.mrf.mxu0 }
 0x590   :  { %v6368_v24 = vadd.f32 %v6367_v30, %v6366_v25  ;;  %v5401_v15 = vpack.c.bf16 %v5373_v29, %v5372_v4  ;;  %v5358_v43 = vmax.f32 %v5326_v60, 0.0 }
 0x591   :  { %v6369_v61 = vpop.f32.mrf.mxu0 }
 0x592   :  { %v5329_v31 = vadd.f32 %v6368_v24, %v8536_v21  ;;  %6421 = vmatprep.mubr.bf16.mxu1 %v5401_v15  ;;  %v5374_v22 = vmin.f32 %v5358_v43, 6.0 }
 0x593   :  { %v6370_v34 = vpop.f32.mrf.mxu0 }
 0x594   :  { %v5359_v27 = vmax.f32 %v5329_v31, 0.0  ;;  %v6371_v32 = vadd.f32 %v6370_v34, %v6369_v61 }
 0x595   :  { %v6372_v42 = vpop.f32.mrf.mxu0 }
 0x596   :  { %v5375_v7 = vmin.f32 %v5359_v27, 6.0  ;;  %v5334_v45 = vadd.f32 %v6371_v32, %v8536_v21 }
 0x597   :  { %v6373_v3 = vpop.f32.mrf.mxu0 }
 0x598   :  { %v5402_v1 = vpack.c.bf16 %v5375_v7, %v5374_v22  ;;  %v6374_v35 = vadd.f32 %v6373_v3, %v6372_v42  ;;  %v5360_v59 = vmax.f32 %v5334_v45, 0.0 }
 0x599   :  { %v6375_v39 = vpop.f32.mrf.mxu0 }
 0x59a   :  { %v5337_v46 = vadd.f32 %v6374_v35, %v8536_v21  ;;  %6422 = vmatmul.mubr.bf16.gmra.mxu1 %v5402_v1  ;;  %v5376_v2 = vmin.f32 %v5360_v59, 6.0 }
 0x59b   :  { %v6376_v50 = vpop.f32.mrf.mxu0 }
 0x59c   :  { %v5361_v8 = vmax.f32 %v5337_v46, 0.0  ;;  %v6377_v20 = vadd.f32 %v6376_v50, %v6375_v39 }
 0x59d   :  { %v6378_v62 = vpop.f32.mrf.mxu0 }
 0x59e   :  { %v5377_v52 = vmin.f32 %v5361_v8, 6.0  ;;  %v5342_v17 = vadd.f32 %v6377_v20, %v8536_v21 }
 0x59f   :  { %v6379_v6 = vpop.f32.mrf.mxu0 }
 0x5a0   :  { %v6380_v26 = vadd.f32 %v6379_v6, %v6378_v62  ;;  %v5403_v11 = vpack.c.bf16 %v5377_v52, %v5376_v2  ;;  %v5362_v23 = vmax.f32 %v5342_v17, 0.0 }
 0x5a2   :  { %v5345_v40 = vadd.f32 %v6380_v26, %v8536_v21  ;;  %6425 = vmatprep.mubr.bf16.mxu1 %v5403_v11  ;;  %v5378_v9 = vmin.f32 %v5362_v23, 6.0 }
 0x5a4   :  { %v5363_v53 = vmax.f32 %v5345_v40, 0.0 }
 0x5a6   :  { %v5379_v37 = vmin.f32 %v5363_v53, 6.0 }
 0x5a8   :  { %v5404_v14 = vpack.c.bf16 %v5379_v37, %v5378_v9 }
 0x5aa   :  { %6426 = vmatmul.mubr.bf16.gmra.mxu1 %v5404_v14 }
 0x63a   :  { %v6415_v16 = vpop.f32.mrf.mxu1 }
 0x63b   :  { %v5502_v36 = vadd.f32 %v6415_v16, %v8557_v47 }
 0x63c   :  { %v5493_v57 = vpop.f32.mrf.mxu1 }
 0x63d   :  { %v6111_v33 = vmul.f32 -1.442695, %v5502_v36  ;;  %v5494_v13 = vadd.f32 %v8557_v47, %v5493_v57 }
 0x63e   :  { %v6416_v10 = vpop.f32.mrf.mxu1 }
 0x63f   :  { %7051 = vpow2.f32 %v6111_v33  ;;  %v6109_v21 = vmul.f32 -1.442695, %v5494_v13  ;;  %v5505_v54 = vadd.f32 %v6416_v10, %v8557_v47 }
 0x640   :  { %v5496_v0 = vpop.f32.mrf.mxu1 }
 0x641   :  { %7053 = vpow2.f32 %v6109_v21  ;;  %v6112_v19 = vmul.f32 -1.442695, %v5505_v54  ;;  %v5497_v55 = vadd.f32 %v8557_v47, %v5496_v0 }
 0x643   :  { %7055 = vpow2.f32 %v6112_v19  ;;  %v6110_v63 = vmul.f32 -1.442695, %v5497_v55 }
 0x645   :  { %7057 = vpow2.f32 %v6110_v63 }
 0x64a   :  { %v6419_v44 = vpop.f32.mrf.mxu1 }
 0x64b   :  { %v5518_v51 = vadd.f32 %v6419_v44, %v8557_v47 }
 0x64c   :  { %v7052_v38 = vpop.eup %7051  ;;  %v5509_v28 = vpop.f32.mrf.mxu1 }
 0x64d   :  { %v5606_v48 = vadd.f32 1.0, %v7052_v38  ;;  %v6115_v41 = vmul.f32 -1.442695, %v5518_v51  ;;  %v5510_v49 = vadd.f32 %v8557_v47, %v5509_v28 }
 0x64e   :  { %v7054_v18 = vpop.eup %7053  ;;  %v6420_v58 = vpop.f32.mrf.mxu1 }
 0x64f   :  { %7059 = vrcp.f32 %v5606_v48  ;;  %v5604_v56 = vadd.f32 1.0, %v7054_v18  ;;  %v6113_v5 = vmul.f32 -1.442695, %v5510_v49  ;;  %v5521_v12 = vadd.f32 %v6420_v58, %v8557_v47 }
 0x650   :  { %v7056_v25 = vpop.eup %7055  ;;  %7061 = vpow2.f32 %v6115_v41  ;;  %v5512_v4 = vpop.f32.mrf.mxu1 }
 0x651   :  { %7063 = vrcp.f32 %v5604_v56  ;;  %v5607_v29 = vadd.f32 1.0, %v7056_v25  ;;  %v6116_v60 = vmul.f32 -1.442695, %v5521_v12  ;;  %v5513_v30 = vadd.f32 %v8557_v47, %v5512_v4 }
 0x652   :  { %v7058_v24 = vpop.eup %7057  ;;  %7065 = vpow2.f32 %v6113_v5 }
 0x653   :  { %7067 = vrcp.f32 %v5607_v29  ;;  %v5605_v15 = vadd.f32 1.0, %v7058_v24  ;;  %v6114_v61 = vmul.f32 -1.442695, %v5513_v30 }
 0x654   :  { %7069 = vpow2.f32 %v6116_v60 }
 0x655   :  { %7071 = vrcp.f32 %v5605_v15 }
 0x656   :  { %7073 = vpow2.f32 %v6114_v61 }
 0x65a   :  { %v6423_v43 = vpop.f32.mrf.mxu1 }
 0x65b   :  { %v5534_v31 = vadd.f32 %v6423_v43, %v8557_v47 }
 0x65c   :  { %v7060_v34 = vpop.eup %7059  ;;  %v5525_v27 = vpop.f32.mrf.mxu1 }
 0x65d   :  { %v7062_v32 = vpop.eup %7061  ;;  %5654 = vst [vmem:[%s8636_s13 + $0x10] sm:$0xff] %v7060_v34  ;;  %v6119_v42 = vmul.f32 -1.442695, %v5534_v31  ;;  %v5526_v22 = vadd.f32 %v8557_v47, %v5525_v27 }
 0x65e   :  { %v7064_v7 = vpop.eup %7063  ;;  %v5610_v45 = vadd.f32 1.0, %v7062_v32  ;;  %v6424_v3 = vpop.f32.mrf.mxu1 }
 0x65f   :  { %v7066_v1 = vpop.eup %7065  ;;  %5652 = vst [vmem:[%s8636_s13] sm:$0xff] %v7064_v7  ;;  %7075 = vpow2.f32 %v6119_v42  ;;  %v6117_v35 = vmul.f32 -1.442695, %v5526_v22  ;;  %v5537_v39 = vadd.f32 %v6424_v3, %v8557_v47 }
 0x660   :  { %v7068_v59 = vpop.eup %7067  ;;  %7077 = vrcp.f32 %v5610_v45  ;;  %v5608_v46 = vadd.f32 1.0, %v7066_v1  ;;  %v5528_v50 = vpop.f32.mrf.mxu1 }
 0x661   :  { %v7070_v8 = vpop.eup %7069  ;;  %5655 = vst [vmem:[%s8636_s13 + $0x18] sm:$0xff] %v7068_v59  ;;  %7079 = vpow2.f32 %v6117_v35  ;;  %v6120_v20 = vmul.f32 -1.442695, %v5537_v39  ;;  %v5529_v62 = vadd.f32 %v8557_v47, %v5528_v50 }
 0x662   :  { %v7072_v2 = vpop.eup %7071  ;;  %7081 = vrcp.f32 %v5608_v46  ;;  %v5611_v52 = vadd.f32 1.0, %v7070_v8 }
 0x663   :  { %v7074_v17 = vpop.eup %7073  ;;  %5653 = vst [vmem:[%s8636_s13 + $0x8] sm:$0xff] %v7072_v2  ;;  %7083 = vpow2.f32 %v6120_v20  ;;  %v6118_v6 = vmul.f32 -1.442695, %v5529_v62 }
 0x664   :  { %7085 = vrcp.f32 %v5611_v52  ;;  %v5609_v26 = vadd.f32 1.0, %v7074_v17 }
 0x665   :  { %7087 = vpow2.f32 %v6118_v6 }
 0x666   :  { %7089 = vrcp.f32 %v5609_v26 }
 0x66a   :  { %v6427_v11 = vpop.f32.mrf.mxu1 }
 0x66b   :  { %v5550_v23 = vadd.f32 %v6427_v11, %v8557_v47 }
 0x66c   :  { %v7076_v40 = vpop.eup %7075  ;;  %v5541_v53 = vpop.f32.mrf.mxu1 }
 0x66d   :  { %v7078_v9 = vpop.eup %7077  ;;  %v5614_v37 = vadd.f32 1.0, %v7076_v40  ;;  %v6123_v14 = vmul.f32 -1.442695, %v5550_v23  ;;  %v5542_v16 = vadd.f32 %v8557_v47, %v5541_v53 }
 0x66e   :  { %v7080_v36 = vpop.eup %7079  ;;  %5658 = vst [vmem:[%s8636_s13 + $0x30] sm:$0xff] %v7078_v9  ;;  %v6428_v57 = vpop.f32.mrf.mxu1 }
 0x66f   :  { %v7082_v33 = vpop.eup %7081  ;;  %7091 = vrcp.f32 %v5614_v37  ;;  %v5612_v13 = vadd.f32 1.0, %v7080_v36  ;;  %v6121_v10 = vmul.f32 -1.442695, %v5542_v16  ;;  %v5553_v21 = vadd.f32 %v6428_v57, %v8557_v47 }
 0x670   :  { %v7084_v54 = vpop.eup %7083  ;;  %5656 = vst [vmem:[%s8636_s13 + $0x20] sm:$0xff] %v7082_v33  ;;  %7093 = vpow2.f32 %v6123_v14  ;;  %v5544_v0 = vpop.f32.mrf.mxu1 }
 0x671   :  { %v7086_v19 = vpop.eup %7085  ;;  %7095 = vrcp.f32 %v5612_v13  ;;  %v5615_v55 = vadd.f32 1.0, %v7084_v54  ;;  %v6124_v63 = vmul.f32 -1.442695, %v5553_v21  ;;  %v5545_v44 = vadd.f32 %v8557_v47, %v5544_v0 }
 0x672   :  { %v7088_v51 = vpop.eup %7087  ;;  %5659 = vst [vmem:[%s8636_s13 + $0x38] sm:$0xff] %v7086_v19  ;;  %7097 = vpow2.f32 %v6121_v10 }
 0x673   :  { %v7090_v38 = vpop.eup %7089  ;;  %7099 = vrcp.f32 %v5615_v55  ;;  %v5613_v28 = vadd.f32 1.0, %v7088_v51  ;;  %v6122_v48 = vmul.f32 -1.442695, %v5545_v44 }
 0x674   :  { %5657 = vst [vmem:[%s8636_s13 + $0x28] sm:$0xff] %v7090_v38  ;;  %7101 = vpow2.f32 %v6124_v63 }
 0x675   :  { %7103 = vrcp.f32 %v5613_v28 }
 0x676   :  { %7105 = vpow2.f32 %v6122_v48 }
 0x67c   :  { %v7092_v41 = vpop.eup %7091 }
 0x67d   :  { %v7094_v49 = vpop.eup %7093  ;;  %5662 = vst [vmem:[%s8636_s13 + $0x50] sm:$0xff] %v7092_v41 }
 0x67e   :  { %v7096_v47 = vpop.eup %7095  ;;  %v5618_v18 = vadd.f32 1.0, %v7094_v49 }
 0x67f   :  { %v7098_v58 = vpop.eup %7097  ;;  %5660 = vst [vmem:[%s8636_s13 + $0x40] sm:$0xff] %v7096_v47 }
 0x680   :  { %v7100_v56 = vpop.eup %7099  ;;  %7107 = vrcp.f32 %v5618_v18  ;;  %v5616_v5 = vadd.f32 1.0, %v7098_v58 }
 0x681   :  { %v7102_v12 = vpop.eup %7101  ;;  %5663 = vst [vmem:[%s8636_s13 + $0x58] sm:$0xff] %v7100_v56 }
 0x682   :  { %v7104_v25 = vpop.eup %7103  ;;  %7109 = vrcp.f32 %v5616_v5  ;;  %v5619_v4 = vadd.f32 1.0, %v7102_v12 }
 0x683   :  { %v7106_v29 = vpop.eup %7105  ;;  %5661 = vst [vmem:[%s8636_s13 + $0x48] sm:$0xff] %v7104_v25 }
 0x684   :  { %7111 = vrcp.f32 %v5619_v4  ;;  %v5617_v60 = vadd.f32 1.0, %v7106_v29 }
 0x686   :  { %7113 = vrcp.f32 %v5617_v60 }
 0x68d   :  { %v7108_v30 = vpop.eup %7107 }
 0x68e   :  { %5666 = vst [vmem:[%s8636_s13 + $0x70] sm:$0xff] %v7108_v30 }
 0x68f   :  { %v7110_v24 = vpop.eup %7109 }
 0x690   :  { %5664 = vst [vmem:[%s8636_s13 + $0x60] sm:$0xff] %v7110_v24 }
 0x691   :  { %v7112_v15 = vpop.eup %7111 }
 0x692   :  { %5667 = vst [vmem:[%s8636_s13 + $0x78] sm:$0xff] %v7112_v15 }
 0x693   :  { %v7114_v61 = vpop.eup %7113 }
 0x694   :  { %5665 = vst [vmem:[%s8636_s13 + $0x68] sm:$0xff] %v7114_v61 }
 0x695   :  { %5672 = vsyncpa [#allocation3], 1 }
 0x696   :  { %5673 = vsyncpa [#allocation5], 1 }
 0x697   :  { %5674 = vsyncpa [#allocation8], 1 }

</bundles_post_ra>
